<compile_context>
chip_gen: v5e
topology: v5e:2x2
jax: 0.10.0
libtpu: 0.0.40
codegen_flags: <defaults>
</compile_context>

<pallas_src>
import functools

import jax
import jax.numpy as jnp
from jax.experimental import pallas as pl
from jax.experimental.pallas import tpu as pltpu

# Layer sizes of the autoencoder (encoder then decoder).
_DIMS = [28 * 28, 128, 64, 36, 18, 9, 18, 36, 64, 128, 28 * 28]
# Activation after each linear layer: 'relu', 'none' (encoder bottleneck), 'sigmoid'.
_ACTS = ["relu", "relu", "relu", "relu", "none",
         "relu", "relu", "relu", "relu", "sigmoid"]

_FEAT = 28 * 28                             # 784 (kept unpadded: 49*16 is bf16-clean)
# Lane-padded layer widths: all hidden dims -> 128; in/out feature dim stays 784.
_PAD_DIMS = [_FEAT] + [128] * 9 + [_FEAT]


def _round_up(n, m):
    return ((n + m - 1) // m) * m


def _sharp_kernel(*refs):
    # refs = (x_ref, w0, b0, w1, b1, ..., w9, b9, out_ref)
    x_ref = refs[0]
    out_ref = refs[-1]
    param_refs = refs[1:-1]

    # f32 (tile_b, 784) tile -> bf16 operand (cast is VPU filler under DMA/MXU).
    h = x_ref[...].astype(jnp.bfloat16)
    for li, act in enumerate(_ACTS):
        w = param_refs[2 * li][...]                  # bf16 (in_pad, out_pad)
        b = param_refs[2 * li + 1][...]              # f32  (1, out_pad)
        z = jnp.dot(h, w, preferred_element_type=jnp.float32) + b
        if act == "relu":
            h = jnp.maximum(z, 0.0).astype(jnp.bfloat16)
        elif act == "none":                          # encoder bottleneck
            h = z.astype(jnp.bfloat16)
        else:
            # sigmoid on the final 784-wide layer: single EUP tanh + one FMA.
            # Kept in f32 (v5e has no bf16 VPU/EUP); hidden under the HBM stream.
            h = 0.5 * (jnp.tanh(0.5 * z) + 1.0)
    out_ref[...] = h.astype(out_ref.dtype)


def init_params(key):
    """PyTorch-default-style deterministic init: U(-1/sqrt(fan_in), +1/sqrt(fan_in))."""
    params = []
    for li in range(len(_ACTS)):
        fan_in, fan_out = _DIMS[li], _DIMS[li + 1]
        key, kw, kb = jax.random.split(key, 3)
        bound = 1.0 / (fan_in ** 0.5)
        w = jax.random.uniform(kw, (fan_in, fan_out), jnp.float32, -bound, bound)
        b = jax.random.uniform(kb, (1, fan_out), jnp.float32, -bound, bound)
        params.append((w, b))
    return params


def _prep_params(params):
    """Zero-pad every hidden dim to 128 lanes; weights -> bf16, biases stay f32."""
    flat = []
    for li, (w, b) in enumerate(params):
        w = jnp.asarray(w, jnp.float32)
        b = jnp.asarray(b, jnp.float32).reshape(1, -1)
        kin, kout = _PAD_DIMS[li], _PAD_DIMS[li + 1]
        w = jnp.pad(w, ((0, kin - w.shape[0]), (0, kout - w.shape[1])))
        b = jnp.pad(b, ((0, 0), (0, kout - b.shape[1])))
        flat.append(w.astype(jnp.bfloat16))
        flat.append(b)
    return flat


@functools.partial(jax.jit, static_argnames=("tile_b",))
def sharp_forward(x_nchw, params, tile_b=1024):
    """x_nchw: (B, C, H, W) with C*H*W == 784. Returns (B, 784) float32."""
    B = x_nchw.shape[0]
    x = x_nchw.reshape(B, -1).astype(jnp.float32)    # nn.Flatten (astype is a no-op for f32)
    assert x.shape[1] == _FEAT, f"expected {_FEAT} features, got {x.shape[1]}"

    # Batch tile: fill the MXU (>=128 rows) without over-padding tiny batches.
    b_128 = _round_up(B, 128)
    tile_b = max(128, min(tile_b, b_128))
    # >=2 grid steps when it costs zero extra padding (v7x has 2 TCs per chip
    # and shards the "parallel" grid axis across them).
    if tile_b == b_128 and tile_b % 256 == 0:
        tile_b //= 2
    b_pad = _round_up(B, tile_b)

    if b_pad != B:                                   # row pad only; no column pad/cast pass
        x = jnp.pad(x, ((0, b_pad - B), (0, 0)))

    flat_params = _prep_params(params)

    in_specs = [pl.BlockSpec((tile_b, _FEAT), lambda i: (i, 0))]
    for p in flat_params:
        # Constant index_map -> params stay resident in VMEM across grid steps.
        # (Could be single-buffered / packed; savings are <1 MiB VMEM + startup DMAs.)
        in_specs.append(pl.BlockSpec(p.shape, lambda i: (0, 0)))
    out_spec = pl.BlockSpec((tile_b, _FEAT), lambda i: (i, 0))

    # Advisory cost estimate with the true (padded) FLOP / byte counts.
    flops = 2 * b_pad * sum(_PAD_DIMS[i] * _PAD_DIMS[i + 1] for i in range(len(_ACTS)))
    bytes_accessed = (b_pad * _FEAT * 4               # f32 input
                      + b_pad * _FEAT * 4             # f32 output
                      + sum(p.size * p.dtype.itemsize for p in flat_params))
    cost = pl.CostEstimate(flops=flops,
                           transcendentals=b_pad * _FEAT,   # final-layer tanh
                           bytes_accessed=bytes_accessed)

    # VMEM budget: double-buffered f32 in/out tiles + live activations + params
    # + headroom.  48 MiB floor (fits v7x's 64 MiB at the default tile_b);
    # grows toward 112 MiB only for large caller-requested tiles on v5e/v6e.
    vmem_need = 16 * tile_b * _FEAT + 8 * tile_b * _FEAT + (8 << 20)
    vmem_limit = int(min(112 << 20, max(48 << 20, vmem_need)))

    out = pl.pallas_call(
        _sharp_kernel,
        out_shape=jax.ShapeDtypeStruct((b_pad, _FEAT), jnp.float32),
        grid_spec=pltpu.PrefetchScalarGridSpec(
            num_scalar_prefetch=0,
            grid=(b_pad // tile_b,),
            in_specs=in_specs,
            out_specs=out_spec,
        ),
        compiler_params=pltpu.CompilerParams(
            dimension_semantics=("parallel",),
            vmem_limit_bytes=vmem_limit,
        ),
        cost_estimate=cost,
    )(x, *flat_params)

    return out[:B]                                   # row slice only (no column copy pass)


def _reference(x_nchw, params):
    """Pure-JAX reference mimicking the kernel's bf16-operand / f32-accum path."""
    h = x_nchw.reshape(x_nchw.shape[0], -1).astype(jnp.bfloat16)
    for li, (w, b) in enumerate(params):
        z = jnp.dot(h, w.astype(jnp.bfloat16),
                    preferred_element_type=jnp.float32) + b.reshape(1, -1)
        if _ACTS[li] == "relu":
            h = jnp.maximum(z, 0.0).astype(jnp.bfloat16)
        elif _ACTS[li] == "none":
            h = z.astype(jnp.bfloat16)
        else:
            h = jax.nn.sigmoid(z)
    return h


if __name__ == "__main__":
    key = jax.random.PRNGKey(0)
    kx, kp = jax.random.split(key)

    # Small MNIST-like batch: (B, C, H, W) = (8, 1, 28, 28)
    x = jax.random.normal(kx, (8, 1, 28, 28), jnp.float32)
    params = init_params(kp)

    # TODO(synk): the PyTorch forward also does print(x.shape); debug side effect omitted.
    out = jax.block_until_ready(sharp_forward(x, params))
    assert out.shape == (8, _FEAT)

    ref = _reference(x, params)
    max_err = float(jnp.max(jnp.abs(out - ref)))
    assert max_err < 2e-2, f"mismatch vs bf16 reference: max abs err {max_err}"

    print("KERNEL_OK")
</pallas_src>

<mosaic_0001>
module attributes {stable_mosaic.version = 11 : i64} {
  func.func @_sharp_kernel(%arg0: i32, %arg1: memref<128x784xf32, #tpu.memory_space<vmem>>, %arg2: memref<784x128xbf16, #tpu.memory_space<vmem>>, %arg3: memref<1x128xf32, #tpu.memory_space<vmem>>, %arg4: memref<128x128xbf16, #tpu.memory_space<vmem>>, %arg5: memref<1x128xf32, #tpu.memory_space<vmem>>, %arg6: memref<128x128xbf16, #tpu.memory_space<vmem>>, %arg7: memref<1x128xf32, #tpu.memory_space<vmem>>, %arg8: memref<128x128xbf16, #tpu.memory_space<vmem>>, %arg9: memref<1x128xf32, #tpu.memory_space<vmem>>, %arg10: memref<128x128xbf16, #tpu.memory_space<vmem>>, %arg11: memref<1x128xf32, #tpu.memory_space<vmem>>, %arg12: memref<128x128xbf16, #tpu.memory_space<vmem>>, %arg13: memref<1x128xf32, #tpu.memory_space<vmem>>, %arg14: memref<128x128xbf16, #tpu.memory_space<vmem>>, %arg15: memref<1x128xf32, #tpu.memory_space<vmem>>, %arg16: memref<128x128xbf16, #tpu.memory_space<vmem>>, %arg17: memref<1x128xf32, #tpu.memory_space<vmem>>, %arg18: memref<128x128xbf16, #tpu.memory_space<vmem>>, %arg19: memref<1x128xf32, #tpu.memory_space<vmem>>, %arg20: memref<128x784xbf16, #tpu.memory_space<vmem>>, %arg21: memref<1x784xf32, #tpu.memory_space<vmem>>, %arg22: memref<128x784xf32, #tpu.memory_space<vmem>>) attributes {dimension_semantics = [#tpu.dimension_semantics<parallel>], iteration_bounds = array<i64: 1>, scalar_prefetch = 0 : i64, scratch_operands = 0 : i64, tpu.core_type = #tpu.core_type<tc>, window_params = [{transform_indices = @transform_0, window_bounds = array<i64: 128, 784>}, {pipeline_mode = #tpu.pipeline_mode<synchronous>, transform_indices = @transform_1, window_bounds = array<i64: 784, 128>}, {pipeline_mode = #tpu.pipeline_mode<synchronous>, transform_indices = @transform_2, window_bounds = array<i64: 1, 128>}, {pipeline_mode = #tpu.pipeline_mode<synchronous>, transform_indices = @transform_3, window_bounds = array<i64: 128, 128>}, {pipeline_mode = #tpu.pipeline_mode<synchronous>, transform_indices = @transform_4, window_bounds = array<i64: 1, 128>}, {pipeline_mode = #tpu.pipeline_mode<synchronous>, transform_indices = @transform_5, window_bounds = array<i64: 128, 128>}, {pipeline_mode = #tpu.pipeline_mode<synchronous>, transform_indices = @transform_6, window_bounds = array<i64: 1, 128>}, {pipeline_mode = #tpu.pipeline_mode<synchronous>, transform_indices = @transform_7, window_bounds = array<i64: 128, 128>}, {pipeline_mode = #tpu.pipeline_mode<synchronous>, transform_indices = @transform_8, window_bounds = array<i64: 1, 128>}, {pipeline_mode = #tpu.pipeline_mode<synchronous>, transform_indices = @transform_9, window_bounds = array<i64: 128, 128>}, {pipeline_mode = #tpu.pipeline_mode<synchronous>, transform_indices = @transform_10, window_bounds = array<i64: 1, 128>}, {pipeline_mode = #tpu.pipeline_mode<synchronous>, transform_indices = @transform_11, window_bounds = array<i64: 128, 128>}, {pipeline_mode = #tpu.pipeline_mode<synchronous>, transform_indices = @transform_12, window_bounds = array<i64: 1, 128>}, {pipeline_mode = #tpu.pipeline_mode<synchronous>, transform_indices = @transform_13, window_bounds = array<i64: 128, 128>}, {pipeline_mode = #tpu.pipeline_mode<synchronous>, transform_indices = @transform_14, window_bounds = array<i64: 1, 128>}, {pipeline_mode = #tpu.pipeline_mode<synchronous>, transform_indices = @transform_15, window_bounds = array<i64: 128, 128>}, {pipeline_mode = #tpu.pipeline_mode<synchronous>, transform_indices = @transform_16, window_bounds = array<i64: 1, 128>}, {pipeline_mode = #tpu.pipeline_mode<synchronous>, transform_indices = @transform_17, window_bounds = array<i64: 128, 128>}, {pipeline_mode = #tpu.pipeline_mode<synchronous>, transform_indices = @transform_18, window_bounds = array<i64: 1, 128>}, {pipeline_mode = #tpu.pipeline_mode<synchronous>, transform_indices = @transform_19, window_bounds = array<i64: 128, 784>}, {pipeline_mode = #tpu.pipeline_mode<synchronous>, transform_indices = @transform_20, window_bounds = array<i64: 1, 784>}, {transform_indices = @transform_21, window_bounds = array<i64: 128, 784>}]} {
    %c0 = arith.constant 0 : index
    %c0_0 = arith.constant 0 : index
    %0 = vector.load %arg1[%c0, %c0_0] : memref<128x784xf32, #tpu.memory_space<vmem>>, vector<128x784xf32>
    %1 = arith.truncf %0 : vector<128x784xf32> to vector<128x784xbf16>
    %c0_1 = arith.constant 0 : index
    %c0_2 = arith.constant 0 : index
    %2 = vector.load %arg2[%c0_1, %c0_2] : memref<784x128xbf16, #tpu.memory_space<vmem>>, vector<784x128xbf16>
    %c0_3 = arith.constant 0 : index
    %c0_4 = arith.constant 0 : index
    %3 = vector.load %arg3[%c0_3, %c0_4] : memref<1x128xf32, #tpu.memory_space<vmem>>, vector<1x128xf32>
    %cst = arith.constant dense<0.000000e+00> : vector<128x128xf32>
    %4 = tpu.matmul %1, %2, %cst {dimension_numbers = #tpu.dot_dimension_numbers<[1], [0], [0], [1], [0, 0, 1, 1], [], []>} : vector<128x784xbf16>, vector<784x128xbf16>, vector<128x128xf32> -> vector<128x128xf32>
    %5 = vector.broadcast %3 : vector<1x128xf32> to vector<128x128xf32>
    %6 = arith.addf %4, %5 : vector<128x128xf32>
    %cst_5 = arith.constant 0.000000e+00 : f32
    %7 = vector.broadcast %cst_5 : f32 to vector<128x128xf32>
    %8 = arith.maximumf %6, %7 : vector<128x128xf32>
    %9 = arith.truncf %8 : vector<128x128xf32> to vector<128x128xbf16>
    %c0_6 = arith.constant 0 : index
    %c0_7 = arith.constant 0 : index
    %10 = vector.load %arg4[%c0_6, %c0_7] : memref<128x128xbf16, #tpu.memory_space<vmem>>, vector<128x128xbf16>
    %c0_8 = arith.constant 0 : index
    %c0_9 = arith.constant 0 : index
    %11 = vector.load %arg5[%c0_8, %c0_9] : memref<1x128xf32, #tpu.memory_space<vmem>>, vector<1x128xf32>
    %cst_10 = arith.constant dense<0.000000e+00> : vector<128x128xf32>
    %12 = tpu.matmul %9, %10, %cst_10 {dimension_numbers = #tpu.dot_dimension_numbers<[1], [0], [0], [1], [0, 0, 1, 1], [], []>} : vector<128x128xbf16>, vector<128x128xbf16>, vector<128x128xf32> -> vector<128x128xf32>
    %13 = vector.broadcast %11 : vector<1x128xf32> to vector<128x128xf32>
    %14 = arith.addf %12, %13 : vector<128x128xf32>
    %cst_11 = arith.constant 0.000000e+00 : f32
    %15 = vector.broadcast %cst_11 : f32 to vector<128x128xf32>
    %16 = arith.maximumf %14, %15 : vector<128x128xf32>
    %17 = arith.truncf %16 : vector<128x128xf32> to vector<128x128xbf16>
    %c0_12 = arith.constant 0 : index
    %c0_13 = arith.constant 0 : index
    %18 = vector.load %arg6[%c0_12, %c0_13] : memref<128x128xbf16, #tpu.memory_space<vmem>>, vector<128x128xbf16>
    %c0_14 = arith.constant 0 : index
    %c0_15 = arith.constant 0 : index
    %19 = vector.load %arg7[%c0_14, %c0_15] : memref<1x128xf32, #tpu.memory_space<vmem>>, vector<1x128xf32>
    %cst_16 = arith.constant dense<0.000000e+00> : vector<128x128xf32>
    %20 = tpu.matmul %17, %18, %cst_16 {dimension_numbers = #tpu.dot_dimension_numbers<[1], [0], [0], [1], [0, 0, 1, 1], [], []>} : vector<128x128xbf16>, vector<128x128xbf16>, vector<128x128xf32> -> vector<128x128xf32>
    %21 = vector.broadcast %19 : vector<1x128xf32> to vector<128x128xf32>
    %22 = arith.addf %20, %21 : vector<128x128xf32>
    %cst_17 = arith.constant 0.000000e+00 : f32
    %23 = vector.broadcast %cst_17 : f32 to vector<128x128xf32>
    %24 = arith.maximumf %22, %23 : vector<128x128xf32>
    %25 = arith.truncf %24 : vector<128x128xf32> to vector<128x128xbf16>
    %c0_18 = arith.constant 0 : index
    %c0_19 = arith.constant 0 : index
    %26 = vector.load %arg8[%c0_18, %c0_19] : memref<128x128xbf16, #tpu.memory_space<vmem>>, vector<128x128xbf16>
    %c0_20 = arith.constant 0 : index
    %c0_21 = arith.constant 0 : index
    %27 = vector.load %arg9[%c0_20, %c0_21] : memref<1x128xf32, #tpu.memory_space<vmem>>, vector<1x128xf32>
    %cst_22 = arith.constant dense<0.000000e+00> : vector<128x128xf32>
    %28 = tpu.matmul %25, %26, %cst_22 {dimension_numbers = #tpu.dot_dimension_numbers<[1], [0], [0], [1], [0, 0, 1, 1], [], []>} : vector<128x128xbf16>, vector<128x128xbf16>, vector<128x128xf32> -> vector<128x128xf32>
    %29 = vector.broadcast %27 : vector<1x128xf32> to vector<128x128xf32>
    %30 = arith.addf %28, %29 : vector<128x128xf32>
    %cst_23 = arith.constant 0.000000e+00 : f32
    %31 = vector.broadcast %cst_23 : f32 to vector<128x128xf32>
    %32 = arith.maximumf %30, %31 : vector<128x128xf32>
    %33 = arith.truncf %32 : vector<128x128xf32> to vector<128x128xbf16>
    %c0_24 = arith.constant 0 : index
    %c0_25 = arith.constant 0 : index
    %34 = vector.load %arg10[%c0_24, %c0_25] : memref<128x128xbf16, #tpu.memory_space<vmem>>, vector<128x128xbf16>
    %c0_26 = arith.constant 0 : index
    %c0_27 = arith.constant 0 : index
    %35 = vector.load %arg11[%c0_26, %c0_27] : memref<1x128xf32, #tpu.memory_space<vmem>>, vector<1x128xf32>
    %cst_28 = arith.constant dense<0.000000e+00> : vector<128x128xf32>
    %36 = tpu.matmul %33, %34, %cst_28 {dimension_numbers = #tpu.dot_dimension_numbers<[1], [0], [0], [1], [0, 0, 1, 1], [], []>} : vector<128x128xbf16>, vector<128x128xbf16>, vector<128x128xf32> -> vector<128x128xf32>
    %37 = vector.broadcast %35 : vector<1x128xf32> to vector<128x128xf32>
    %38 = arith.addf %36, %37 : vector<128x128xf32>
    %39 = arith.truncf %38 : vector<128x128xf32> to vector<128x128xbf16>
    %c0_29 = arith.constant 0 : index
    %c0_30 = arith.constant 0 : index
    %40 = vector.load %arg12[%c0_29, %c0_30] : memref<128x128xbf16, #tpu.memory_space<vmem>>, vector<128x128xbf16>
    %c0_31 = arith.constant 0 : index
    %c0_32 = arith.constant 0 : index
    %41 = vector.load %arg13[%c0_31, %c0_32] : memref<1x128xf32, #tpu.memory_space<vmem>>, vector<1x128xf32>
    %cst_33 = arith.constant dense<0.000000e+00> : vector<128x128xf32>
    %42 = tpu.matmul %39, %40, %cst_33 {dimension_numbers = #tpu.dot_dimension_numbers<[1], [0], [0], [1], [0, 0, 1, 1], [], []>} : vector<128x128xbf16>, vector<128x128xbf16>, vector<128x128xf32> -> vector<128x128xf32>
    %43 = vector.broadcast %41 : vector<1x128xf32> to vector<128x128xf32>
    %44 = arith.addf %42, %43 : vector<128x128xf32>
    %cst_34 = arith.constant 0.000000e+00 : f32
    %45 = vector.broadcast %cst_34 : f32 to vector<128x128xf32>
    %46 = arith.maximumf %44, %45 : vector<128x128xf32>
    %47 = arith.truncf %46 : vector<128x128xf32> to vector<128x128xbf16>
    %c0_35 = arith.constant 0 : index
    %c0_36 = arith.constant 0 : index
    %48 = vector.load %arg14[%c0_35, %c0_36] : memref<128x128xbf16, #tpu.memory_space<vmem>>, vector<128x128xbf16>
    %c0_37 = arith.constant 0 : index
    %c0_38 = arith.constant 0 : index
    %49 = vector.load %arg15[%c0_37, %c0_38] : memref<1x128xf32, #tpu.memory_space<vmem>>, vector<1x128xf32>
    %cst_39 = arith.constant dense<0.000000e+00> : vector<128x128xf32>
    %50 = tpu.matmul %47, %48, %cst_39 {dimension_numbers = #tpu.dot_dimension_numbers<[1], [0], [0], [1], [0, 0, 1, 1], [], []>} : vector<128x128xbf16>, vector<128x128xbf16>, vector<128x128xf32> -> vector<128x128xf32>
    %51 = vector.broadcast %49 : vector<1x128xf32> to vector<128x128xf32>
    %52 = arith.addf %50, %51 : vector<128x128xf32>
    %cst_40 = arith.constant 0.000000e+00 : f32
    %53 = vector.broadcast %cst_40 : f32 to vector<128x128xf32>
    %54 = arith.maximumf %52, %53 : vector<128x128xf32>
    %55 = arith.truncf %54 : vector<128x128xf32> to vector<128x128xbf16>
    %c0_41 = arith.constant 0 : index
    %c0_42 = arith.constant 0 : index
    %56 = vector.load %arg16[%c0_41, %c0_42] : memref<128x128xbf16, #tpu.memory_space<vmem>>, vector<128x128xbf16>
    %c0_43 = arith.constant 0 : index
    %c0_44 = arith.constant 0 : index
    %57 = vector.load %arg17[%c0_43, %c0_44] : memref<1x128xf32, #tpu.memory_space<vmem>>, vector<1x128xf32>
    %cst_45 = arith.constant dense<0.000000e+00> : vector<128x128xf32>
    %58 = tpu.matmul %55, %56, %cst_45 {dimension_numbers = #tpu.dot_dimension_numbers<[1], [0], [0], [1], [0, 0, 1, 1], [], []>} : vector<128x128xbf16>, vector<128x128xbf16>, vector<128x128xf32> -> vector<128x128xf32>
    %59 = vector.broadcast %57 : vector<1x128xf32> to vector<128x128xf32>
    %60 = arith.addf %58, %59 : vector<128x128xf32>
    %cst_46 = arith.constant 0.000000e+00 : f32
    %61 = vector.broadcast %cst_46 : f32 to vector<128x128xf32>
    %62 = arith.maximumf %60, %61 : vector<128x128xf32>
    %63 = arith.truncf %62 : vector<128x128xf32> to vector<128x128xbf16>
    %c0_47 = arith.constant 0 : index
    %c0_48 = arith.constant 0 : index
    %64 = vector.load %arg18[%c0_47, %c0_48] : memref<128x128xbf16, #tpu.memory_space<vmem>>, vector<128x128xbf16>
    %c0_49 = arith.constant 0 : index
    %c0_50 = arith.constant 0 : index
    %65 = vector.load %arg19[%c0_49, %c0_50] : memref<1x128xf32, #tpu.memory_space<vmem>>, vector<1x128xf32>
    %cst_51 = arith.constant dense<0.000000e+00> : vector<128x128xf32>
    %66 = tpu.matmul %63, %64, %cst_51 {dimension_numbers = #tpu.dot_dimension_numbers<[1], [0], [0], [1], [0, 0, 1, 1], [], []>} : vector<128x128xbf16>, vector<128x128xbf16>, vector<128x128xf32> -> vector<128x128xf32>
    %67 = vector.broadcast %65 : vector<1x128xf32> to vector<128x128xf32>
    %68 = arith.addf %66, %67 : vector<128x128xf32>
    %cst_52 = arith.constant 0.000000e+00 : f32
    %69 = vector.broadcast %cst_52 : f32 to vector<128x128xf32>
    %70 = arith.maximumf %68, %69 : vector<128x128xf32>
    %71 = arith.truncf %70 : vector<128x128xf32> to vector<128x128xbf16>
    %c0_53 = arith.constant 0 : index
    %c0_54 = arith.constant 0 : index
    %72 = vector.load %arg20[%c0_53, %c0_54] : memref<128x784xbf16, #tpu.memory_space<vmem>>, vector<128x784xbf16>
    %c0_55 = arith.constant 0 : index
    %c0_56 = arith.constant 0 : index
    %73 = vector.load %arg21[%c0_55, %c0_56] : memref<1x784xf32, #tpu.memory_space<vmem>>, vector<1x784xf32>
    %cst_57 = arith.constant dense<0.000000e+00> : vector<128x784xf32>
    %74 = tpu.matmul %71, %72, %cst_57 {dimension_numbers = #tpu.dot_dimension_numbers<[1], [0], [0], [1], [0, 0, 1, 1], [], []>} : vector<128x128xbf16>, vector<128x784xbf16>, vector<128x784xf32> -> vector<128x784xf32>
    %75 = vector.broadcast %73 : vector<1x784xf32> to vector<128x784xf32>
    %76 = arith.addf %74, %75 : vector<128x784xf32>
    %cst_58 = arith.constant 5.000000e-01 : f32
    %77 = vector.broadcast %cst_58 : f32 to vector<128x784xf32>
    %78 = arith.mulf %77, %76 : vector<128x784xf32>
    %79 = math.tanh %78 : vector<128x784xf32>
    %cst_59 = arith.constant 1.000000e+00 : f32
    %80 = vector.broadcast %cst_59 : f32 to vector<128x784xf32>
    %81 = arith.addf %79, %80 : vector<128x784xf32>
    %cst_60 = arith.constant 5.000000e-01 : f32
    %82 = vector.broadcast %cst_60 : f32 to vector<128x784xf32>
    %83 = arith.mulf %82, %81 : vector<128x784xf32>
    %c0_61 = arith.constant 0 : index
    %c0_62 = arith.constant 0 : index
    %84 = vector.load %arg22[%c0_61, %c0_62] : memref<128x784xf32, #tpu.memory_space<vmem>>, vector<128x784xf32>
    tpu.vector_store %arg22[%c0_61, %c0_62], %83 {strides = array<i32>} : memref<128x784xf32, #tpu.memory_space<vmem>>, vector<128x784xf32>,
    return
  }
  func.func @transform_0(%arg0: i32) -> (i32, i32) {
    %c0_i32 = arith.constant 0 : i32
    %c0_i32_0 = arith.constant 0 : i32
    return %arg0, %c0_i32 : i32, i32
  }
  func.func @transform_1(%arg0: i32) -> (i32, i32) {
    %c0_i32 = arith.constant 0 : i32
    %c0_i32_0 = arith.constant 0 : i32
    %c0_i32_1 = arith.constant 0 : i32
    return %c0_i32, %c0_i32_0 : i32, i32
  }
  func.func @transform_2(%arg0: i32) -> (i32, i32) {
    %c0_i32 = arith.constant 0 : i32
    %c0_i32_0 = arith.constant 0 : i32
    %c0_i32_1 = arith.constant 0 : i32
    return %c0_i32, %c0_i32_0 : i32, i32
  }
  func.func @transform_3(%arg0: i32) -> (i32, i32) {
    %c0_i32 = arith.constant 0 : i32
    %c0_i32_0 = arith.constant 0 : i32
    %c0_i32_1 = arith.constant 0 : i32
    return %c0_i32, %c0_i32_0 : i32, i32
  }
  func.func @transform_4(%arg0: i32) -> (i32, i32) {
    %c0_i32 = arith.constant 0 : i32
    %c0_i32_0 = arith.constant 0 : i32
    %c0_i32_1 = arith.constant 0 : i32
    return %c0_i32, %c0_i32_0 : i32, i32
  }
  func.func @transform_5(%arg0: i32) -> (i32, i32) {
    %c0_i32 = arith.constant 0 : i32
    %c0_i32_0 = arith.constant 0 : i32
    %c0_i32_1 = arith.constant 0 : i32
    return %c0_i32, %c0_i32_0 : i32, i32
  }
  func.func @transform_6(%arg0: i32) -> (i32, i32) {
    %c0_i32 = arith.constant 0 : i32
    %c0_i32_0 = arith.constant 0 : i32
    %c0_i32_1 = arith.constant 0 : i32
    return %c0_i32, %c0_i32_0 : i32, i32
  }
  func.func @transform_7(%arg0: i32) -> (i32, i32) {
    %c0_i32 = arith.constant 0 : i32
    %c0_i32_0 = arith.constant 0 : i32
    %c0_i32_1 = arith.constant 0 : i32
    return %c0_i32, %c0_i32_0 : i32, i32
  }
  func.func @transform_8(%arg0: i32) -> (i32, i32) {
    %c0_i32 = arith.constant 0 : i32
    %c0_i32_0 = arith.constant 0 : i32
    %c0_i32_1 = arith.constant 0 : i32
    return %c0_i32, %c0_i32_0 : i32, i32
  }
  func.func @transform_9(%arg0: i32) -> (i32, i32) {
    %c0_i32 = arith.constant 0 : i32
    %c0_i32_0 = arith.constant 0 : i32
    %c0_i32_1 = arith.constant 0 : i32
    return %c0_i32, %c0_i32_0 : i32, i32
  }
  func.func @transform_10(%arg0: i32) -> (i32, i32) {
    %c0_i32 = arith.constant 0 : i32
    %c0_i32_0 = arith.constant 0 : i32
    %c0_i32_1 = arith.constant 0 : i32
    return %c0_i32, %c0_i32_0 : i32, i32
  }
  func.func @transform_11(%arg0: i32) -> (i32, i32) {
    %c0_i32 = arith.constant 0 : i32
    %c0_i32_0 = arith.constant 0 : i32
    %c0_i32_1 = arith.constant 0 : i32
    return %c0_i32, %c0_i32_0 : i32, i32
  }
  func.func @transform_12(%arg0: i32) -> (i32, i32) {
    %c0_i32 = arith.constant 0 : i32
    %c0_i32_0 = arith.constant 0 : i32
    %c0_i32_1 = arith.constant 0 : i32
    return %c0_i32, %c0_i32_0 : i32, i32
  }
  func.func @transform_13(%arg0: i32) -> (i32, i32) {
    %c0_i32 = arith.constant 0 : i32
    %c0_i32_0 = arith.constant 0 : i32
    %c0_i32_1 = arith.constant 0 : i32
    return %c0_i32, %c0_i32_0 : i32, i32
  }
  func.func @transform_14(%arg0: i32) -> (i32, i32) {
    %c0_i32 = arith.constant 0 : i32
    %c0_i32_0 = arith.constant 0 : i32
    %c0_i32_1 = arith.constant 0 : i32
    return %c0_i32, %c0_i32_0 : i32, i32
  }
  func.func @transform_15(%arg0: i32) -> (i32, i32) {
    %c0_i32 = arith.constant 0 : i32
    %c0_i32_0 = arith.constant 0 : i32
    %c0_i32_1 = arith.constant 0 : i32
    return %c0_i32, %c0_i32_0 : i32, i32
  }
  func.func @transform_16(%arg0: i32) -> (i32, i32) {
    %c0_i32 = arith.constant 0 : i32
    %c0_i32_0 = arith.constant 0 : i32
    %c0_i32_1 = arith.constant 0 : i32
    return %c0_i32, %c0_i32_0 : i32, i32
  }
  func.func @transform_17(%arg0: i32) -> (i32, i32) {
    %c0_i32 = arith.constant 0 : i32
    %c0_i32_0 = arith.constant 0 : i32
    %c0_i32_1 = arith.constant 0 : i32
    return %c0_i32, %c0_i32_0 : i32, i32
  }
  func.func @transform_18(%arg0: i32) -> (i32, i32) {
    %c0_i32 = arith.constant 0 : i32
    %c0_i32_0 = arith.constant 0 : i32
    %c0_i32_1 = arith.constant 0 : i32
    return %c0_i32, %c0_i32_0 : i32, i32
  }
  func.func @transform_19(%arg0: i32) -> (i32, i32) {
    %c0_i32 = arith.constant 0 : i32
    %c0_i32_0 = arith.constant 0 : i32
    %c0_i32_1 = arith.constant 0 : i32
    return %c0_i32, %c0_i32_0 : i32, i32
  }
  func.func @transform_20(%arg0: i32) -> (i32, i32) {
    %c0_i32 = arith.constant 0 : i32
    %c0_i32_0 = arith.constant 0 : i32
    %c0_i32_1 = arith.constant 0 : i32
    return %c0_i32, %c0_i32_0 : i32, i32
  }
  func.func @transform_21(%arg0: i32) -> (i32, i32) {
    %c0_i32 = arith.constant 0 : i32
    %c0_i32_0 = arith.constant 0 : i32
    return %arg0, %c0_i32 : i32, i32
  }
}

</mosaic_0001>

<bundles_post_ra>
// kernel: sharp_forward.1
= control target key start
LH: loop header
LB: loop body
LE: loop exit
PB: predicated region body
PF: predicated region fallthrough
CT: control target
= control target key end

     0   :  { %vm633_vm0 = vcmask 130048   ;;  %s6496_s1 = inlined_call_operand.vmem [shape: bf16[784,128], index: 1, kind: input, shape index: {}]   ;;  %s6497_s0 = inlined_call_operand.vmem [shape: f32[128,784], index: 0, kind: input, shape index: {}]   ;;  %s6498_s2 = inlined_call_operand.vmem [shape: f32[1,128], index: 2, kind: input, shape index: {}]   ;;  %s6499_s3 = inlined_call_operand.vmem [shape: bf16[128,128], index: 3, kind: input, shape index: {}]   ;;  %s6500_s4 = inlined_call_operand.vmem [shape: f32[1,128], index: 4, kind: input, shape index: {}]   ;;  %s6501_s5 = inlined_call_operand.vmem [shape: bf16[128,128], index: 5, kind: input, shape index: {}]   ;;  %s6502_s7 = inlined_call_operand.vmem [shape: bf16[128,128], index: 7, kind: input, shape index: {}]   ;;  %s6503_s6 = inlined_call_operand.vmem [shape: f32[1,128], index: 6, kind: input, shape index: {}]   ;;  %s6504_s9 = inlined_call_operand.vmem [shape: bf16[128,128], index: 9, kind: input, shape index: {}]   ;;  %s6505_s8 = inlined_call_operand.vmem [shape: f32[1,128], index: 8, kind: input, shape index: {}]   ;;  %s6506_s11 = inlined_call_operand.vmem [shape: bf16[128,128], index: 11, kind: input, shape index: {}]   ;;  %s6507_s10 = inlined_call_operand.vmem [shape: f32[1,128], index: 10, kind: input, shape index: {}]   ;;  %s6508_s13 = inlined_call_operand.vmem [shape: bf16[128,128], index: 13, kind: input, shape index: {}]   ;;  %s6509_s12 = inlined_call_operand.vmem [shape: f32[1,128], index: 12, kind: input, shape index: {}]   ;;  %s6510_s15 = inlined_call_operand.vmem [shape: bf16[128,128], index: 15, kind: input, shape index: {}]   ;;  %s6511_s14 = inlined_call_operand.vmem [shape: f32[1,128], index: 14, kind: input, shape index: {}]   ;;  %s6512_s17 = inlined_call_operand.vmem [shape: bf16[128,128], index: 17, kind: input, shape index: {}]   ;;  %s6513_s16 = inlined_call_operand.vmem [shape: f32[1,128], index: 16, kind: input, shape index: {}]   ;;  %s6514_s18 = inlined_call_operand.vmem [shape: f32[1,128], index: 18, kind: input, shape index: {}]   ;;  %s6515_s19 = inlined_call_operand.vmem [shape: bf16[128,784], index: 19, kind: input, shape index: {}]   ;;  %s6516_s20 = inlined_call_operand.vmem [shape: f32[1,784], index: 20, kind: input, shape index: {}]   ;;  %s6517_s21 = inlined_call_operand.vmem [shape: f32[128,784], index: 21, kind: output, shape index: {}]  }
   0x1   :  { %6522 = sst [smem:[#allocation2_spill]] %s6496_s1 }
   0x2   :  { %6523 = sst [smem:[#allocation3_spill]] %s6497_s0 }
   0x3   :  { %6524 = sst [smem:[#allocation4_spill]] %s6498_s2 }
   0x4   :  { %6525 = sst [smem:[#allocation5_spill]] %s6499_s3 }
   0x5   :  { %6526 = sst [smem:[#allocation6_spill]] %s6500_s4 }
   0x6   :  { %6527 = sst [smem:[#allocation7_spill]] %s6501_s5 }
   0x7   :  { %s6528_s26 = sld [smem:[#allocation2_spill]] }
   0x8   :  { %s6529_s1 = sld [smem:[#allocation3_spill]] }
   0x9   :  { %s6530_s25 = sld [smem:[#allocation4_spill]] }
   0xa   :  { %s6532_s28 = sld [smem:[#allocation7_spill]] }
   0xb   :  { %s6533_s5 = sld [smem:[#allocation6_spill]] }
   0xd   :  { %v4103_v0 = vld [vmem:[%s6528_s26 + $0x38] sm:$0xff]  ;;  %v4102_v2 = vld [vmem:[%s6528_s26 + $0x30] sm:$0xff]  ;;  %v4101_v4 = vld [vmem:[%s6528_s26 + $0x28] sm:$0xff] }
   0xe   :  { %v4111_v1 = vld [vmem:[%s6528_s26 + $0x78] sm:$0xff]  ;;  %4265 = vmatpush.bf16.msra.mxu2 %v4103_v0  ;;  %v4110_v3 = vld [vmem:[%s6528_s26 + $0x70] sm:$0xff]  ;;  %658 = vmatpush.bf16.msra.mxu0 %v4103_v0  ;;  %v4109_v5 = vld [vmem:[%s6528_s26 + $0x68] sm:$0xff] }
   0xf   :  { %4273 = vmatpush.bf16.msra.mxu3 %v4111_v1  ;;  %707 = vmatpush.bf16.msra.mxu1 %v4111_v1  ;;  %v4100_v6 = vld [vmem:[%s6528_s26 + $0x20] sm:$0xff]  ;;  %v4099_v8 = vld [vmem:[%s6528_s26 + $0x18] sm:$0xff]  ;;  %v4098_v10 = vld [vmem:[%s6528_s26 + $0x10] sm:$0xff] }
  0x10   :  { %v4108_v7 = vld [vmem:[%s6528_s26 + $0x60] sm:$0xff]  ;;  %v4107_v9 = vld [vmem:[%s6528_s26 + $0x58] sm:$0xff]  ;;  %v4106_v11 = vld [vmem:[%s6528_s26 + $0x50] sm:$0xff] }
  0x11   :  { %v4097_v12 = vld [vmem:[%s6528_s26 + $0x8] sm:$0xff]  ;;  %v4096_v14 = vld [vmem:[%s6528_s26] sm:$0xff]  ;;  %v132_v17 = vld [vmem:[%s6529_s1 + $0x1f8] sm:$0xff] }
  0x12   :  { %4266 = vmatpush.bf16.msra.mxu2 %v4102_v2  ;;  %659 = vmatpush.bf16.msra.mxu0 %v4102_v2  ;;  %v4105_v13 = vld [vmem:[%s6528_s26 + $0x48] sm:$0xff]  ;;  %v4104_v15 = vld [vmem:[%s6528_s26 + $0x40] sm:$0xff]  ;;  %v4119_v20 = vld [vmem:[%s6528_s26 + $0xb8] sm:$0xff] }
  0x13   :  { %4274 = vmatpush.bf16.msra.mxu3 %v4110_v3  ;;  %708 = vmatpush.bf16.msra.mxu1 %v4110_v3  ;;  %v125_v16 = vld [vmem:[%s6529_s1 + $0x1c0] sm:$0xff]  ;;  %v126_v18 = vld [vmem:[%s6529_s1 + $0x1c8] sm:$0xff]  ;;  %v76_v22 = vld [vmem:[%s6529_s1 + $0x38] sm:$0xff] }
  0x14   :  { %v133_v19 = vld [vmem:[%s6529_s1 + $0x200] sm:$0xff]  ;;  %v70_v23 = vld [vmem:[%s6529_s1 + $0x8] sm:$0xff]  ;;  %v209_v25 = vpack.c.bf16 %v132_v17, %v125_v16  ;;  %v4118_v28 = vld [vmem:[%s6528_s26 + $0xb0] sm:$0xff] }
  0x15   :  { %v69_v21 = vld [vmem:[%s6529_s1] sm:$0xff]  ;;  %v210_v26 = vpack.c.bf16 %v133_v19, %v126_v18  ;;  %v4127_v30 = vld [vmem:[%s6528_s26 + $0xf8] sm:$0xff]  ;;  %v4117_v31 = vld [vmem:[%s6528_s26 + $0xa8] sm:$0xff] }
  0x16   :  { %4267 = vmatpush.bf16.msra.mxu2 %v4101_v4  ;;  %660 = vmatpush.bf16.msra.mxu0 %v4101_v4  ;;  %v77_v24 = vld [vmem:[%s6529_s1 + $0x40] sm:$0xff]  ;;  %v181_v27 = vpack.c.bf16 %v76_v22, %v69_v21  ;;  %v4135_v32 = vld [vmem:[%s6528_s26 + $0x138] sm:$0xff]  ;;  %v4126_v33 = vld [vmem:[%s6528_s26 + $0xf0] sm:$0xff] }
  0x17   :  { %4275 = vmatpush.bf16.msra.mxu3 %v4109_v5  ;;  %709 = vmatpush.bf16.msra.mxu1 %v4109_v5  ;;  %v182_v29 = vpack.c.bf16 %v77_v24, %v70_v23  ;;  %v4143_v34 = vld [vmem:[%s6528_s26 + $0x178] sm:$0xff]  ;;  %v4134_v35 = vld [vmem:[%s6528_s26 + $0x130] sm:$0xff]  ;;  %v4116_v36 = vld [vmem:[%s6528_s26 + $0xa0] sm:$0xff] }
  0x18   :  { %v4125_v37 = vld [vmem:[%s6528_s26 + $0xe8] sm:$0xff]  ;;  %v139_v38 = vld [vmem:[%s6529_s1 + $0x230] sm:$0xff]  ;;  %v140_v40 = vld [vmem:[%s6529_s1 + $0x238] sm:$0xff] }
  0x19   :  { %v146_v39 = vld [vmem:[%s6529_s1 + $0x268] sm:$0xff]  ;;  %v147_v41 = vld [vmem:[%s6529_s1 + $0x270] sm:$0xff]  ;;  %v4115_v44 = vld [vmem:[%s6528_s26 + $0x98] sm:$0xff] }
  0x1a   :  { %4268 = vmatpush.bf16.msra.mxu2 %v4100_v6  ;;  %661 = vmatpush.bf16.msra.mxu0 %v4100_v6  ;;  %v83_v42 = vld [vmem:[%s6529_s1 + $0x70] sm:$0xff]  ;;  %v90_v43 = vld [vmem:[%s6529_s1 + $0xa8] sm:$0xff]  ;;  %v84_v45 = vld [vmem:[%s6529_s1 + $0x78] sm:$0xff]  ;;  %v216_v48 = vpack.c.bf16 %v146_v39, %v139_v38  ;;  %v217_v49 = vpack.c.bf16 %v147_v41, %v140_v40 }
  0x1b   :  { %4276 = vmatpush.bf16.msra.mxu3 %v4108_v7  ;;  %710 = vmatpush.bf16.msra.mxu1 %v4108_v7  ;;  %v91_v46 = vld [vmem:[%s6529_s1 + $0xb0] sm:$0xff]  ;;  %v4124_v47 = vld [vmem:[%s6528_s26 + $0xe0] sm:$0xff]  ;;  %v188_v50 = vpack.c.bf16 %v90_v43, %v83_v42  ;;  %v4123_v54 = vld [vmem:[%s6528_s26 + $0xd8] sm:$0xff] }
  0x1c   :  { %v189_v51 = vpack.c.bf16 %v91_v46, %v84_v45  ;;  %v4114_v52 = vld [vmem:[%s6528_s26 + $0x90] sm:$0xff]  ;;  %v4133_v55 = vld [vmem:[%s6528_s26 + $0x128] sm:$0xff]  ;;  %v4132_v59 = vld [vmem:[%s6528_s26 + $0x120] sm:$0xff] }
  0x1d   :  { %v4142_v53 = vld [vmem:[%s6528_s26 + $0x170] sm:$0xff]  ;;  %v4141_v56 = vld [vmem:[%s6528_s26 + $0x168] sm:$0xff]  ;;  %v4140_v60 = vld [vmem:[%s6528_s26 + $0x160] sm:$0xff] }
  0x1e   :  { %4269 = vmatpush.bf16.msra.mxu2 %v4099_v8  ;;  %662 = vmatpush.bf16.msra.mxu0 %v4099_v8  ;;  %v4113_v57 = vld [vmem:[%s6528_s26 + $0x88] sm:$0xff]  ;;  %v4122_v58 = vld [vmem:[%s6528_s26 + $0xd0] sm:$0xff]  ;;  %v4112_v61 = vld [vmem:[%s6528_s26 + $0x80] sm:$0xff] }
  0x1f   :  { %4277 = vmatpush.bf16.msra.mxu3 %v4107_v9  ;;  %711 = vmatpush.bf16.msra.mxu1 %v4107_v9  ;;  %v4121_v62 = vld [vmem:[%s6528_s26 + $0xc8] sm:$0xff]  ;;  %v4131_v63 = vld [vmem:[%s6528_s26 + $0x118] sm:$0xff]  ;;  %v153_v0 = vld [vmem:[%s6529_s1 + $0x2a0] sm:$0xff] }
  0x20   :  { %v160_v1 = vld [vmem:[%s6529_s1 + $0x2d8] sm:$0xff]  ;;  %v154_v2 = vld [vmem:[%s6529_s1 + $0x2a8] sm:$0xff]  ;;  %v161_v3 = vld [vmem:[%s6529_s1 + $0x2e0] sm:$0xff] }
  0x21   :  { %v4139_v4 = vld [vmem:[%s6528_s26 + $0x158] sm:$0xff]  ;;  %v97_v5 = vld [vmem:[%s6529_s1 + $0xe0] sm:$0xff]  ;;  %v98_v7 = vld [vmem:[%s6529_s1 + $0xe8] sm:$0xff] }
  0x22   :  { %4270 = vmatpush.bf16.msra.mxu2 %v4098_v10  ;;  %663 = vmatpush.bf16.msra.mxu0 %v4098_v10  ;;  %v104_v6 = vld [vmem:[%s6529_s1 + $0x118] sm:$0xff]  ;;  %v105_v8 = vld [vmem:[%s6529_s1 + $0x120] sm:$0xff]  ;;  %v4130_v10 = vld [vmem:[%s6528_s26 + $0x110] sm:$0xff] }
  0x23   :  { %4278 = vmatpush.bf16.msra.mxu3 %v4106_v11  ;;  %712 = vmatpush.bf16.msra.mxu1 %v4106_v11  ;;  %v4120_v9 = vld [vmem:[%s6528_s26 + $0xc0] sm:$0xff]  ;;  %v223_v11 = vpack.c.bf16 %v160_v1, %v153_v0  ;;  %v4129_v17 = vld [vmem:[%s6528_s26 + $0x108] sm:$0xff]  ;;  %v167_v21 = vld [vmem:[%s6529_s1 + $0x310] sm:$0xff] }
  0x24   :  { %v4144_v16 = vld [vmem:[%s6528_s26 + $0x180] sm:$0xff]  ;;  %v4137_v18 = vld [vmem:[%s6528_s26 + $0x148] sm:$0xff]  ;;  %v168_v23 = vld [vmem:[%s6529_s1 + $0x318] sm:$0xff] }
  0x25   :  { %v4128_v19 = vld [vmem:[%s6528_s26 + $0x100] sm:$0xff]  ;;  %v174_v22 = vld [vmem:[%s6529_s1 + $0x348] sm:$0xff]  ;;  %v175_v24 = vld [vmem:[%s6529_s1 + $0x350] sm:$0xff] }
  0x26   :  { %4271 = vmatpush.bf16.msra.mxu2 %v4097_v12  ;;  %664 = vmatpush.bf16.msra.mxu0 %v4097_v12  ;;  %v224_v12 = vpack.c.bf16 %v161_v3, %v154_v2  ;;  %v80_v38 = vld [vmem:[%s6529_s1 + $0x58] sm:$0xff]  ;;  %v74_v39 = vld [vmem:[%s6529_s1 + $0x28] sm:$0xff]  ;;  %v81_v40 = vld [vmem:[%s6529_s1 + $0x60] sm:$0xff] }
  0x27   :  { %4279 = vmatpush.bf16.msra.mxu3 %v4105_v13  ;;  %713 = vmatpush.bf16.msra.mxu1 %v4105_v13  ;;  %v195_v13 = vpack.c.bf16 %v104_v6, %v97_v5  ;;  %v85_v45 = vld [vmem:[%s6529_s1 + $0x80] sm:$0xff]  ;;  %v92_v46 = vld [vmem:[%s6529_s1 + $0xb8] sm:$0xff] }
  0x28   :  { %v109_v0 = vld [vmem:[%s6529_s1 + $0x140] sm:$0xff]  ;;  %v120_v6 = vld [vmem:[%s6529_s1 + $0x198] sm:$0xff] }
  0x29   :  { %v113_v5 = vld [vmem:[%s6529_s1 + $0x160] sm:$0xff] }
  0x2a   :  { %4272 = vmatpush.bf16.msra.mxu2 %v4096_v14  ;;  %665 = vmatpush.bf16.msra.mxu0 %v4096_v14  ;;  %v196_v14 = vpack.c.bf16 %v105_v8, %v98_v7  ;;  %v114_v7 = vld [vmem:[%s6529_s1 + $0x168] sm:$0xff]  ;;  %v121_v8 = vld [vmem:[%s6529_s1 + $0x1a0] sm:$0xff] }
  0x2b   :  { %4280 = vmatpush.bf16.msra.mxu3 %v4104_v15  ;;  %714 = vmatpush.bf16.msra.mxu1 %v4104_v15  ;;  %v4138_v15 = vld [vmem:[%s6528_s26 + $0x150] sm:$0xff] }
  0x2d   :  { %686 = vmatmul.bf16.vlgmr.msra.gmra.mxu2 %v209_v25  ;;  %666 = vmatmul.bf16.vlgmr.msra.gmra.mxu0 %v181_v27  ;;  %v111_v25 = vld [vmem:[%s6529_s1 + $0x150] sm:$0xff]  ;;  %v112_v27 = vld [vmem:[%s6529_s1 + $0x158] sm:$0xff] }
  0x2e   :  { %756 = vmatpush.bf16.msrb.mxu2 %v4119_v20  ;;  %735 = vmatmul.bf16.vlgmr.msra.gmra.mxu3 %v210_v26  ;;  %v4136_v20 = vld [vmem:[%s6528_s26 + $0x140] sm:$0xff]  ;;  %v118_v26 = vld [vmem:[%s6529_s1 + $0x188] sm:$0xff]  ;;  %s6531_s26 = sld [smem:[#allocation5_spill]] }
  0x2f   :  { %715 = vmatmul.bf16.vlgmr.msra.gmra.mxu1 %v182_v29  ;;  %805 = vmatpush.bf16.msrb.mxu3 %v4127_v30  ;;  %v230_v29 = vpack.c.bf16 %v174_v22, %v167_v21  ;;  %v231_v30 = vpack.c.bf16 %v175_v24, %v168_v23  ;;  %v129_v21 = vld [vmem:[%s6529_s1 + $0x1e0] sm:$0xff]  ;;  %v136_v22 = vld [vmem:[%s6529_s1 + $0x218] sm:$0xff]  ;;  %v130_v23 = vld [vmem:[%s6529_s1 + $0x1e8] sm:$0xff] }
  0x30   :  { %854 = vmatpush.bf16.msrb.mxu0 %v4135_v32  ;;  %903 = vmatpush.bf16.msrb.mxu1 %v4143_v34  ;;  %v78_v34 = vld [vmem:[%s6529_s1 + $0x48] sm:$0xff]  ;;  %v137_v24 = vld [vmem:[%s6529_s1 + $0x220] sm:$0xff] }
  0x32   :  { %757 = vmatpush.bf16.msrb.mxu2 %v4118_v28  ;;  %v119_v28 = vld [vmem:[%s6529_s1 + $0x190] sm:$0xff] }
  0x33   :  { %806 = vmatpush.bf16.msrb.mxu3 %v4126_v33  ;;  %v203_v32 = vpack.c.bf16 %v119_v28, %v112_v27  ;;  %v71_v33 = vld [vmem:[%s6529_s1 + $0x10] sm:$0xff]  ;;  %v4991_v27 = vld [vmem:[%s6530_s25] ss:$0 sm:$0xff]  ;;  %v213_v28 = vpack.c.bf16 %v136_v22, %v129_v21 }
  0x34   :  { %855 = vmatpush.bf16.msrb.mxu0 %v4134_v35  ;;  %904 = vmatpush.bf16.msrb.mxu1 %v4142_v53  ;;  %v72_v35 = vld [vmem:[%s6529_s1 + $0x18] sm:$0xff]  ;;  %v183_v41 = vpack.c.bf16 %v78_v34, %v71_v33  ;;  %v190_v53 = vpack.c.bf16 %v92_v46, %v85_v45  ;;  %v150_v45 = vld [vmem:[%s6529_s1 + $0x288] sm:$0xff] }
  0x36   :  { %758 = vmatpush.bf16.msrb.mxu2 %v4117_v31  ;;  %v202_v31 = vpack.c.bf16 %v118_v26, %v111_v25 }
  0x37   :  { %807 = vmatpush.bf16.msrb.mxu3 %v4125_v37  ;;  %v73_v37 = vld [vmem:[%s6529_s1 + $0x20] sm:$0xff] }
  0x38   :  { %856 = vmatpush.bf16.msrb.mxu0 %v4133_v55  ;;  %905 = vmatpush.bf16.msrb.mxu1 %v4141_v56  ;;  %v185_v43 = vpack.c.bf16 %v80_v38, %v73_v37 }
  0x3a   :  { %759 = vmatpush.bf16.msrb.mxu2 %v4116_v36  ;;  %v79_v36 = vld [vmem:[%s6529_s1 + $0x50] sm:$0xff] }
  0x3b   :  { %808 = vmatpush.bf16.msrb.mxu3 %v4124_v47  ;;  %v184_v42 = vpack.c.bf16 %v79_v36, %v72_v35  ;;  %v86_v47 = vld [vmem:[%s6529_s1 + $0x88] sm:$0xff] }
  0x3c   :  { %857 = vmatpush.bf16.msrb.mxu0 %v4132_v59  ;;  %906 = vmatpush.bf16.msrb.mxu1 %v4140_v60  ;;  %v100_v59 = vld [vmem:[%s6529_s1 + $0xf8] sm:$0xff]  ;;  %v107_v60 = vld [vmem:[%s6529_s1 + $0x130] sm:$0xff] }
  0x3d   :  { %691 = vmatmul.bf16.gmra.mxu2 %v216_v48  ;;  %671 = vmatmul.bf16.gmra.mxu0 %v188_v50  ;;  %v93_v48 = vld [vmem:[%s6529_s1 + $0xc0] sm:$0xff]  ;;  %v94_v50 = vld [vmem:[%s6529_s1 + $0xc8] sm:$0xff]  ;;  %v198_v2 = vpack.c.bf16 %v107_v60, %v100_v59 }
  0x3e   :  { %760 = vmatpush.bf16.msrb.mxu2 %v4115_v44  ;;  %740 = vmatmul.bf16.gmra.mxu3 %v217_v49  ;;  %v186_v44 = vpack.c.bf16 %v81_v40, %v74_v39  ;;  %v87_v49 = vld [vmem:[%s6529_s1 + $0x90] sm:$0xff]  ;;  %v141_v40 = vld [vmem:[%s6529_s1 + $0x240] sm:$0xff] }
  0x3f   :  { %720 = vmatmul.bf16.gmra.mxu1 %v189_v51  ;;  %809 = vmatpush.bf16.msrb.mxu3 %v4123_v54  ;;  %v88_v51 = vld [vmem:[%s6529_s1 + $0x98] sm:$0xff]  ;;  %v191_v54 = vpack.c.bf16 %v93_v48, %v86_v47  ;;  %v192_v55 = vpack.c.bf16 %v94_v50, %v87_v49  ;;  %v151_v49 = vld [vmem:[%s6529_s1 + $0x290] sm:$0xff] }
  0x40   :  { %858 = vmatpush.bf16.msrb.mxu0 %v4131_v63  ;;  %907 = vmatpush.bf16.msrb.mxu1 %v4139_v4  ;;  %v102_v63 = vld [vmem:[%s6529_s1 + $0x108] sm:$0xff]  ;;  %v144_v48 = vld [vmem:[%s6529_s1 + $0x258] sm:$0xff] }
  0x41   :  { %v200_v4 = vpack.c.bf16 %v109_v0, %v102_v63 }
  0x42   :  { %761 = vmatpush.bf16.msrb.mxu2 %v4114_v52  ;;  %v95_v52 = vld [vmem:[%s6529_s1 + $0xd0] sm:$0xff] }
  0x43   :  { %810 = vmatpush.bf16.msrb.mxu3 %v4122_v58  ;;  %v193_v56 = vpack.c.bf16 %v95_v52, %v88_v51  ;;  %v106_v58 = vld [vmem:[%s6529_s1 + $0x128] sm:$0xff] }
  0x44   :  { %859 = vmatpush.bf16.msrb.mxu0 %v4130_v10  ;;  %908 = vmatpush.bf16.msrb.mxu1 %v4138_v15  ;;  %v122_v10 = vld [vmem:[%s6529_s1 + $0x1a8] sm:$0xff] }
  0x46   :  { %762 = vmatpush.bf16.msrb.mxu2 %v4113_v57  ;;  %v99_v57 = vld [vmem:[%s6529_s1 + $0xf0] sm:$0xff] }
  0x47   :  { %811 = vmatpush.bf16.msrb.mxu3 %v4121_v62  ;;  %v108_v62 = vld [vmem:[%s6529_s1 + $0x138] sm:$0xff]  ;;  %v197_v1 = vpack.c.bf16 %v106_v58, %v99_v57 }
  0x48   :  { %860 = vmatpush.bf16.msrb.mxu0 %v4129_v17  ;;  %909 = vmatpush.bf16.msrb.mxu1 %v4137_v18  ;;  %v127_v17 = vld [vmem:[%s6529_s1 + $0x1d0] sm:$0xff]  ;;  %v134_v18 = vld [vmem:[%s6529_s1 + $0x208] sm:$0xff] }
  0x49   :  { %v211_v25 = vpack.c.bf16 %v134_v18, %v127_v17 }
  0x4a   :  { %763 = vmatpush.bf16.msrb.mxu2 %v4112_v61  ;;  %v101_v61 = vld [vmem:[%s6529_s1 + $0x100] sm:$0xff] }
  0x4b   :  { %812 = vmatpush.bf16.msrb.mxu3 %v4120_v9  ;;  %v199_v3 = vpack.c.bf16 %v108_v62, %v101_v61  ;;  %v115_v9 = vld [vmem:[%s6529_s1 + $0x170] sm:$0xff] }
  0x4c   :  { %861 = vmatpush.bf16.msrb.mxu0 %v4128_v19  ;;  %910 = vmatpush.bf16.msrb.mxu1 %v4136_v20  ;;  %v206_v15 = vpack.c.bf16 %v122_v10, %v115_v9  ;;  %v128_v19 = vld [vmem:[%s6529_s1 + $0x1d8] sm:$0xff]  ;;  %v135_v20 = vld [vmem:[%s6529_s1 + $0x210] sm:$0xff]  ;;  %v158_v9 = vld [vmem:[%s6529_s1 + $0x2c8] sm:$0xff] }
  0x4d   :  { %696 = vmatmul.bf16.gmra.mxu2 %v223_v11  ;;  %676 = vmatmul.bf16.gmra.mxu0 %v195_v13  ;;  %v116_v11 = vld [vmem:[%s6529_s1 + $0x178] sm:$0xff]  ;;  %v204_v13 = vpack.c.bf16 %v120_v6, %v113_v5  ;;  %v212_v26 = vpack.c.bf16 %v135_v20, %v128_v19  ;;  %v157_v5 = vld [vmem:[%s6529_s1 + $0x2c0] sm:$0xff] }
  0x4e   :  { %745 = vmatmul.bf16.gmra.mxu3 %v224_v12  ;;  %959 = vmatpush.bf16.msra.mxu2 %v4144_v16  ;;  %v123_v12 = vld [vmem:[%s6529_s1 + $0x1b0] sm:$0xff]  ;;  %v164_v6 = vld [vmem:[%s6529_s1 + $0x2f8] sm:$0xff]  ;;  %v165_v10 = vld [vmem:[%s6529_s1 + $0x300] sm:$0xff] }
  0x4f   :  { %725 = vmatmul.bf16.gmra.mxu1 %v196_v14  ;;  %v205_v14 = vpack.c.bf16 %v121_v8, %v114_v7  ;;  %v207_v16 = vpack.c.bf16 %v123_v12, %v116_v11 }
  0x5d   :  { %701 = vmatmul.bf16.gmra.mxu2 %v230_v29  ;;  %681 = vmatmul.bf16.gmra.mxu0 %v202_v31 }
  0x5e   :  { %750 = vmatmul.bf16.gmra.mxu3 %v231_v30  ;;  %v214_v30 = vpack.c.bf16 %v137_v24, %v130_v23 }
  0x5f   :  { %730 = vmatmul.bf16.gmra.mxu1 %v203_v32 }
  0x6d   :  { %764 = vmatmul.bf16.vlgmr.msrb.gmra.mxu2 %v183_v41  ;;  %862 = vmatmul.bf16.vlgmr.msrb.gmra.mxu0 %v185_v43  ;;  %v148_v41 = vld [vmem:[%s6529_s1 + $0x278] sm:$0xff]  ;;  %v149_v43 = vld [vmem:[%s6529_s1 + $0x280] sm:$0xff] }
  0x6e   :  { %813 = vmatmul.bf16.vlgmr.msrb.gmra.mxu3 %v184_v42  ;;  %v142_v42 = vld [vmem:[%s6529_s1 + $0x248] sm:$0xff]  ;;  %v218_v51 = vpack.c.bf16 %v148_v41, %v141_v40  ;;  %v179_v40 = vld [vmem:[%s6529_s1 + $0x370] sm:$0xff] }
  0x6f   :  { %911 = vmatmul.bf16.vlgmr.msrb.gmra.mxu1 %v186_v44  ;;  %v143_v44 = vld [vmem:[%s6529_s1 + $0x250] sm:$0xff]  ;;  %v219_v52 = vpack.c.bf16 %v149_v43, %v142_v42 }
  0x7d   :  { %769 = vmatmul.bf16.gmra.mxu2 %v190_v53  ;;  %867 = vmatmul.bf16.gmra.mxu0 %v192_v55  ;;  %v220_v53 = vpack.c.bf16 %v150_v45, %v143_v44  ;;  %v221_v55 = vpack.c.bf16 %v151_v49, %v144_v48 }
  0x7e   :  { %818 = vmatmul.bf16.gmra.mxu3 %v191_v54 }
  0x7f   :  { %916 = vmatmul.bf16.gmra.mxu1 %v193_v56 }
  0x8d   :  { %774 = vmatmul.bf16.gmra.mxu2 %v197_v1  ;;  %872 = vmatmul.bf16.gmra.mxu0 %v199_v3  ;;  %v155_v1 = vld [vmem:[%s6529_s1 + $0x2b0] sm:$0xff]  ;;  %v156_v3 = vld [vmem:[%s6529_s1 + $0x2b8] sm:$0xff] }
  0x8e   :  { %823 = vmatmul.bf16.gmra.mxu3 %v198_v2  ;;  %v162_v2 = vld [vmem:[%s6529_s1 + $0x2e8] sm:$0xff] }
  0x8f   :  { %921 = vmatmul.bf16.gmra.mxu1 %v200_v4  ;;  %v163_v4 = vld [vmem:[%s6529_s1 + $0x2f0] sm:$0xff]  ;;  %v225_v12 = vpack.c.bf16 %v162_v2, %v155_v1 }
  0x90   :  { %v4151_v2 = vld [vmem:[%s6531_s26 + $0x30] sm:$0xff] }
  0x9d   :  { %779 = vmatmul.bf16.gmra.mxu2 %v204_v13  ;;  %877 = vmatmul.bf16.gmra.mxu0 %v206_v15  ;;  %v226_v13 = vpack.c.bf16 %v163_v4, %v156_v3 }
  0x9e   :  { %828 = vmatmul.bf16.gmra.mxu3 %v205_v14  ;;  %v227_v14 = vpack.c.bf16 %v164_v6, %v157_v5  ;;  %v89_v5 = vld [vmem:[%s6529_s1 + $0xa0] sm:$0xff]  ;;  %v96_v6 = vld [vmem:[%s6529_s1 + $0xd8] sm:$0xff] }
  0x9f   :  { %926 = vmatmul.bf16.gmra.mxu1 %v207_v16  ;;  %v228_v16 = vpack.c.bf16 %v165_v10, %v158_v9  ;;  %v194_v9 = vpack.c.bf16 %v96_v6, %v89_v5  ;;  %v4150_v10 = vld [vmem:[%s6531_s26 + $0x28] sm:$0xff] }
  0xaa   :  { %v667_v29 = vpop.f32.mrf.mxu0 }
  0xab   :  { %v668_v31 = vadd.f32 %v4991_v27, %v667_v29  ;;  %v170_v29 = vld [vmem:[%s6529_s1 + $0x328] sm:$0xff] }
  0xac   :  { %v716_v32 = vpop.f32.mrf.mxu1 }
  0xad   :  { %784 = vmatmul.bf16.gmra.mxu2 %v211_v25  ;;  %v4994_v33 = vadd.f32 %v716_v32, %v668_v31  ;;  %882 = vmatmul.bf16.gmra.mxu0 %v213_v28  ;;  %v176_v28 = vld [vmem:[%s6529_s1 + $0x358] sm:$0xff]  ;;  %v171_v31 = vld [vmem:[%s6529_s1 + $0x330] sm:$0xff]  ;;  %v178_v32 = vld [vmem:[%s6529_s1 + $0x368] sm:$0xff] }
  0xae   :  { %833 = vmatmul.bf16.gmra.mxu3 %v212_v26  ;;  %v169_v26 = vld [vmem:[%s6529_s1 + $0x320] sm:$0xff]  ;;  %v234_v44 = vpack.c.bf16 %v178_v32, %v171_v31  ;;  %v138_v31 = vld [vmem:[%s6529_s1 + $0x228] sm:$0xff] }
  0xaf   :  { %931 = vmatmul.bf16.gmra.mxu1 %v214_v30  ;;  %v177_v30 = vld [vmem:[%s6529_s1 + $0x360] sm:$0xff]  ;;  %v232_v42 = vpack.c.bf16 %v176_v28, %v169_v26  ;;  %v4148_v28 = vld [vmem:[%s6531_s26 + $0x18] sm:$0xff] }
  0xb0   :  { %v687_v34 = vpop.f32.mrf.mxu2  ;;  %v233_v43 = vpack.c.bf16 %v177_v30, %v170_v29  ;;  %v131_v30 = vld [vmem:[%s6529_s1 + $0x1f0] sm:$0xff] }
  0xb1   :  { %v736_v35 = vpop.f32.mrf.mxu3  ;;  %v688_v36 = vadd.f32 %v4991_v27, %v687_v34 }
  0xb2   :  { %v4999_v38 = vpop.f32.mrf.mxu0 }
  0xb3   :  { %v4997_v37 = vadd.f32 %v736_v35, %v688_v36  ;;  %v172_v36 = vld [vmem:[%s6529_s1 + $0x338] sm:$0xff] }
  0xb4   :  { %v5001_v39 = vpop.f32.mrf.mxu1 }
  0xb8   :  { %v689_v46 = vpop.f32.mrf.mxu2 }
  0xb9   :  { %v5021_v47 = vpop.f32.mrf.mxu3  ;;  %v5030_v50 = vadd.f32 %v4991_v27, %v689_v46  ;;  %v235_v46 = vpack.c.bf16 %v179_v40, %v172_v36  ;;  %v4147_v36 = vld [vmem:[%s6531_s26 + $0x10] sm:$0xff] }
  0xba   :  { %v672_v54 = vpop.f32.mrf.mxu0 }
  0xbb   :  { %v673_v56 = vadd.f32 %v4991_v27, %v672_v54 }
  0xbc   :  { %v721_v57 = vpop.f32.mrf.mxu1 }
  0xbd   :  { %789 = vmatmul.bf16.gmra.mxu2 %v218_v51  ;;  %v5033_v58 = vadd.f32 %v721_v57, %v673_v56  ;;  %887 = vmatmul.bf16.gmra.mxu0 %v220_v53  ;;  %v75_v57 = vld [vmem:[%s6529_s1 + $0x30] sm:$0xff] }
  0xbe   :  { %838 = vmatmul.bf16.gmra.mxu3 %v219_v52  ;;  %v4152_v52 = vld [vmem:[%s6531_s26 + $0x38] sm:$0xff] }
  0xbf   :  { %936 = vmatmul.bf16.gmra.mxu1 %v221_v55  ;;  %1093 = vmatpush.bf16.msra.mxu3 %v4152_v52 }
  0xc0   :  { %v692_v59 = vpop.f32.mrf.mxu2 }
  0xc1   :  { %v741_v60 = vpop.f32.mrf.mxu3  ;;  %v693_v61 = vadd.f32 %v4991_v27, %v692_v59  ;;  %v82_v59 = vld [vmem:[%s6529_s1 + $0x68] sm:$0xff] }
  0xc2   :  { %v5038_v63 = vpop.f32.mrf.mxu0  ;;  %v187_v1 = vpack.c.bf16 %v82_v59, %v75_v57  ;;  %v166_v57 = vld [vmem:[%s6529_s1 + $0x308] sm:$0xff] }
  0xc3   :  { %v5036_v62 = vadd.f32 %v741_v60, %v693_v61  ;;  %1094 = vmatpush.bf16.msra.mxu3 %v4151_v2  ;;  %v4145_v2 = vld [vmem:[%s6531_s26] sm:$0xff] }
  0xc4   :  { %v5040_v0 = vpop.f32.mrf.mxu1 }
  0xc7   :  { %1095 = vmatpush.bf16.msra.mxu3 %v4150_v10  ;;  %v173_v10 = vld [vmem:[%s6529_s1 + $0x340] sm:$0xff] }
  0xc8   :  { %v694_v7 = vpop.f32.mrf.mxu2 }
  0xc9   :  { %v5060_v8 = vpop.f32.mrf.mxu3  ;;  %v5069_v11 = vadd.f32 %v4991_v27, %v694_v7 }
  0xca   :  { %v677_v15 = vpop.f32.mrf.mxu0 }
  0xcb   :  { %v678_v17 = vadd.f32 %v4991_v27, %v677_v15 }
  0xcc   :  { %v726_v18 = vpop.f32.mrf.mxu1 }
  0xcd   :  { %794 = vmatmul.bf16.gmra.mxu2 %v225_v12  ;;  %v5072_v19 = vadd.f32 %v726_v18, %v678_v17  ;;  %892 = vmatmul.bf16.gmra.mxu0 %v227_v14  ;;  %v110_v14 = vld [vmem:[%s6529_s1 + $0x148] sm:$0xff]  ;;  %v4149_v17 = vld [vmem:[%s6531_s26 + $0x20] sm:$0xff] }
  0xce   :  { %843 = vmatmul.bf16.gmra.mxu3 %v226_v13  ;;  %v103_v13 = vld [vmem:[%s6529_s1 + $0x110] sm:$0xff] }
  0xcf   :  { %941 = vmatmul.bf16.gmra.mxu1 %v228_v16  ;;  %v201_v16 = vpack.c.bf16 %v110_v14, %v103_v13  ;;  %1096 = vmatpush.bf16.msra.mxu3 %v4149_v17 }
  0xd0   :  { %v697_v20 = vpop.f32.mrf.mxu2 }
  0xd1   :  { %v746_v21 = vpop.f32.mrf.mxu3  ;;  %v698_v22 = vadd.f32 %v4991_v27, %v697_v20  ;;  %v117_v20 = vld [vmem:[%s6529_s1 + $0x180] sm:$0xff] }
  0xd2   :  { %v5077_v24 = vpop.f32.mrf.mxu0 }
  0xd3   :  { %v5075_v23 = vadd.f32 %v746_v21, %v698_v22  ;;  %v124_v21 = vld [vmem:[%s6529_s1 + $0x1b8] sm:$0xff]  ;;  %1097 = vmatpush.bf16.msra.mxu3 %v4148_v28 }
  0xd4   :  { %v5079_v25 = vpop.f32.mrf.mxu1  ;;  %v208_v26 = vpack.c.bf16 %v124_v21, %v117_v20 }
  0xd7   :  { %1098 = vmatpush.bf16.msra.mxu3 %v4147_v36 }
  0xd8   :  { %v699_v34 = vpop.f32.mrf.mxu2 }
  0xd9   :  { %v5099_v35 = vpop.f32.mrf.mxu3  ;;  %v5108_v41 = vadd.f32 %v4991_v27, %v699_v34  ;;  %v215_v34 = vpack.c.bf16 %v138_v31, %v131_v30 }
  0xda   :  { %v682_v45 = vpop.f32.mrf.mxu0 }
  0xdb   :  { %v683_v48 = vadd.f32 %v4991_v27, %v682_v45 }
  0xdc   :  { %v731_v49 = vpop.f32.mrf.mxu1 }
  0xdd   :  { %799 = vmatmul.bf16.gmra.mxu2 %v232_v42  ;;  %v732_v51 = vadd.f32 %v731_v49, %v683_v48  ;;  %897 = vmatmul.bf16.gmra.mxu0 %v234_v44  ;;  %v152_v44 = vld [vmem:[%s6529_s1 + $0x298] sm:$0xff] }
  0xde   :  { %848 = vmatmul.bf16.gmra.mxu3 %v233_v43  ;;  %v145_v43 = vld [vmem:[%s6529_s1 + $0x260] sm:$0xff] }
  0xdf   :  { %946 = vmatmul.bf16.gmra.mxu1 %v235_v46  ;;  %v222_v46 = vpack.c.bf16 %v152_v44, %v145_v43 }
  0xe0   :  { %v702_v53 = vpop.f32.mrf.mxu2 }
  0xe1   :  { %v751_v54 = vpop.f32.mrf.mxu3  ;;  %v703_v55 = vadd.f32 %v4991_v27, %v702_v53 }
  0xe2   :  { %v5206_v49 = vpop.f32.mrf.mxu0 }
  0xe3   :  { %v5115_v56 = vadd.f32 %v751_v54, %v703_v55  ;;  %v159_v55 = vld [vmem:[%s6529_s1 + $0x2d0] sm:$0xff] }
  0xe4   :  { %v5211_v53 = vpop.f32.mrf.mxu1 }
  0xe8   :  { %v704_v60 = vpop.f32.mrf.mxu2 }
  0xe9   :  { %v5124_v61 = vadd.f32 %v4991_v27, %v704_v60  ;;  %v5200_v48 = vpop.f32.mrf.mxu3  ;;  %v229_v60 = vpack.c.bf16 %v166_v57, %v159_v55 }
  0xed   :  { %3608 = vmatmul.msk.bf16.vlgmr.msra.gmra.mxu2 %vm633_vm0, %v187_v1  ;;  %v863_v1 = vpop.f32.mrf.mxu0 }
  0xf0   :  { %v765_v3 = vpop.f32.mrf.mxu2 }
  0xf1   :  { %v5131_v4 = vadd.f32 %v765_v3, %v4994_v33  ;;  %v814_v54 = vpop.f32.mrf.mxu3 }
  0xf8   :  { %v5139_v7 = vpop.f32.mrf.mxu2 }
  0xf9   :  { %v816_v3 = vpop.f32.mrf.mxu3 }
  0xfd   :  { %3609 = vmatmul.msk.bf16.gmra.mxu2 %vm633_vm0, %v194_v9  ;;  %v865_v9 = vpop.f32.mrf.mxu0 }
 0x100   :  { %v770_v33 = vpop.f32.mrf.mxu2 }
 0x101   :  { %v5146_v12 = vadd.f32 %v770_v33, %v5033_v58  ;;  %v180_v33 = vld [vmem:[%s6529_s1 + $0x378] sm:$0xff]  ;;  %v819_v17 = vpop.f32.mrf.mxu3 }
 0x108   :  { %v5154_v15 = vpop.f32.mrf.mxu2 }
 0x109   :  { %v821_v28 = vpop.f32.mrf.mxu3 }
 0x10d   :  { %3610 = vmatmul.msk.bf16.gmra.mxu2 %vm633_vm0, %v201_v16  ;;  %v236_v16 = vpack.c.bf16 %v180_v33, %v173_v10 }
 0x110   :  { %v775_v58 = vpop.f32.mrf.mxu2 }
 0x111   :  { %v5161_v18 = vadd.f32 %v775_v58, %v5072_v19  ;;  %v868_v58 = vpop.f32.mrf.mxu0  ;;  %v824_v43 = vpop.f32.mrf.mxu3 }
 0x118   :  { %v5169_v22 = vpop.f32.mrf.mxu2 }
 0x119   :  { %v870_v30 = vpop.f32.mrf.mxu0 }
 0x11d   :  { %3611 = vmatmul.msk.bf16.gmra.mxu2 %vm633_vm0, %v208_v26  ;;  %v670_v26 = vadd.f32 %v4991_v27, %v4999_v38 }
 0x120   :  { %v780_v19 = vpop.f32.mrf.mxu2 }
 0x121   :  { %v5175_v29 = vadd.f32 %v780_v19, %v732_v51  ;;  %v719_v19 = vadd.f32 %v5001_v39, %v670_v26  ;;  %v4160_v39 = vld [vmem:[%s6532_s28 + $0x38] sm:$0xff] }
 0x122   :  { %1234 = vmatpush.bf16.msra.mxu0 %v4160_v39 }
 0x128   :  { %v5183_v32 = vpop.f32.mrf.mxu2 }
 0x12d   :  { %3612 = vmatmul.msk.bf16.gmra.mxu2 %vm633_vm0, %v215_v34  ;;  %v768_v34 = vadd.f32 %v5139_v7, %v719_v19 }
 0x12f   :  { %v817_v44 = vadd.f32 %v816_v3, %v768_v34 }
 0x130   :  { %v785_v40 = vpop.f32.mrf.mxu2 }
 0x131   :  { %v5190_v42 = vadd.f32 %v785_v40, %v4997_v37  ;;  %v4146_v37 = vld [vmem:[%s6531_s26 + $0x8] sm:$0xff]  ;;  %v815_v40 = vadd.f32 %v814_v54, %v5131_v4  ;;  %v866_v38 = vadd.f32 %v865_v9, %v817_v44  ;;  %v826_v54 = vpop.f32.mrf.mxu3  ;;  %v820_v9 = vadd.f32 %v819_v17, %v5146_v12 }
 0x132   :  { %1099 = vmatpush.bf16.msra.mxu3 %v4146_v37  ;;  %v873_v37 = vpop.f32.mrf.mxu0 }
 0x133   :  { %v869_v26 = vadd.f32 %v868_v58, %v820_v9 }
 0x136   :  { %1100 = vmatpush.bf16.msra.mxu3 %v4145_v2 }
 0x138   :  { %v5198_v45 = vpop.f32.mrf.mxu2 }
 0x139   :  { %v829_v19 = vpop.f32.mrf.mxu3 }
 0x13d   :  { %3613 = vmatmul.msk.bf16.gmra.mxu2 %vm633_vm0, %v222_v46 }
 0x140   :  { %v790_v51 = vpop.f32.mrf.mxu2 }
 0x141   :  { %v5209_v52 = vadd.f32 %v790_v51, %v5036_v62  ;;  %v912_v62 = vpop.f32.mrf.mxu1  ;;  %v675_v51 = vadd.f32 %v4991_v27, %v5038_v63  ;;  %v875_v63 = vpop.f32.mrf.mxu0 }
 0x143   :  { %v724_v7 = vadd.f32 %v5040_v0, %v675_v51  ;;  %v680_v0 = vadd.f32 %v4991_v27, %v5077_v24  ;;  %v831_v24 = vpop.f32.mrf.mxu3 }
 0x145   :  { %v729_v12 = vadd.f32 %v5079_v25, %v680_v0  ;;  %v685_v25 = vadd.f32 %v4991_v27, %v5206_v49  ;;  %v830_v49 = vadd.f32 %v829_v19, %v5175_v29  ;;  %v739_v29 = vadd.f32 %v5021_v47, %v5030_v50  ;;  %v4156_v47 = vld [vmem:[%s6532_s28 + $0x18] sm:$0xff] }
 0x147   :  { %v778_v58 = vadd.f32 %v5169_v22, %v729_v12 }
 0x148   :  { %v5219_v59 = vpop.f32.mrf.mxu2 }
 0x149   :  { %v914_v13 = vpop.f32.mrf.mxu1 }
 0x14d   :  { %3614 = vmatmul.msk.bf16.gmra.mxu2 %vm633_vm0, %v229_v60  ;;  %v915_v60 = vadd.f32 %v914_v13, %v866_v38 }
 0x150   :  { %v795_v5 = vpop.f32.mrf.mxu2 }
 0x151   :  { %v5226_v6 = vadd.f32 %v795_v5, %v5075_v23  ;;  %v917_v21 = vpop.f32.mrf.mxu1 }
 0x152   :  { %v918_v34 = vadd.f32 %v917_v21, %v869_v26 }
 0x158   :  { %v5234_v14 = vpop.f32.mrf.mxu2 }
 0x159   :  { %v919_v36 = vpop.f32.mrf.mxu1 }
 0x15d   :  { %3615 = vmatmul.msk.bf16.gmra.mxu2 %vm633_vm0, %v236_v16 }
 0x160   :  { %v800_v23 = vpop.f32.mrf.mxu2 }
 0x161   :  { %v5238_v20 = vadd.f32 %v800_v23, %v5115_v56  ;;  %v864_v56 = vadd.f32 %v863_v1, %v815_v40  ;;  %v922_v57 = vpop.f32.mrf.mxu1  ;;  %v773_v1 = vadd.f32 %v5154_v15, %v724_v7  ;;  %v4159_v15 = vld [vmem:[%s6532_s28 + $0x30] sm:$0xff]  ;;  %v878_v40 = vpop.f32.mrf.mxu0 }
 0x162   :  { %1235 = vmatpush.bf16.msra.mxu0 %v4159_v15  ;;  %v879_v26 = vadd.f32 %v878_v40, %v830_v49 }
 0x163   :  { %v913_v55 = vadd.f32 %v912_v62, %v864_v56  ;;  %v822_v16 = vadd.f32 %v821_v28, %v773_v1 }
 0x165   :  { %v871_v13 = vadd.f32 %v870_v30, %v822_v16  ;;  %v825_v30 = vadd.f32 %v824_v43, %v5161_v18  ;;  %v734_v18 = vadd.f32 %v5211_v53, %v685_v25  ;;  %v4157_v53 = vld [vmem:[%s6532_s28 + $0x20] sm:$0xff] }
 0x167   :  { %v920_v17 = vadd.f32 %v919_v36, %v871_v13 }
 0x168   :  { %v5243_v31 = vpop.f32.mrf.mxu2 }
 0x169   :  { %v924_v62 = vpop.f32.mrf.mxu1  ;;  %v880_v21 = vpop.f32.mrf.mxu0 }
 0x170   :  { %v961_v46 = vpop.f32.mrf.mxu2 }
 0x171   :  { %v962_v4 = vadd.f32 %v961_v46, %v913_v55  ;;  %v927_v56 = vpop.f32.mrf.mxu1  ;;  %v827_v55 = vadd.f32 %v826_v54, %v778_v58 }
 0x172   :  { %v928_v13 = vadd.f32 %v927_v56, %v879_v26 }
 0x173   :  { %v1001_v5 = vmax.f32 %v962_v4, 0.0  ;;  %v876_v36 = vadd.f32 %v875_v63, %v827_v55  ;;  %v4158_v4 = vld [vmem:[%s6532_s28 + $0x28] sm:$0xff] }
 0x174   :  { %1236 = vmatpush.bf16.msra.mxu0 %v4158_v4 }
 0x175   :  { %v925_v43 = vadd.f32 %v924_v62, %v876_v36 }
 0x178   :  { %v963_v2 = vpop.f32.mrf.mxu2  ;;  %1237 = vmatpush.bf16.msra.mxu0 %v4157_v53 }
 0x179   :  { %v964_v3 = vadd.f32 %v963_v2, %v915_v60  ;;  %v874_v60 = vadd.f32 %v873_v37, %v825_v30  ;;  %v929_v22 = vpop.f32.mrf.mxu1  ;;  %v783_v37 = vadd.f32 %v5183_v32, %v734_v18 }
 0x17b   :  { %v1002_v10 = vmax.f32 %v964_v3, 0.0  ;;  %v923_v2 = vadd.f32 %v922_v57, %v874_v60  ;;  %v834_v3 = vpop.f32.mrf.mxu3  ;;  %v832_v16 = vadd.f32 %v831_v24, %v783_v37 }
 0x17c   :  { %1238 = vmatpush.bf16.msra.mxu0 %v4156_v47 }
 0x17d   :  { %v1017_v33 = vpack.c.bf16 %v1002_v10, %v1001_v5  ;;  %v883_v10 = vpop.f32.mrf.mxu0  ;;  %v881_v0 = vadd.f32 %v880_v21, %v832_v16 }
 0x17f   :  { %1101 = vmatmul.bf16.vlgmr.msra.gmra.mxu3 %v1017_v33  ;;  %v930_v32 = vadd.f32 %v929_v22, %v881_v0 }
 0x180   :  { %v966_v23 = vpop.f32.mrf.mxu2 }
 0x181   :  { %v967_v28 = vadd.f32 %v966_v23, %v918_v34  ;;  %v932_v33 = vpop.f32.mrf.mxu1 }
 0x183   :  { %v1003_v51 = vmax.f32 %v967_v28, 0.0  ;;  %v836_v57 = vpop.f32.mrf.mxu3  ;;  %v788_v28 = vadd.f32 %v5198_v45, %v739_v29 }
 0x185   :  { %v885_v62 = vpop.f32.mrf.mxu0 }
 0x188   :  { %v968_v44 = vpop.f32.mrf.mxu2 }
 0x189   :  { %v969_v46 = vadd.f32 %v968_v44, %v920_v17  ;;  %v934_v34 = vpop.f32.mrf.mxu1 }
 0x18b   :  { %v1004_v38 = vmax.f32 %v969_v46, 0.0  ;;  %v839_v17 = vpop.f32.mrf.mxu3  ;;  %v835_v46 = vadd.f32 %v834_v3, %v5190_v42  ;;  %v744_v42 = vadd.f32 %v5060_v8, %v5069_v11  ;;  %v4155_v8 = vld [vmem:[%s6532_s28 + $0x10] sm:$0xff] }
 0x18c   :  { %v840_v3 = vadd.f32 %v839_v17, %v5209_v52  ;;  %1239 = vmatpush.bf16.msra.mxu0 %v4155_v8  ;;  %v749_v52 = vadd.f32 %v5099_v35, %v5108_v41  ;;  %v4153_v35 = vld [vmem:[%s6532_s28] sm:$0xff] }
 0x18d   :  { %v1018_v39 = vpack.c.bf16 %v1004_v38, %v1003_v51  ;;  %v888_v51 = vpop.f32.mrf.mxu0  ;;  %v837_v38 = vadd.f32 %v836_v57, %v788_v28  ;;  %v884_v24 = vadd.f32 %v883_v10, %v835_v46  ;;  %v793_v36 = vadd.f32 %v5219_v59, %v744_v42 }
 0x18e   :  { %v798_v16 = vadd.f32 %v5234_v14, %v749_v52  ;;  %v754_v28 = vadd.f32 %v5200_v48, %v5124_v61 }
 0x18f   :  { %1106 = vmatmul.bf16.gmra.mxu3 %v1018_v39  ;;  %v886_v39 = vadd.f32 %v885_v62, %v837_v38  ;;  %v933_v55 = vadd.f32 %v932_v33, %v884_v24 }
 0x190   :  { %v971_v7 = vpop.f32.mrf.mxu2  ;;  %v803_v46 = vadd.f32 %v5243_v31, %v754_v28 }
 0x191   :  { %v972_v54 = vadd.f32 %v971_v7, %v923_v2  ;;  %v937_v30 = vpop.f32.mrf.mxu1  ;;  %v935_v45 = vadd.f32 %v934_v34, %v886_v39 }
 0x193   :  { %v1005_v9 = vmax.f32 %v972_v54, 0.0  ;;  %v841_v50 = vpop.f32.mrf.mxu3 }
 0x194   :  { %v842_v54 = vadd.f32 %v841_v50, %v793_v36 }
 0x195   :  { %v890_v7 = vpop.f32.mrf.mxu0 }
 0x196   :  { %v891_v37 = vadd.f32 %v890_v7, %v842_v54  ;;  %v4167_v54 = vld [vmem:[%s6502_s7 + $0x30] sm:$0xff] }
 0x198   :  { %v973_v1 = vpop.f32.mrf.mxu2 }
 0x199   :  { %v974_v5 = vadd.f32 %v973_v1, %v925_v43  ;;  %v939_v2 = vpop.f32.mrf.mxu1 }
 0x19b   :  { %v1006_v27 = vmax.f32 %v974_v5, 0.0  ;;  %v844_v43 = vpop.f32.mrf.mxu3  ;;  %v889_v5 = vadd.f32 %v888_v51, %v840_v3 }
 0x19c   :  { %v845_v0 = vadd.f32 %v844_v43, %v5226_v6 }
 0x19d   :  { %v1019_v63 = vpack.c.bf16 %v1006_v27, %v1005_v9  ;;  %v893_v10 = vpop.f32.mrf.mxu0  ;;  %v938_v11 = vadd.f32 %v937_v30, %v889_v5  ;;  %v940_v9 = vadd.f32 %v939_v2, %v891_v37 }
 0x19e   :  { %v894_v34 = vadd.f32 %v893_v10, %v845_v0 }
 0x19f   :  { %1111 = vmatmul.bf16.gmra.mxu3 %v1019_v63 }
 0x1a0   :  { %v976_v23 = vpop.f32.mrf.mxu2 }
 0x1a1   :  { %v977_v15 = vadd.f32 %v976_v23, %v928_v13  ;;  %v942_v59 = vpop.f32.mrf.mxu1  ;;  %v4154_v13 = vld [vmem:[%s6532_s28 + $0x8] sm:$0xff] }
 0x1a2   :  { %1240 = vmatpush.bf16.msra.mxu0 %v4154_v13 }
 0x1a3   :  { %v1007_v40 = vmax.f32 %v977_v15, 0.0  ;;  %v846_v49 = vpop.f32.mrf.mxu3 }
 0x1a4   :  { %v847_v62 = vadd.f32 %v846_v49, %v798_v16 }
 0x1a5   :  { %v895_v26 = vpop.f32.mrf.mxu0 }
 0x1a6   :  { %v896_v14 = vadd.f32 %v895_v26, %v847_v62  ;;  %1241 = vmatpush.bf16.msra.mxu0 %v4153_v35 }
 0x1a8   :  { %v978_v12 = vpop.f32.mrf.mxu2 }
 0x1a9   :  { %v979_v19 = vadd.f32 %v978_v12, %v930_v32  ;;  %v944_v32 = vpop.f32.mrf.mxu1  ;;  %v943_v12 = vadd.f32 %v942_v59, %v894_v34  ;;  %v4164_v34 = vld [vmem:[%s6502_s7 + $0x18] sm:$0xff] }
 0x1aa   :  { %v945_v29 = vadd.f32 %v944_v32, %v896_v14 }
 0x1ab   :  { %v1008_v44 = vmax.f32 %v979_v19, 0.0  ;;  %v849_v41 = vpop.f32.mrf.mxu3 }
 0x1ad   :  { %v1020_v58 = vpack.c.bf16 %v1008_v44, %v1007_v40  ;;  %v898_v6 = vpop.f32.mrf.mxu0 }
 0x1af   :  { %1116 = vmatmul.bf16.gmra.mxu3 %v1020_v58 }
 0x1b0   :  { %v981_v56 = vpop.f32.mrf.mxu2 }
 0x1b1   :  { %v982_v21 = vadd.f32 %v981_v56, %v933_v55  ;;  %v947_v44 = vpop.f32.mrf.mxu1  ;;  %v850_v56 = vadd.f32 %v849_v41, %v5238_v20  ;;  %v4168_v20 = vld [vmem:[%s6502_s7 + $0x38] sm:$0xff] }
 0x1b2   :  { %1375 = vmatpush.bf16.msra.mxu1 %v4168_v20 }
 0x1b3   :  { %v1009_v4 = vmax.f32 %v982_v21, 0.0  ;;  %v851_v38 = vpop.f32.mrf.mxu3  ;;  %v899_v50 = vadd.f32 %v898_v6, %v850_v56  ;;  %v4162_v56 = vld [vmem:[%s6502_s7 + $0x8] sm:$0xff] }
 0x1b4   :  { %v852_v30 = vadd.f32 %v851_v38, %v803_v46 }
 0x1b5   :  { %v900_v39 = vpop.f32.mrf.mxu0  ;;  %v948_v21 = vadd.f32 %v947_v44, %v899_v50 }
 0x1b6   :  { %v901_v55 = vadd.f32 %v900_v39, %v852_v30  ;;  %1376 = vmatpush.bf16.msra.mxu1 %v4167_v54  ;;  %v4161_v30 = vld [vmem:[%s6502_s7] sm:$0xff] }
 0x1b8   :  { %v983_v60 = vpop.f32.mrf.mxu2 }
 0x1b9   :  { %v984_v25 = vadd.f32 %v983_v60, %v935_v45  ;;  %v949_v45 = vpop.f32.mrf.mxu1 }
 0x1ba   :  { %v950_v7 = vadd.f32 %v949_v45, %v901_v55 }
 0x1bb   :  { %v1010_v22 = vmax.f32 %v984_v25, 0.0 }
 0x1bd   :  { %v1021_v18 = vpack.c.bf16 %v1010_v22, %v1009_v4  ;;  %v5308_v4 = vld [vmem:[%s6533_s5] ss:$0 sm:$0xff] }
 0x1bf   :  { %1121 = vmatmul.bf16.gmra.mxu3 %v1021_v18 }
 0x1c0   :  { %v986_v1 = vpop.f32.mrf.mxu2 }
 0x1c1   :  { %v987_v27 = vadd.f32 %v986_v1, %v938_v11 }
 0x1c3   :  { %v1011_v57 = vmax.f32 %v987_v27, 0.0 }
 0x1c8   :  { %v988_v63 = vpop.f32.mrf.mxu2 }
 0x1c9   :  { %v989_v33 = vadd.f32 %v988_v63, %v940_v9  ;;  %v4166_v9 = vld [vmem:[%s6502_s7 + $0x28] sm:$0xff] }
 0x1ca   :  { %1377 = vmatpush.bf16.msra.mxu1 %v4166_v9 }
 0x1cb   :  { %v1012_v23 = vmax.f32 %v989_v33, 0.0 }
 0x1cd   :  { %v1022_v53 = vpack.c.bf16 %v1012_v23, %v1011_v57  ;;  %v4165_v23 = vld [vmem:[%s6502_s7 + $0x20] sm:$0xff] }
 0x1ce   :  { %1378 = vmatpush.bf16.msra.mxu1 %v4165_v23 }
 0x1cf   :  { %1126 = vmatmul.bf16.gmra.mxu3 %v1022_v53 }
 0x1d0   :  { %v991_v15 = vpop.f32.mrf.mxu2 }
 0x1d1   :  { %v992_v19 = vadd.f32 %v991_v15, %v943_v12 }
 0x1d2   :  { %1379 = vmatpush.bf16.msra.mxu1 %v4164_v34 }
 0x1d3   :  { %v1013_v58 = vmax.f32 %v992_v19, 0.0 }
 0x1d8   :  { %v993_v17 = vpop.f32.mrf.mxu2 }
 0x1d9   :  { %v994_v40 = vadd.f32 %v993_v17, %v945_v29  ;;  %v4163_v17 = vld [vmem:[%s6502_s7 + $0x10] sm:$0xff] }
 0x1da   :  { %1380 = vmatpush.bf16.msra.mxu1 %v4163_v17 }
 0x1db   :  { %v1014_v51 = vmax.f32 %v994_v40, 0.0 }
 0x1dd   :  { %v1023_v24 = vpack.c.bf16 %v1014_v51, %v1013_v58 }
 0x1de   :  { %1381 = vmatpush.bf16.msra.mxu1 %v4162_v56 }
 0x1df   :  { %1131 = vmatmul.bf16.gmra.mxu3 %v1023_v24 }
 0x1e0   :  { %v996_v47 = vpop.f32.mrf.mxu2 }
 0x1e1   :  { %v997_v61 = vadd.f32 %v996_v47, %v948_v21 }
 0x1e2   :  { %1382 = vmatpush.bf16.msra.mxu1 %v4161_v30 }
 0x1e3   :  { %v1015_v42 = vmax.f32 %v997_v61, 0.0 }
 0x1e8   :  { %v998_v48 = vpop.f32.mrf.mxu2 }
 0x1e9   :  { %v999_v60 = vadd.f32 %v998_v48, %v950_v7 }
 0x1eb   :  { %v1016_v31 = vmax.f32 %v999_v60, 0.0 }
 0x1ed   :  { %v1024_v25 = vpack.c.bf16 %v1016_v31, %v1015_v42 }
 0x1ef   :  { %1136 = vmatmul.bf16.gmra.mxu3 %v1024_v25 }
 0x202   :  { %v1102_v36 = vpop.f32.mrf.mxu3 }
 0x203   :  { %v1103_v22 = vadd.f32 %v5308_v4, %v1102_v36  ;;  %v4176_v36 = vld [vmem:[%s6504_s9 + $0x38] sm:$0xff] }
 0x204   :  { %1516 = vmatpush.bf16.msrb.mxu2 %v4176_v36 }
 0x205   :  { %v1142_v18 = vmax.f32 %v1103_v22, 0.0 }
 0x20a   :  { %v1104_v2 = vpop.f32.mrf.mxu3 }
 0x20b   :  { %v1105_v3 = vadd.f32 %v5308_v4, %v1104_v2  ;;  %v5353_v2 = vld [vmem:[%s6503_s6] ss:$0 sm:$0xff] }
 0x20d   :  { %v1143_v43 = vmax.f32 %v1105_v3, 0.0 }
 0x20f   :  { %v1158_v1 = vpack.c.bf16 %v1143_v43, %v1142_v18 }
 0x211   :  { %1242 = vmatmul.bf16.vlgmr.msra.gmra.mxu0 %v1158_v1  ;;  %v4175_v1 = vld [vmem:[%s6504_s9 + $0x30] sm:$0xff] }
 0x212   :  { %v1107_v5 = vpop.f32.mrf.mxu3  ;;  %1517 = vmatpush.bf16.msrb.mxu2 %v4175_v1 }
 0x213   :  { %v1108_v10 = vadd.f32 %v5308_v4, %v1107_v5 }
 0x215   :  { %v1144_v11 = vmax.f32 %v1108_v10, 0.0 }
 0x21a   :  { %v1109_v37 = vpop.f32.mrf.mxu3 }
 0x21b   :  { %v1110_v8 = vadd.f32 %v5308_v4, %v1109_v37 }
 0x21d   :  { %v1145_v59 = vmax.f32 %v1110_v8, 0.0 }
 0x21f   :  { %v1159_v27 = vpack.c.bf16 %v1145_v59, %v1144_v11 }
 0x221   :  { %1247 = vmatmul.bf16.gmra.mxu0 %v1159_v27  ;;  %v4174_v27 = vld [vmem:[%s6504_s9 + $0x28] sm:$0xff] }
 0x222   :  { %v1112_v49 = vpop.f32.mrf.mxu3  ;;  %1518 = vmatpush.bf16.msrb.mxu2 %v4174_v27 }
 0x223   :  { %v1113_v63 = vadd.f32 %v5308_v4, %v1112_v49 }
 0x225   :  { %v1146_v16 = vmax.f32 %v1113_v63, 0.0 }
 0x22a   :  { %v1114_v52 = vpop.f32.mrf.mxu3 }
 0x22b   :  { %v1115_v33 = vadd.f32 %v5308_v4, %v1114_v52 }
 0x22d   :  { %v1147_v57 = vmax.f32 %v1115_v33, 0.0 }
 0x22f   :  { %v1160_v26 = vpack.c.bf16 %v1147_v57, %v1146_v16 }
 0x231   :  { %1252 = vmatmul.bf16.gmra.mxu0 %v1160_v26  ;;  %v4173_v26 = vld [vmem:[%s6504_s9 + $0x20] sm:$0xff] }
 0x232   :  { %v1117_v0 = vpop.f32.mrf.mxu3  ;;  %1519 = vmatpush.bf16.msrb.mxu2 %v4173_v26 }
 0x233   :  { %v1118_v53 = vadd.f32 %v5308_v4, %v1117_v0 }
 0x235   :  { %v1148_v32 = vmax.f32 %v1118_v53, 0.0 }
 0x23a   :  { %v1119_v62 = vpop.f32.mrf.mxu3 }
 0x23b   :  { %v1120_v13 = vadd.f32 %v5308_v4, %v1119_v62 }
 0x23d   :  { %v1149_v15 = vmax.f32 %v1120_v13, 0.0 }
 0x23f   :  { %v1161_v35 = vpack.c.bf16 %v1149_v15, %v1148_v32 }
 0x241   :  { %1257 = vmatmul.bf16.gmra.mxu0 %v1161_v35  ;;  %v4172_v35 = vld [vmem:[%s6504_s9 + $0x18] sm:$0xff] }
 0x242   :  { %v1122_v41 = vpop.f32.mrf.mxu3  ;;  %1520 = vmatpush.bf16.msrb.mxu2 %v4172_v35 }
 0x243   :  { %v1123_v14 = vadd.f32 %v5308_v4, %v1122_v41 }
 0x245   :  { %v1150_v29 = vmax.f32 %v1123_v14, 0.0 }
 0x24a   :  { %v1124_v12 = vpop.f32.mrf.mxu3 }
 0x24b   :  { %v1125_v6 = vadd.f32 %v5308_v4, %v1124_v12 }
 0x24d   :  { %v1151_v19 = vmax.f32 %v1125_v6, 0.0 }
 0x24f   :  { %v1162_v28 = vpack.c.bf16 %v1151_v19, %v1150_v29 }
 0x251   :  { %1262 = vmatmul.bf16.gmra.mxu0 %v1162_v28  ;;  %v4171_v28 = vld [vmem:[%s6504_s9 + $0x10] sm:$0xff] }
 0x252   :  { %v1127_v40 = vpop.f32.mrf.mxu3  ;;  %1521 = vmatpush.bf16.msrb.mxu2 %v4171_v28 }
 0x253   :  { %v1128_v44 = vadd.f32 %v5308_v4, %v1127_v40 }
 0x255   :  { %v1152_v51 = vmax.f32 %v1128_v44, 0.0 }
 0x25a   :  { %v1129_v46 = vpop.f32.mrf.mxu3 }
 0x25b   :  { %v1130_v58 = vadd.f32 %v5308_v4, %v1129_v46 }
 0x25d   :  { %v1153_v38 = vmax.f32 %v1130_v58, 0.0 }
 0x25f   :  { %v1163_v24 = vpack.c.bf16 %v1153_v38, %v1152_v51 }
 0x261   :  { %1267 = vmatmul.bf16.gmra.mxu0 %v1163_v24  ;;  %v4170_v24 = vld [vmem:[%s6504_s9 + $0x8] sm:$0xff] }
 0x262   :  { %v1132_v39 = vpop.f32.mrf.mxu3  ;;  %1522 = vmatpush.bf16.msrb.mxu2 %v4170_v24 }
 0x263   :  { %v1133_v47 = vadd.f32 %v5308_v4, %v1132_v39  ;;  %v4169_v39 = vld [vmem:[%s6504_s9] sm:$0xff] }
 0x265   :  { %v1154_v45 = vmax.f32 %v1133_v47, 0.0 }
 0x266   :  { %1523 = vmatpush.bf16.msrb.mxu2 %v4169_v39  ;;  %v4178_v39 = vld [vmem:[%s6506_s11 + $0x8] sm:$0xff] }
 0x26a   :  { %v1134_v50 = vpop.f32.mrf.mxu3 }
 0x26b   :  { %v1135_v55 = vadd.f32 %v5308_v4, %v1134_v50 }
 0x26d   :  { %v1155_v21 = vmax.f32 %v1135_v55, 0.0 }
 0x26f   :  { %v1164_v7 = vpack.c.bf16 %v1155_v21, %v1154_v45 }
 0x271   :  { %1272 = vmatmul.bf16.gmra.mxu0 %v1164_v7 }
 0x272   :  { %v1137_v61 = vpop.f32.mrf.mxu3 }
 0x273   :  { %v1138_v48 = vadd.f32 %v5308_v4, %v1137_v61 }
 0x275   :  { %v1156_v31 = vmax.f32 %v1138_v48, 0.0 }
 0x27a   :  { %v1139_v60 = vpop.f32.mrf.mxu3 }
 0x27b   :  { %v1140_v42 = vadd.f32 %v5308_v4, %v1139_v60 }
 0x27d   :  { %v1157_v25 = vmax.f32 %v1140_v42, 0.0 }
 0x27f   :  { %v1165_v20 = vpack.c.bf16 %v1157_v25, %v1156_v31 }
 0x281   :  { %1277 = vmatmul.bf16.gmra.mxu0 %v1165_v20 }
 0x28e   :  { %v1243_v22 = vpop.f32.mrf.mxu0 }
 0x28f   :  { %v1244_v3 = vadd.f32 %v5353_v2, %v1243_v22  ;;  %v4184_v22 = vld [vmem:[%s6506_s11 + $0x38] sm:$0xff] }
 0x290   :  { %1641 = vmatpush.bf16.msrb.mxu3 %v4184_v22 }
 0x291   :  { %v1283_v43 = vmax.f32 %v1244_v3, 0.0 }
 0x296   :  { %v1245_v18 = vpop.f32.mrf.mxu0 }
 0x297   :  { %v1246_v4 = vadd.f32 %v5353_v2, %v1245_v18  ;;  %v5398_v18 = vld [vmem:[%s6505_s8] ss:$0 sm:$0xff] }
 0x299   :  { %v1284_v54 = vmax.f32 %v1246_v4, 0.0 }
 0x29b   :  { %v1299_v5 = vpack.c.bf16 %v1284_v54, %v1283_v43 }
 0x29d   :  { %1383 = vmatmul.bf16.vlgmr.msra.gmra.mxu1 %v1299_v5 }
 0x29e   :  { %v1248_v10 = vpop.f32.mrf.mxu0 }
 0x29f   :  { %v1249_v37 = vadd.f32 %v5353_v2, %v1248_v10  ;;  %v4183_v10 = vld [vmem:[%s6506_s11 + $0x30] sm:$0xff] }
 0x2a0   :  { %1642 = vmatpush.bf16.msrb.mxu3 %v4183_v10 }
 0x2a1   :  { %v1285_v59 = vmax.f32 %v1249_v37, 0.0 }
 0x2a6   :  { %v1250_v8 = vpop.f32.mrf.mxu0 }
 0x2a7   :  { %v1251_v11 = vadd.f32 %v5353_v2, %v1250_v8 }
 0x2a9   :  { %v1286_v9 = vmax.f32 %v1251_v11, 0.0 }
 0x2ab   :  { %v1300_v49 = vpack.c.bf16 %v1286_v9, %v1285_v59 }
 0x2ad   :  { %1388 = vmatmul.bf16.gmra.mxu1 %v1300_v49 }
 0x2ae   :  { %v1253_v63 = vpop.f32.mrf.mxu0 }
 0x2af   :  { %v1254_v52 = vadd.f32 %v5353_v2, %v1253_v63  ;;  %v4182_v63 = vld [vmem:[%s6506_s11 + $0x28] sm:$0xff] }
 0x2b0   :  { %1643 = vmatpush.bf16.msrb.mxu3 %v4182_v63 }
 0x2b1   :  { %v1287_v57 = vmax.f32 %v1254_v52, 0.0 }
 0x2b6   :  { %v1255_v33 = vpop.f32.mrf.mxu0 }
 0x2b7   :  { %v1256_v16 = vadd.f32 %v5353_v2, %v1255_v33 }
 0x2b9   :  { %v1288_v23 = vmax.f32 %v1256_v16, 0.0 }
 0x2bb   :  { %v1301_v0 = vpack.c.bf16 %v1288_v23, %v1287_v57 }
 0x2bd   :  { %1393 = vmatmul.bf16.gmra.mxu1 %v1301_v0 }
 0x2be   :  { %v1258_v53 = vpop.f32.mrf.mxu0 }
 0x2bf   :  { %v1259_v62 = vadd.f32 %v5353_v2, %v1258_v53  ;;  %v4181_v53 = vld [vmem:[%s6506_s11 + $0x20] sm:$0xff] }
 0x2c0   :  { %1644 = vmatpush.bf16.msrb.mxu3 %v4181_v53 }
 0x2c1   :  { %v1289_v15 = vmax.f32 %v1259_v62, 0.0 }
 0x2c6   :  { %v1260_v13 = vpop.f32.mrf.mxu0 }
 0x2c7   :  { %v1261_v32 = vadd.f32 %v5353_v2, %v1260_v13 }
 0x2c9   :  { %v1290_v34 = vmax.f32 %v1261_v32, 0.0 }
 0x2cb   :  { %v1302_v41 = vpack.c.bf16 %v1290_v34, %v1289_v15 }
 0x2cd   :  { %1398 = vmatmul.bf16.gmra.mxu1 %v1302_v41 }
 0x2ce   :  { %v1263_v14 = vpop.f32.mrf.mxu0 }
 0x2cf   :  { %v1264_v12 = vadd.f32 %v5353_v2, %v1263_v14  ;;  %v4180_v14 = vld [vmem:[%s6506_s11 + $0x18] sm:$0xff] }
 0x2d0   :  { %1645 = vmatpush.bf16.msrb.mxu3 %v4180_v14 }
 0x2d1   :  { %v1291_v19 = vmax.f32 %v1264_v12, 0.0 }
 0x2d6   :  { %v1265_v6 = vpop.f32.mrf.mxu0 }
 0x2d7   :  { %v1266_v29 = vadd.f32 %v5353_v2, %v1265_v6 }
 0x2d9   :  { %v1292_v17 = vmax.f32 %v1266_v29, 0.0 }
 0x2db   :  { %v1303_v40 = vpack.c.bf16 %v1292_v17, %v1291_v19 }
 0x2dd   :  { %1403 = vmatmul.bf16.gmra.mxu1 %v1303_v40 }
 0x2de   :  { %v1268_v44 = vpop.f32.mrf.mxu0 }
 0x2df   :  { %v1269_v46 = vadd.f32 %v5353_v2, %v1268_v44  ;;  %v4179_v44 = vld [vmem:[%s6506_s11 + $0x10] sm:$0xff] }
 0x2e0   :  { %1646 = vmatpush.bf16.msrb.mxu3 %v4179_v44 }
 0x2e1   :  { %v1293_v38 = vmax.f32 %v1269_v46, 0.0 }
 0x2e4   :  { %1647 = vmatpush.bf16.msrb.mxu3 %v4178_v39 }
 0x2e6   :  { %v1270_v58 = vpop.f32.mrf.mxu0 }
 0x2e7   :  { %v1271_v51 = vadd.f32 %v5353_v2, %v1270_v58 }
 0x2e9   :  { %v1294_v56 = vmax.f32 %v1271_v51, 0.0 }
 0x2eb   :  { %v1304_v30 = vpack.c.bf16 %v1294_v56, %v1293_v38 }
 0x2ed   :  { %1408 = vmatmul.bf16.gmra.mxu1 %v1304_v30 }
 0x2ee   :  { %v1273_v47 = vpop.f32.mrf.mxu0 }
 0x2ef   :  { %v1274_v50 = vadd.f32 %v5353_v2, %v1273_v47 }
 0x2f1   :  { %v1295_v21 = vmax.f32 %v1274_v50, 0.0  ;;  %v4177_v50 = vld [vmem:[%s6506_s11] sm:$0xff] }
 0x2f2   :  { %1648 = vmatpush.bf16.msrb.mxu3 %v4177_v50 }
 0x2f6   :  { %v1275_v55 = vpop.f32.mrf.mxu0 }
 0x2f7   :  { %v1276_v45 = vadd.f32 %v5353_v2, %v1275_v55 }
 0x2f9   :  { %v1296_v7 = vmax.f32 %v1276_v45, 0.0 }
 0x2fb   :  { %v1305_v61 = vpack.c.bf16 %v1296_v7, %v1295_v21 }
 0x2fd   :  { %1413 = vmatmul.bf16.gmra.mxu1 %v1305_v61 }
 0x2fe   :  { %v1278_v48 = vpop.f32.mrf.mxu0 }
 0x2ff   :  { %v1279_v60 = vadd.f32 %v5353_v2, %v1278_v48 }
 0x301   :  { %v1297_v25 = vmax.f32 %v1279_v60, 0.0 }
 0x306   :  { %v1280_v42 = vpop.f32.mrf.mxu0 }
 0x307   :  { %v1281_v31 = vadd.f32 %v5353_v2, %v1280_v42 }
 0x309   :  { %v1298_v20 = vmax.f32 %v1281_v31, 0.0 }
 0x30b   :  { %v1306_v36 = vpack.c.bf16 %v1298_v20, %v1297_v25 }
 0x30d   :  { %1418 = vmatmul.bf16.gmra.mxu1 %v1306_v36 }
 0x31a   :  { %v1384_v3 = vpop.f32.mrf.mxu1 }
 0x31b   :  { %v1385_v4 = vadd.f32 %v5398_v18, %v1384_v3  ;;  %v4192_v3 = vld [vmem:[%s6508_s13 + $0x38] sm:$0xff] }
 0x31c   :  { %1782 = vmatpush.bf16.msrb.mxu0 %v4192_v3 }
 0x31d   :  { %v1424_v54 = vmax.f32 %v1385_v4, 0.0 }
 0x322   :  { %v1386_v43 = vpop.f32.mrf.mxu1 }
 0x323   :  { %v1387_v2 = vadd.f32 %v5398_v18, %v1386_v43  ;;  %v4285_v43 = vld [vmem:[%s6507_s10] ss:$0 sm:$0xff] }
 0x325   :  { %v1425_v1 = vmax.f32 %v1387_v2, 0.0 }
 0x327   :  { %v1440_v5 = vpack.c.bf16 %v1425_v1, %v1424_v54 }
 0x329   :  { %1524 = vmatmul.bf16.vlgmr.msrb.gmra.mxu2 %v1440_v5 }
 0x32a   :  { %v1389_v37 = vpop.f32.mrf.mxu1 }
 0x32b   :  { %v1390_v8 = vadd.f32 %v5398_v18, %v1389_v37 }
 0x32d   :  { %v1426_v9 = vmax.f32 %v1390_v8, 0.0 }
 0x332   :  { %v1391_v11 = vpop.f32.mrf.mxu1 }
 0x333   :  { %v1392_v59 = vadd.f32 %v5398_v18, %v1391_v11 }
 0x335   :  { %v1427_v27 = vmax.f32 %v1392_v59, 0.0 }
 0x337   :  { %v1441_v49 = vpack.c.bf16 %v1427_v27, %v1426_v9  ;;  %v4190_v9 = vld [vmem:[%s6508_s13 + $0x28] sm:$0xff] }
 0x339   :  { %1529 = vmatmul.bf16.gmra.mxu2 %v1441_v49 }
 0x33a   :  { %v1394_v52 = vpop.f32.mrf.mxu1 }
 0x33b   :  { %v1395_v33 = vadd.f32 %v5398_v18, %v1394_v52 }
 0x33d   :  { %v1428_v23 = vmax.f32 %v1395_v33, 0.0 }
 0x342   :  { %v1396_v16 = vpop.f32.mrf.mxu1 }
 0x343   :  { %v1397_v57 = vadd.f32 %v5398_v18, %v1396_v16  ;;  %v4189_v16 = vld [vmem:[%s6508_s13 + $0x20] sm:$0xff] }
 0x345   :  { %v1429_v26 = vmax.f32 %v1397_v57, 0.0 }
 0x347   :  { %v1442_v0 = vpack.c.bf16 %v1429_v26, %v1428_v23 }
 0x349   :  { %1534 = vmatmul.bf16.gmra.mxu2 %v1442_v0 }
 0x34a   :  { %v1399_v62 = vpop.f32.mrf.mxu1 }
 0x34b   :  { %v1400_v13 = vadd.f32 %v5398_v18, %v1399_v62  ;;  %v4188_v62 = vld [vmem:[%s6508_s13 + $0x18] sm:$0xff] }
 0x34d   :  { %v1430_v34 = vmax.f32 %v1400_v13, 0.0 }
 0x352   :  { %v1401_v32 = vpop.f32.mrf.mxu1 }
 0x353   :  { %v1402_v15 = vadd.f32 %v5398_v18, %v1401_v32 }
 0x355   :  { %v1431_v35 = vmax.f32 %v1402_v15, 0.0 }
 0x357   :  { %v1443_v41 = vpack.c.bf16 %v1431_v35, %v1430_v34 }
 0x359   :  { %1539 = vmatmul.bf16.gmra.mxu2 %v1443_v41  ;;  %v4187_v41 = vld [vmem:[%s6508_s13 + $0x10] sm:$0xff] }
 0x35a   :  { %v1404_v12 = vpop.f32.mrf.mxu1 }
 0x35b   :  { %v1405_v6 = vadd.f32 %v5398_v18, %v1404_v12 }
 0x35d   :  { %v1432_v17 = vmax.f32 %v1405_v6, 0.0 }
 0x362   :  { %v1406_v29 = vpop.f32.mrf.mxu1 }
 0x363   :  { %v1407_v19 = vadd.f32 %v5398_v18, %v1406_v29 }
 0x365   :  { %v1433_v28 = vmax.f32 %v1407_v19, 0.0 }
 0x367   :  { %v1444_v40 = vpack.c.bf16 %v1433_v28, %v1432_v17  ;;  %v4186_v17 = vld [vmem:[%s6508_s13 + $0x8] sm:$0xff]  ;;  %v4185_v28 = vld [vmem:[%s6508_s13] sm:$0xff] }
 0x369   :  { %1544 = vmatmul.bf16.gmra.mxu2 %v1444_v40 }
 0x36a   :  { %v1409_v46 = vpop.f32.mrf.mxu1 }
 0x36b   :  { %v1410_v58 = vadd.f32 %v5398_v18, %v1409_v46 }
 0x36d   :  { %v1434_v56 = vmax.f32 %v1410_v58, 0.0 }
 0x372   :  { %v1411_v51 = vpop.f32.mrf.mxu1 }
 0x373   :  { %v1412_v38 = vadd.f32 %v5398_v18, %v1411_v51 }
 0x375   :  { %v1435_v24 = vmax.f32 %v1412_v38, 0.0 }
 0x377   :  { %v1445_v30 = vpack.c.bf16 %v1435_v24, %v1434_v56 }
 0x379   :  { %1549 = vmatmul.bf16.gmra.mxu2 %v1445_v30 }
 0x37a   :  { %v1414_v47 = vpop.f32.mrf.mxu1 }
 0x37b   :  { %v1415_v55 = vadd.f32 %v5398_v18, %v1414_v47  ;;  %v4200_v47 = vld [vmem:[%s6510_s15 + $0x38] sm:$0xff] }
 0x37c   :  { %1923 = vmatpush.bf16.msrb.mxu1 %v4200_v47 }
 0x37d   :  { %v1436_v7 = vmax.f32 %v1415_v55, 0.0  ;;  %v5470_v55 = vld [vmem:[%s6509_s12] ss:$0 sm:$0xff] }
 0x382   :  { %v1416_v45 = vpop.f32.mrf.mxu1 }
 0x383   :  { %v1417_v21 = vadd.f32 %v5398_v18, %v1416_v45 }
 0x385   :  { %v1437_v61 = vmax.f32 %v1417_v21, 0.0 }
 0x387   :  { %v1446_v48 = vpack.c.bf16 %v1437_v61, %v1436_v7 }
 0x389   :  { %1554 = vmatmul.bf16.gmra.mxu2 %v1446_v48 }
 0x38a   :  { %v1419_v60 = vpop.f32.mrf.mxu1 }
 0x38b   :  { %v1420_v42 = vadd.f32 %v5398_v18, %v1419_v60  ;;  %v4199_v60 = vld [vmem:[%s6510_s15 + $0x30] sm:$0xff] }
 0x38c   :  { %1924 = vmatpush.bf16.msrb.mxu1 %v4199_v60 }
 0x38d   :  { %v1438_v20 = vmax.f32 %v1420_v42, 0.0 }
 0x392   :  { %v1421_v31 = vpop.f32.mrf.mxu1 }
 0x393   :  { %v1422_v25 = vadd.f32 %v5398_v18, %v1421_v31  ;;  %v4191_v18 = vld [vmem:[%s6508_s13 + $0x30] sm:$0xff] }
 0x394   :  { %1783 = vmatpush.bf16.msrb.mxu0 %v4191_v18 }
 0x395   :  { %v1439_v36 = vmax.f32 %v1422_v25, 0.0 }
 0x397   :  { %v1447_v22 = vpack.c.bf16 %v1439_v36, %v1438_v20 }
 0x398   :  { %1784 = vmatpush.bf16.msrb.mxu0 %v4190_v9 }
 0x399   :  { %1559 = vmatmul.bf16.gmra.mxu2 %v1447_v22 }
 0x39c   :  { %1785 = vmatpush.bf16.msrb.mxu0 %v4189_v16 }
 0x3a0   :  { %1786 = vmatpush.bf16.msrb.mxu0 %v4188_v62  ;;  %v4195_v62 = vld [vmem:[%s6510_s15 + $0x10] sm:$0xff] }
 0x3a4   :  { %1787 = vmatpush.bf16.msrb.mxu0 %v4187_v41 }
 0x3a8   :  { %1788 = vmatpush.bf16.msrb.mxu0 %v4186_v17 }
 0x3ac   :  { %v1525_v4 = vpop.f32.mrf.mxu2  ;;  %1789 = vmatpush.bf16.msrb.mxu0 %v4185_v28 }
 0x3ad   :  { %v1526_v54 = vadd.f32 %v4285_v43, %v1525_v4  ;;  %v4198_v4 = vld [vmem:[%s6510_s15 + $0x28] sm:$0xff] }
 0x3ae   :  { %1925 = vmatpush.bf16.msrb.mxu1 %v4198_v4 }
 0x3b4   :  { %v1527_v2 = vpop.f32.mrf.mxu2 }
 0x3b5   :  { %v1528_v1 = vadd.f32 %v4285_v43, %v1527_v2 }
 0x3b7   :  { %v1565_v5 = vpack.c.bf16 %v1528_v1, %v1526_v54 }
 0x3b9   :  { %1649 = vmatmul.bf16.vlgmr.msrb.gmra.mxu3 %v1565_v5 }
 0x3bc   :  { %v1530_v10 = vpop.f32.mrf.mxu2 }
 0x3bd   :  { %v1531_v8 = vadd.f32 %v4285_v43, %v1530_v10 }
 0x3c4   :  { %v1532_v37 = vpop.f32.mrf.mxu2 }
 0x3c5   :  { %v1533_v11 = vadd.f32 %v4285_v43, %v1532_v37  ;;  %v4197_v37 = vld [vmem:[%s6510_s15 + $0x20] sm:$0xff] }
 0x3c6   :  { %1926 = vmatpush.bf16.msrb.mxu1 %v4197_v37 }
 0x3c7   :  { %v1566_v59 = vpack.c.bf16 %v1533_v11, %v1531_v8 }
 0x3c9   :  { %1654 = vmatmul.bf16.gmra.mxu3 %v1566_v59 }
 0x3cc   :  { %v1535_v27 = vpop.f32.mrf.mxu2 }
 0x3cd   :  { %v1536_v63 = vadd.f32 %v4285_v43, %v1535_v27 }
 0x3d4   :  { %v1537_v49 = vpop.f32.mrf.mxu2 }
 0x3d5   :  { %v1538_v52 = vadd.f32 %v4285_v43, %v1537_v49 }
 0x3d7   :  { %v1567_v33 = vpack.c.bf16 %v1538_v52, %v1536_v63  ;;  %v4196_v52 = vld [vmem:[%s6510_s15 + $0x18] sm:$0xff] }
 0x3d8   :  { %1927 = vmatpush.bf16.msrb.mxu1 %v4196_v52 }
 0x3d9   :  { %1659 = vmatmul.bf16.gmra.mxu3 %v1567_v33 }
 0x3dc   :  { %v1540_v57 = vpop.f32.mrf.mxu2  ;;  %1928 = vmatpush.bf16.msrb.mxu1 %v4195_v62 }
 0x3dd   :  { %v1541_v26 = vadd.f32 %v4285_v43, %v1540_v57 }
 0x3e4   :  { %v1542_v23 = vpop.f32.mrf.mxu2 }
 0x3e5   :  { %v1543_v0 = vadd.f32 %v4285_v43, %v1542_v23 }
 0x3e7   :  { %v1568_v53 = vpack.c.bf16 %v1543_v0, %v1541_v26 }
 0x3e9   :  { %1664 = vmatmul.bf16.gmra.mxu3 %v1568_v53 }
 0x3ec   :  { %v1545_v13 = vpop.f32.mrf.mxu2 }
 0x3ed   :  { %v1546_v15 = vadd.f32 %v4285_v43, %v1545_v13 }
 0x3f4   :  { %v1547_v32 = vpop.f32.mrf.mxu2 }
 0x3f5   :  { %v1548_v34 = vadd.f32 %v4285_v43, %v1547_v32 }
 0x3f7   :  { %v1569_v35 = vpack.c.bf16 %v1548_v34, %v1546_v15 }
 0x3f9   :  { %1669 = vmatmul.bf16.gmra.mxu3 %v1569_v35 }
 0x3fc   :  { %v1550_v14 = vpop.f32.mrf.mxu2 }
 0x3fd   :  { %v1551_v6 = vadd.f32 %v4285_v43, %v1550_v14 }
 0x404   :  { %v1552_v12 = vpop.f32.mrf.mxu2 }
 0x405   :  { %v1553_v29 = vadd.f32 %v4285_v43, %v1552_v12  ;;  %v4194_v12 = vld [vmem:[%s6510_s15 + $0x8] sm:$0xff] }
 0x406   :  { %1929 = vmatpush.bf16.msrb.mxu1 %v4194_v12 }
 0x407   :  { %v1570_v19 = vpack.c.bf16 %v1553_v29, %v1551_v6  ;;  %v4193_v29 = vld [vmem:[%s6510_s15] sm:$0xff] }
 0x409   :  { %1674 = vmatmul.bf16.gmra.mxu3 %v1570_v19 }
 0x40a   :  { %1930 = vmatpush.bf16.msrb.mxu1 %v4193_v29 }
 0x40c   :  { %v1555_v40 = vpop.f32.mrf.mxu2 }
 0x40d   :  { %v1556_v46 = vadd.f32 %v4285_v43, %v1555_v40 }
 0x414   :  { %v1557_v44 = vpop.f32.mrf.mxu2 }
 0x415   :  { %v1558_v58 = vadd.f32 %v4285_v43, %v1557_v44 }
 0x417   :  { %v1571_v51 = vpack.c.bf16 %v1558_v58, %v1556_v46 }
 0x419   :  { %1679 = vmatmul.bf16.gmra.mxu3 %v1571_v51 }
 0x41c   :  { %v1560_v38 = vpop.f32.mrf.mxu2 }
 0x41d   :  { %v1561_v24 = vadd.f32 %v4285_v43, %v1560_v38 }
 0x424   :  { %v1562_v56 = vpop.f32.mrf.mxu2 }
 0x425   :  { %v1563_v30 = vadd.f32 %v4285_v43, %v1562_v56 }
 0x427   :  { %v1572_v39 = vpack.c.bf16 %v1563_v30, %v1561_v24 }
 0x429   :  { %1684 = vmatmul.bf16.gmra.mxu3 %v1572_v39 }
 0x43c   :  { %v1650_v50 = vpop.f32.mrf.mxu3 }
 0x43d   :  { %v1651_v45 = vadd.f32 %v5470_v55, %v1650_v50  ;;  %v4208_v50 = vld [vmem:[%s6512_s17 + $0x38] sm:$0xff] }
 0x43e   :  { %2064 = vmatpush.bf16.msra.mxu2 %v4208_v50 }
 0x43f   :  { %v1690_v61 = vmax.f32 %v1651_v45, 0.0 }
 0x444   :  { %v1652_v21 = vpop.f32.mrf.mxu3 }
 0x445   :  { %v1653_v7 = vadd.f32 %v5470_v55, %v1652_v21  ;;  %v5515_v21 = vld [vmem:[%s6511_s14] ss:$0 sm:$0xff] }
 0x447   :  { %v1691_v48 = vmax.f32 %v1653_v7, 0.0 }
 0x449   :  { %v1706_v42 = vpack.c.bf16 %v1691_v48, %v1690_v61 }
 0x44b   :  { %1790 = vmatmul.bf16.vlgmr.msrb.gmra.mxu0 %v1706_v42  ;;  %v4207_v42 = vld [vmem:[%s6512_s17 + $0x30] sm:$0xff] }
 0x44c   :  { %v1655_v31 = vpop.f32.mrf.mxu3  ;;  %2065 = vmatpush.bf16.msra.mxu2 %v4207_v42  ;;  %v4078_v42 = vld [vmem:[%s6515_s19 + $0x190] sm:$0xf] }
 0x44d   :  { %v1656_v25 = vadd.f32 %v5470_v55, %v1655_v31 }
 0x44f   :  { %v1692_v22 = vmax.f32 %v1656_v25, 0.0 }
 0x454   :  { %v1657_v20 = vpop.f32.mrf.mxu3 }
 0x455   :  { %v1658_v36 = vadd.f32 %v5470_v55, %v1657_v20 }
 0x457   :  { %v1693_v3 = vmax.f32 %v1658_v36, 0.0 }
 0x459   :  { %v1707_v43 = vpack.c.bf16 %v1693_v3, %v1692_v22 }
 0x45b   :  { %1795 = vmatmul.bf16.gmra.mxu0 %v1707_v43  ;;  %v4206_v43 = vld [vmem:[%s6512_s17 + $0x28] sm:$0xff] }
 0x45c   :  { %v1660_v2 = vpop.f32.mrf.mxu3  ;;  %2066 = vmatpush.bf16.msra.mxu2 %v4206_v43 }
 0x45d   :  { %v1661_v54 = vadd.f32 %v5470_v55, %v1660_v2 }
 0x45f   :  { %v1694_v18 = vmax.f32 %v1661_v54, 0.0 }
 0x464   :  { %v1662_v1 = vpop.f32.mrf.mxu3 }
 0x465   :  { %v1663_v5 = vadd.f32 %v5470_v55, %v1662_v1 }
 0x467   :  { %v1695_v10 = vmax.f32 %v1663_v5, 0.0 }
 0x469   :  { %v1708_v8 = vpack.c.bf16 %v1695_v10, %v1694_v18 }
 0x46b   :  { %1800 = vmatmul.bf16.gmra.mxu0 %v1708_v8  ;;  %v4205_v8 = vld [vmem:[%s6512_s17 + $0x20] sm:$0xff] }
 0x46c   :  { %v1665_v11 = vpop.f32.mrf.mxu3  ;;  %2067 = vmatpush.bf16.msra.mxu2 %v4205_v8  ;;  %v4050_v8 = vld [vmem:[%s6515_s19 + $0x158] sm:$0xf] }
 0x46d   :  { %v1666_v59 = vadd.f32 %v5470_v55, %v1665_v11 }
 0x46f   :  { %v1696_v49 = vmax.f32 %v1666_v59, 0.0 }
 0x474   :  { %v1667_v9 = vpop.f32.mrf.mxu3 }
 0x475   :  { %v1668_v27 = vadd.f32 %v5470_v55, %v1667_v9 }
 0x477   :  { %v1697_v63 = vmax.f32 %v1668_v27, 0.0 }
 0x479   :  { %v1709_v33 = vpack.c.bf16 %v1697_v63, %v1696_v49 }
 0x47b   :  { %1805 = vmatmul.bf16.gmra.mxu0 %v1709_v33  ;;  %v4204_v33 = vld [vmem:[%s6512_s17 + $0x18] sm:$0xff] }
 0x47c   :  { %v1670_v16 = vpop.f32.mrf.mxu3  ;;  %2068 = vmatpush.bf16.msra.mxu2 %v4204_v33 }
 0x47d   :  { %v1671_v57 = vadd.f32 %v5470_v55, %v1670_v16 }
 0x47f   :  { %v1698_v0 = vmax.f32 %v1671_v57, 0.0 }
 0x484   :  { %v1672_v23 = vpop.f32.mrf.mxu3 }
 0x485   :  { %v1673_v26 = vadd.f32 %v5470_v55, %v1672_v23 }
 0x487   :  { %v1699_v53 = vmax.f32 %v1673_v26, 0.0 }
 0x489   :  { %v1710_v13 = vpack.c.bf16 %v1699_v53, %v1698_v0 }
 0x48b   :  { %1810 = vmatmul.bf16.gmra.mxu0 %v1710_v13  ;;  %v4203_v13 = vld [vmem:[%s6512_s17 + $0x10] sm:$0xff] }
 0x48c   :  { %v1675_v32 = vpop.f32.mrf.mxu3  ;;  %2069 = vmatpush.bf16.msra.mxu2 %v4203_v13  ;;  %v4022_v13 = vld [vmem:[%s6515_s19 + $0x120] sm:$0xf] }
 0x48d   :  { %v1676_v15 = vadd.f32 %v5470_v55, %v1675_v32 }
 0x48f   :  { %v1700_v41 = vmax.f32 %v1676_v15, 0.0 }
 0x494   :  { %v1677_v34 = vpop.f32.mrf.mxu3 }
 0x495   :  { %v1678_v35 = vadd.f32 %v5470_v55, %v1677_v34 }
 0x497   :  { %v1701_v14 = vmax.f32 %v1678_v35, 0.0 }
 0x499   :  { %v1711_v6 = vpack.c.bf16 %v1701_v14, %v1700_v41 }
 0x49b   :  { %1815 = vmatmul.bf16.gmra.mxu0 %v1711_v6  ;;  %v4202_v6 = vld [vmem:[%s6512_s17 + $0x8] sm:$0xff] }
 0x49c   :  { %v1680_v19 = vpop.f32.mrf.mxu3  ;;  %2070 = vmatpush.bf16.msra.mxu2 %v4202_v6 }
 0x49d   :  { %v1681_v17 = vadd.f32 %v5470_v55, %v1680_v19  ;;  %v4201_v19 = vld [vmem:[%s6512_s17] sm:$0xff] }
 0x49f   :  { %v1702_v44 = vmax.f32 %v1681_v17, 0.0 }
 0x4a0   :  { %2071 = vmatpush.bf16.msra.mxu2 %v4201_v19 }
 0x4a4   :  { %v1682_v28 = vpop.f32.mrf.mxu3 }
 0x4a5   :  { %v1683_v40 = vadd.f32 %v5470_v55, %v1682_v28 }
 0x4a7   :  { %v1703_v46 = vmax.f32 %v1683_v40, 0.0 }
 0x4a9   :  { %v1712_v58 = vpack.c.bf16 %v1703_v46, %v1702_v44 }
 0x4ab   :  { %1820 = vmatmul.bf16.gmra.mxu0 %v1712_v58 }
 0x4ac   :  { %v1685_v51 = vpop.f32.mrf.mxu3 }
 0x4ad   :  { %v1686_v38 = vadd.f32 %v5470_v55, %v1685_v51 }
 0x4af   :  { %v1704_v30 = vmax.f32 %v1686_v38, 0.0 }
 0x4b4   :  { %v1687_v56 = vpop.f32.mrf.mxu3 }
 0x4b5   :  { %v1688_v24 = vadd.f32 %v5470_v55, %v1687_v56 }
 0x4b7   :  { %v1705_v39 = vmax.f32 %v1688_v24, 0.0 }
 0x4b9   :  { %v1713_v47 = vpack.c.bf16 %v1705_v39, %v1704_v30 }
 0x4bb   :  { %1825 = vmatmul.bf16.gmra.mxu0 %v1713_v47 }
 0x4c8   :  { %v1791_v45 = vpop.f32.mrf.mxu0 }
 0x4c9   :  { %v1792_v7 = vadd.f32 %v5515_v21, %v1791_v45 }
 0x4cb   :  { %v1831_v48 = vmax.f32 %v1792_v7, 0.0  ;;  %v5557_v7 = vld [vmem:[%s6513_s16] ss:$0 sm:$0xff] }
 0x4d0   :  { %v1793_v61 = vpop.f32.mrf.mxu0 }
 0x4d1   :  { %v1794_v55 = vadd.f32 %v5515_v21, %v1793_v61  ;;  %v4070_v61 = vld [vmem:[%s6515_s19 + $0x188] sm:$0xf] }
 0x4d3   :  { %v1832_v60 = vmax.f32 %v1794_v55, 0.0  ;;  %v4261_v55 = vld [vmem:[%s6515_s19 + $0x1a0] sm:$0xf0] }
 0x4d5   :  { %v1847_v31 = vpack.c.bf16 %v1832_v60, %v1831_v48  ;;  %v4071_v48 = vor.u32 %v4261_v55, %v4070_v61  ;;  %v4072_v60 = vld [vmem:[%s6515_s19 + $0x1a4] sm:$0xf0] }
 0x4d6   :  { %v3958_v55 = vld [vmem:[%s6515_s19 + $0xa8] sm:$0xf] }
 0x4d7   :  { %1931 = vmatmul.bf16.vlgmr.msrb.gmra.mxu1 %v1847_v31  ;;  %2505 = vmatpush.bf16.msra.mxu3 %v4071_v48  ;;  %v4233_v48 = vld [vmem:[%s6515_s19 + $0xc0] sm:$0xf0] }
 0x4d8   :  { %v1796_v25 = vpop.f32.mrf.mxu0 }
 0x4d9   :  { %v1797_v20 = vadd.f32 %v5515_v21, %v1796_v25  ;;  %v4262_v25 = vld [vmem:[%s6515_s19 + $0x1a8] sm:$0xf0] }
 0x4db   :  { %v1833_v3 = vmax.f32 %v1797_v20, 0.0  ;;  %v4079_v20 = vor.u32 %v4262_v25, %v4078_v42  ;;  %v3960_v42 = vld [vmem:[%s6515_s19 + $0xc4] sm:$0xf0] }
 0x4dd   :  { %2603 = vmatpush.bf16.msra.mxu1 %v4079_v20  ;;  %v4234_v20 = vld [vmem:[%s6515_s19 + $0xc8] sm:$0xf0] }
 0x4e0   :  { %v1798_v36 = vpop.f32.mrf.mxu0 }
 0x4e1   :  { %v1799_v22 = vadd.f32 %v5515_v21, %v1798_v36 }
 0x4e3   :  { %v1834_v4 = vmax.f32 %v1799_v22, 0.0 }
 0x4e5   :  { %v1848_v2 = vpack.c.bf16 %v1834_v4, %v1833_v3 }
 0x4e7   :  { %1936 = vmatmul.bf16.gmra.mxu1 %v1848_v2 }
 0x4e8   :  { %v1801_v54 = vpop.f32.mrf.mxu0 }
 0x4e9   :  { %v1802_v1 = vadd.f32 %v5515_v21, %v1801_v54 }
 0x4eb   :  { %v1835_v10 = vmax.f32 %v1802_v1, 0.0  ;;  %v4042_v1 = vld [vmem:[%s6515_s19 + $0x150] sm:$0xf] }
 0x4f0   :  { %v1803_v5 = vpop.f32.mrf.mxu0 }
 0x4f1   :  { %v1804_v18 = vadd.f32 %v5515_v21, %v1803_v5  ;;  %v4254_v5 = vld [vmem:[%s6515_s19 + $0x168] sm:$0xf0] }
 0x4f3   :  { %v1836_v37 = vmax.f32 %v1804_v18, 0.0  ;;  %v4043_v18 = vor.u32 %v4254_v5, %v4042_v1  ;;  %v3930_v5 = vld [vmem:[%s6515_s19 + $0x70] sm:$0xf] }
 0x4f5   :  { %v1849_v11 = vpack.c.bf16 %v1836_v37, %v1835_v10  ;;  %v4251_v10 = vld [vmem:[%s6515_s19 + $0x154] sm:$0xf]  ;;  %v4044_v37 = vld [vmem:[%s6515_s19 + $0x16c] sm:$0xf0]  ;;  %2506 = vmatpush.bf16.msra.mxu3 %v4043_v18  ;;  %v4226_v18 = vld [vmem:[%s6515_s19 + $0x88] sm:$0xf0] }
 0x4f7   :  { %1941 = vmatmul.bf16.gmra.mxu1 %v1849_v11  ;;  %v4047_v11 = vor.u32 %v4251_v10, %v4044_v37  ;;  %v3931_v10 = vor.u32 %v4226_v18, %v3930_v5  ;;  %v4223_v37 = vld [vmem:[%s6515_s19 + $0x74] sm:$0xf] }
 0x4f8   :  { %v1806_v59 = vpop.f32.mrf.mxu0 }
 0x4f9   :  { %v1807_v9 = vadd.f32 %v5515_v21, %v1806_v59  ;;  %v4255_v59 = vld [vmem:[%s6515_s19 + $0x170] sm:$0xf0] }
 0x4fb   :  { %v1837_v63 = vmax.f32 %v1807_v9, 0.0  ;;  %v4051_v9 = vor.u32 %v4255_v59, %v4050_v8  ;;  %v3932_v8 = vld [vmem:[%s6515_s19 + $0x8c] sm:$0xf0] }
 0x4fc   :  { %v3935_v59 = vor.u32 %v4223_v37, %v3932_v8  ;;  %v4210_v8 = vld [vmem:[%s6515_s19 + $0xc] sm:$0xf] }
 0x4fd   :  { %2604 = vmatpush.bf16.msra.mxu1 %v4051_v9  ;;  %v4227_v9 = vld [vmem:[%s6515_s19 + $0x90] sm:$0xf0] }
 0x500   :  { %v1808_v27 = vpop.f32.mrf.mxu0 }
 0x501   :  { %v1809_v49 = vadd.f32 %v5515_v21, %v1808_v27 }
 0x503   :  { %v1838_v52 = vmax.f32 %v1809_v49, 0.0 }
 0x505   :  { %v1850_v16 = vpack.c.bf16 %v1838_v52, %v1837_v63 }
 0x507   :  { %1946 = vmatmul.bf16.gmra.mxu1 %v1850_v16 }
 0x508   :  { %v1811_v57 = vpop.f32.mrf.mxu0 }
 0x509   :  { %v1812_v23 = vadd.f32 %v5515_v21, %v1811_v57 }
 0x50b   :  { %v1839_v53 = vmax.f32 %v1812_v23, 0.0  ;;  %v4014_v23 = vld [vmem:[%s6515_s19 + $0x118] sm:$0xf] }
 0x510   :  { %v1813_v26 = vpop.f32.mrf.mxu0 }
 0x511   :  { %v1814_v0 = vadd.f32 %v5515_v21, %v1813_v26  ;;  %v4247_v26 = vld [vmem:[%s6515_s19 + $0x130] sm:$0xf0] }
 0x513   :  { %v1840_v62 = vmax.f32 %v1814_v0, 0.0  ;;  %v4015_v0 = vor.u32 %v4247_v26, %v4014_v23  ;;  %v3902_v23 = vld [vmem:[%s6515_s19 + $0x38] sm:$0xf]  ;;  %v4219_v26 = vld [vmem:[%s6515_s19 + $0x50] sm:$0xf0] }
 0x515   :  { %v1851_v32 = vpack.c.bf16 %v1840_v62, %v1839_v53  ;;  %v4244_v53 = vld [vmem:[%s6515_s19 + $0x11c] sm:$0xf]  ;;  %v4016_v62 = vld [vmem:[%s6515_s19 + $0x134] sm:$0xf0]  ;;  %2507 = vmatpush.bf16.msra.mxu3 %v4015_v0  ;;  %v4259_v0 = vld [vmem:[%s6515_s19 + $0x194] sm:$0xf] }
 0x517   :  { %1951 = vmatmul.bf16.gmra.mxu1 %v1851_v32  ;;  %v4019_v32 = vor.u32 %v4244_v53, %v4016_v62  ;;  %v3903_v62 = vor.u32 %v4219_v26, %v3902_v23 }
 0x518   :  { %v1816_v15 = vpop.f32.mrf.mxu0 }
 0x519   :  { %v1817_v34 = vadd.f32 %v5515_v21, %v1816_v15  ;;  %v4248_v15 = vld [vmem:[%s6515_s19 + $0x138] sm:$0xf0] }
 0x51b   :  { %v1841_v14 = vmax.f32 %v1817_v34, 0.0  ;;  %v4023_v34 = vor.u32 %v4248_v15, %v4022_v13  ;;  %v4080_v13 = vld [vmem:[%s6515_s19 + $0x1ac] sm:$0xf0]  ;;  %v4052_v15 = vld [vmem:[%s6515_s19 + $0x174] sm:$0xf0] }
 0x51d   :  { %2605 = vmatpush.bf16.msra.mxu1 %v4023_v34  ;;  %v4083_v34 = vor.u32 %v4259_v0, %v4080_v13  ;;  %v4058_v0 = vld [vmem:[%s6515_s19 + $0x160] sm:$0xf] }
 0x51e   :  { %v5794_v13 = vld [vmem:[%s6514_s18] ss:$0 sm:$0xff] }
 0x51f   :  { %2652 = vmatpush.bf16.msrb.mxu2 %v4083_v34 }
 0x520   :  { %v1818_v35 = vpop.f32.mrf.mxu0 }
 0x521   :  { %v1819_v41 = vadd.f32 %v5515_v21, %v1818_v35 }
 0x523   :  { %v1842_v12 = vmax.f32 %v1819_v41, 0.0 }
 0x525   :  { %v1852_v29 = vpack.c.bf16 %v1842_v12, %v1841_v14 }
 0x527   :  { %1956 = vmatmul.bf16.gmra.mxu1 %v1852_v29 }
 0x528   :  { %v1821_v17 = vpop.f32.mrf.mxu0 }
 0x529   :  { %v1822_v28 = vadd.f32 %v5515_v21, %v1821_v17  ;;  %v3986_v17 = vld [vmem:[%s6515_s19 + $0xe0] sm:$0xf] }
 0x52b   :  { %v1843_v46 = vmax.f32 %v1822_v28, 0.0  ;;  %v4240_v28 = vld [vmem:[%s6515_s19 + $0xf8] sm:$0xf0] }
 0x530   :  { %v1823_v40 = vpop.f32.mrf.mxu0 }
 0x531   :  { %v1824_v44 = vadd.f32 %v5515_v21, %v1823_v40  ;;  %v3987_v40 = vor.u32 %v4240_v28, %v3986_v17  ;;  %v4245_v17 = vld [vmem:[%s6515_s19 + $0x124] sm:$0xf]  ;;  %v4024_v28 = vld [vmem:[%s6515_s19 + $0x13c] sm:$0xf0] }
 0x533   :  { %v1844_v58 = vmax.f32 %v1824_v44, 0.0  ;;  %v4237_v44 = vld [vmem:[%s6515_s19 + $0xe4] sm:$0xf]  ;;  %2508 = vmatpush.bf16.msra.mxu3 %v3987_v40  ;;  %v3874_v40 = vld [vmem:[%s6515_s19] sm:$0xf] }
 0x535   :  { %v1853_v51 = vpack.c.bf16 %v1844_v58, %v1843_v46  ;;  %v3988_v46 = vld [vmem:[%s6515_s19 + $0xfc] sm:$0xf0]  ;;  %v3994_v58 = vld [vmem:[%s6515_s19 + $0xe8] sm:$0xf] }
 0x537   :  { %1961 = vmatmul.bf16.gmra.mxu1 %v1853_v51  ;;  %v3991_v51 = vor.u32 %v4237_v44, %v3988_v46  ;;  %v4212_v44 = vld [vmem:[%s6515_s19 + $0x18] sm:$0xf0] }
 0x538   :  { %v1826_v38 = vpop.f32.mrf.mxu0  ;;  %v3875_v46 = vor.u32 %v4212_v44, %v3874_v40  ;;  %v4030_v44 = vld [vmem:[%s6515_s19 + $0x128] sm:$0xf] }
 0x539   :  { %v1827_v56 = vadd.f32 %v5515_v21, %v1826_v38  ;;  %v4241_v38 = vld [vmem:[%s6515_s19 + $0x100] sm:$0xf0] }
 0x53b   :  { %v1845_v39 = vmax.f32 %v1827_v56, 0.0  ;;  %v3995_v56 = vor.u32 %v4241_v38, %v3994_v58 }
 0x53d   :  { %2606 = vmatpush.bf16.msra.mxu1 %v3995_v56 }
 0x540   :  { %v1828_v24 = vpop.f32.mrf.mxu0 }
 0x541   :  { %v1829_v30 = vadd.f32 %v5515_v21, %v1828_v24  ;;  %v4258_v21 = vld [vmem:[%s6515_s19 + $0x18c] sm:$0xf] }
 0x542   :  { %v4075_v31 = vor.u32 %v4258_v21, %v4072_v60  ;;  %v3959_v21 = vor.u32 %v4233_v48, %v3958_v55  ;;  %v4230_v60 = vld [vmem:[%s6515_s19 + $0xac] sm:$0xf]  ;;  %v3968_v55 = vld [vmem:[%s6515_s19 + $0xcc] sm:$0xf0] }
 0x543   :  { %v1846_v47 = vmax.f32 %v1829_v30, 0.0  ;;  %v3963_v25 = vor.u32 %v4230_v60, %v3960_v42  ;;  %v4224_v60 = vld [vmem:[%s6515_s19 + $0x7c] sm:$0xf]  ;;  %v3940_v42 = vld [vmem:[%s6515_s19 + $0x94] sm:$0xf0] }
 0x544   :  { %2554 = vmatpush.bf16.msra.mxu0 %v4075_v31  ;;  %v3966_v31 = vld [vmem:[%s6515_s19 + $0xb0] sm:$0xf]  ;;  %2509 = vmatpush.bf16.msra.mxu3 %v3959_v21 }
 0x545   :  { %v1854_v50 = vpack.c.bf16 %v1846_v47, %v1845_v39 }
 0x547   :  { %1966 = vmatmul.bf16.gmra.mxu1 %v1854_v50 }
 0x548   :  { %2555 = vmatpush.bf16.msra.mxu0 %v4047_v11  ;;  %v3938_v11 = vld [vmem:[%s6515_s19 + $0x78] sm:$0xf]  ;;  %2510 = vmatpush.bf16.msra.mxu3 %v3931_v10 }
 0x54c   :  { %2556 = vmatpush.bf16.msra.mxu0 %v4019_v32  ;;  %v4252_v32 = vld [vmem:[%s6515_s19 + $0x15c] sm:$0xf]  ;;  %2511 = vmatpush.bf16.msra.mxu3 %v3903_v62 }
 0x550   :  { %2557 = vmatpush.bf16.msra.mxu0 %v3991_v51  ;;  %v4027_v51 = vor.u32 %v4245_v17, %v4024_v28  ;;  %2512 = vmatpush.bf16.msra.mxu3 %v3875_v46  ;;  %v4249_v46 = vld [vmem:[%s6515_s19 + $0x140] sm:$0xf0] }
 0x554   :  { %v1932_v45 = vpop.f32.mrf.mxu1  ;;  %2558 = vmatpush.bf16.msra.mxu0 %v3963_v25  ;;  %v4209_v25 = vld [vmem:[%s6515_s19 + $0x4] sm:$0xf] }
 0x555   :  { %v1933_v36 = vadd.f32 %v5557_v7, %v1932_v45 }
 0x557   :  { %v1972_v4 = vmax.f32 %v1933_v36, 0.0  ;;  %v3967_v36 = vor.u32 %v4234_v20, %v3966_v31  ;;  %v3943_v31 = vor.u32 %v4224_v60, %v3940_v42  ;;  %v3876_v20 = vld [vmem:[%s6515_s19 + $0x1c] sm:$0xf0]  ;;  %v4002_v60 = vld [vmem:[%s6515_s19 + $0xf0] sm:$0xf] }
 0x558   :  { %2559 = vmatpush.bf16.msra.mxu0 %v3935_v59  ;;  %v4242_v42 = vld [vmem:[%s6515_s19 + $0x108] sm:$0xf0] }
 0x559   :  { %2607 = vmatpush.bf16.msra.mxu1 %v3967_v36  ;;  %v3882_v36 = vld [vmem:[%s6515_s19 + $0x8] sm:$0xf] }
 0x55c   :  { %v1934_v22 = vpop.f32.mrf.mxu1 }
 0x55d   :  { %v1935_v3 = vadd.f32 %v5557_v7, %v1934_v22 }
 0x55f   :  { %v1973_v43 = vmax.f32 %v1935_v3, 0.0 }
 0x561   :  { %v1988_v2 = vpack.c.bf16 %v1973_v43, %v1972_v4 }
 0x563   :  { %2072 = vmatmul.bf16.vlgmr.msra.gmra.mxu2 %v1988_v2 }
 0x564   :  { %v1937_v54 = vpop.f32.mrf.mxu1 }
 0x565   :  { %v1938_v27 = vadd.f32 %v5557_v7, %v1937_v54 }
 0x567   :  { %v1974_v52 = vmax.f32 %v1938_v27, 0.0  ;;  %v3939_v27 = vor.u32 %v4227_v9, %v3938_v11  ;;  %v3884_v11 = vld [vmem:[%s6515_s19 + $0x24] sm:$0xf0] }
 0x568   :  { %v3887_v59 = vor.u32 %v4210_v8, %v3884_v11  ;;  %v4235_v8 = vld [vmem:[%s6515_s19 + $0xd0] sm:$0xf0] }
 0x569   :  { %2608 = vmatpush.bf16.msra.mxu1 %v3939_v27  ;;  %v4263_v27 = vld [vmem:[%s6515_s19 + $0x1b0] sm:$0xf0] }
 0x56c   :  { %v1939_v49 = vpop.f32.mrf.mxu1 }
 0x56d   :  { %v1940_v63 = vadd.f32 %v5557_v7, %v1939_v49 }
 0x56f   :  { %v1975_v33 = vmax.f32 %v1940_v63, 0.0 }
 0x571   :  { %v1989_v16 = vpack.c.bf16 %v1975_v33, %v1974_v52 }
 0x573   :  { %2077 = vmatmul.bf16.gmra.mxu2 %v1989_v16 }
 0x574   :  { %v1942_v57 = vpop.f32.mrf.mxu1 }
 0x575   :  { %v1943_v35 = vadd.f32 %v5557_v7, %v1942_v57 }
 0x577   :  { %v1976_v12 = vmax.f32 %v1943_v35, 0.0  ;;  %v4216_v35 = vld [vmem:[%s6515_s19 + $0x3c] sm:$0xf] }
 0x57c   :  { %v1944_v41 = vpop.f32.mrf.mxu1 }
 0x57d   :  { %v1945_v14 = vadd.f32 %v5557_v7, %v1944_v41  ;;  %v3904_v41 = vld [vmem:[%s6515_s19 + $0x54] sm:$0xf0] }
 0x57f   :  { %v1977_v6 = vmax.f32 %v1945_v14, 0.0  ;;  %v3910_v14 = vld [vmem:[%s6515_s19 + $0x40] sm:$0xf] }
 0x581   :  { %v1990_v29 = vpack.c.bf16 %v1977_v6, %v1976_v12  ;;  %v3907_v12 = vor.u32 %v4216_v35, %v3904_v41  ;;  %v4220_v6 = vld [vmem:[%s6515_s19 + $0x58] sm:$0xf0]  ;;  %v4066_v35 = vld [vmem:[%s6515_s19 + $0x168] sm:$0xf]  ;;  %v4257_v41 = vld [vmem:[%s6515_s19 + $0x180] sm:$0xf0] }
 0x583   :  { %2082 = vmatmul.bf16.gmra.mxu2 %v1990_v29  ;;  %v4055_v29 = vor.u32 %v4252_v32, %v4052_v15  ;;  %2560 = vmatpush.bf16.msra.mxu0 %v3907_v12  ;;  %v4253_v32 = vld [vmem:[%s6515_s19 + $0x164] sm:$0xf]  ;;  %v4060_v15 = vld [vmem:[%s6515_s19 + $0x17c] sm:$0xf0] }
 0x584   :  { %v1947_v19 = vpop.f32.mrf.mxu1  ;;  %v4063_v34 = vor.u32 %v4253_v32, %v4060_v15  ;;  %v4225_v15 = vld [vmem:[%s6515_s19 + $0x84] sm:$0xf] }
 0x585   :  { %v1948_v24 = vadd.f32 %v5557_v7, %v1947_v19  ;;  %v3911_v19 = vor.u32 %v4220_v6, %v3910_v14  ;;  %2653 = vmatpush.bf16.msrb.mxu2 %v4055_v29  ;;  %v4067_v14 = vor.u32 %v4257_v41, %v4066_v35  ;;  %v3954_v41 = vld [vmem:[%s6515_s19 + $0x88] sm:$0xf] }
 0x587   :  { %v1978_v47 = vmax.f32 %v1948_v24, 0.0  ;;  %2609 = vmatpush.bf16.msra.mxu1 %v3911_v19  ;;  %v4238_v24 = vld [vmem:[%s6515_s19 + $0xec] sm:$0xf] }
 0x589   :  { %2654 = vmatpush.bf16.msrb.mxu2 %v4027_v51  ;;  %v4246_v51 = vld [vmem:[%s6515_s19 + $0x12c] sm:$0xf] }
 0x58c   :  { %v1949_v30 = vpop.f32.mrf.mxu1 }
 0x58d   :  { %v1950_v39 = vadd.f32 %v5557_v7, %v1949_v30  ;;  %v3996_v30 = vld [vmem:[%s6515_s19 + $0x104] sm:$0xf0] }
 0x58f   :  { %v1979_v50 = vmax.f32 %v1950_v39, 0.0 }
 0x591   :  { %v1991_v45 = vpack.c.bf16 %v1979_v50, %v1978_v47  ;;  %v3999_v50 = vor.u32 %v4238_v24, %v3996_v30  ;;  %v4038_v24 = vld [vmem:[%s6515_s19 + $0x130] sm:$0xf]  ;;  %v4250_v30 = vld [vmem:[%s6515_s19 + $0x148] sm:$0xf0] }
 0x593   :  { %2087 = vmatmul.bf16.gmra.mxu2 %v1991_v45 }
 0x594   :  { %v1952_v61 = vpop.f32.mrf.mxu1  ;;  %2655 = vmatpush.bf16.msrb.mxu2 %v3999_v50 }
 0x595   :  { %v1953_v22 = vadd.f32 %v5557_v7, %v1952_v61  ;;  %v4231_v61 = vld [vmem:[%s6515_s19 + $0xb4] sm:$0xf] }
 0x596   :  { %v3971_v21 = vor.u32 %v4231_v61, %v3968_v55 }
 0x597   :  { %v1980_v43 = vmax.f32 %v1953_v22, 0.0  ;;  %v3879_v22 = vor.u32 %v4209_v25, %v3876_v20  ;;  %v4239_v25 = vld [vmem:[%s6515_s19 + $0xf4] sm:$0xf]  ;;  %v4004_v20 = vld [vmem:[%s6515_s19 + $0x10c] sm:$0xf0] }
 0x598   :  { %2656 = vmatpush.bf16.msrb.mxu2 %v3971_v21 }
 0x599   :  { %2561 = vmatpush.bf16.msra.mxu0 %v3879_v22  ;;  %v4010_v22 = vld [vmem:[%s6515_s19 + $0xf8] sm:$0xf] }
 0x59c   :  { %v1954_v3 = vpop.f32.mrf.mxu1  ;;  %2657 = vmatpush.bf16.msrb.mxu2 %v3943_v31  ;;  %v4003_v31 = vor.u32 %v4242_v42, %v4002_v60 }
 0x59d   :  { %v1955_v4 = vadd.f32 %v5557_v7, %v1954_v3  ;;  %v4213_v3 = vld [vmem:[%s6515_s19 + $0x20] sm:$0xf0] }
 0x59f   :  { %v1981_v2 = vmax.f32 %v1955_v4, 0.0 }
 0x5a1   :  { %v1992_v54 = vpack.c.bf16 %v1981_v2, %v1980_v43  ;;  %v3883_v43 = vor.u32 %v4213_v3, %v3882_v36  ;;  %v4217_v2 = vld [vmem:[%s6515_s19 + $0x44] sm:$0xf]  ;;  %v4007_v36 = vor.u32 %v4239_v25, %v4004_v20  ;;  %v4243_v3 = vld [vmem:[%s6515_s19 + $0x110] sm:$0xf0]  ;;  %v3890_v25 = vld [vmem:[%s6515_s19 + $0x10] sm:$0xf] }
 0x5a2   :  { %v4214_v20 = vld [vmem:[%s6515_s19 + $0x28] sm:$0xf0] }
 0x5a3   :  { %2092 = vmatmul.bf16.gmra.mxu2 %v1992_v54  ;;  %v3912_v54 = vld [vmem:[%s6515_s19 + $0x5c] sm:$0xf0]  ;;  %2610 = vmatpush.bf16.msra.mxu1 %v3883_v43 }
 0x5a4   :  { %v1957_v1 = vpop.f32.mrf.mxu1  ;;  %v3915_v5 = vor.u32 %v4217_v2, %v3912_v54 }
 0x5a5   :  { %v1958_v49 = vadd.f32 %v5557_v7, %v1957_v1 }
 0x5a6   :  { %2658 = vmatpush.bf16.msrb.mxu2 %v3915_v5 }
 0x5a7   :  { %v1982_v33 = vmax.f32 %v1958_v49, 0.0 }
 0x5aa   :  { %2659 = vmatpush.bf16.msrb.mxu2 %v3887_v59  ;;  %v4232_v59 = vld [vmem:[%s6515_s19 + $0xbc] sm:$0xf] }
 0x5ac   :  { %v1959_v63 = vpop.f32.mrf.mxu1 }
 0x5ad   :  { %v1960_v52 = vadd.f32 %v5557_v7, %v1959_v63  ;;  %v4260_v63 = vld [vmem:[%s6515_s19 + $0x19c] sm:$0xf] }
 0x5af   :  { %v1983_v16 = vmax.f32 %v1960_v52, 0.0  ;;  %v4088_v52 = vld [vmem:[%s6515_s19 + $0x1b4] sm:$0xf0] }
 0x5b1   :  { %v1993_v57 = vpack.c.bf16 %v1983_v16, %v1982_v33  ;;  %v4094_v33 = vld [vmem:[%s6515_s19 + $0x1a0] sm:$0xf]  ;;  %v4091_v16 = vor.u32 %v4260_v63, %v4088_v52 }
 0x5b3   :  { %2097 = vmatmul.bf16.gmra.mxu2 %v1993_v57  ;;  %v4264_v57 = vld [vmem:[%s6515_s19 + $0x1b8] sm:$0xf0]  ;;  %2750 = vmatpush.bf16.msrb.mxu0 %v4091_v16 }
 0x5b4   :  { %v1962_v53 = vpop.f32.mrf.mxu1  ;;  %v4095_v23 = vor.u32 %v4264_v57, %v4094_v33 }
 0x5b5   :  { %v1963_v58 = vadd.f32 %v5557_v7, %v1962_v53  ;;  %v4256_v53 = vld [vmem:[%s6515_s19 + $0x178] sm:$0xf0] }
 0x5b6   :  { %2799 = vmatpush.bf16.msrb.mxu1 %v4095_v23  ;;  %v4059_v62 = vor.u32 %v4256_v53, %v4058_v0  ;;  %v3946_v53 = vld [vmem:[%s6515_s19 + $0x80] sm:$0xf] }
 0x5b7   :  { %v1984_v39 = vmax.f32 %v1963_v58, 0.0  ;;  %2751 = vmatpush.bf16.msrb.mxu0 %v4063_v34  ;;  %v4031_v58 = vor.u32 %v4249_v46, %v4030_v44  ;;  %v3948_v34 = vld [vmem:[%s6515_s19 + $0x9c] sm:$0xf0] }
 0x5b8   :  { %v3951_v35 = vor.u32 %v4225_v15, %v3948_v34 }
 0x5ba   :  { %2800 = vmatpush.bf16.msrb.mxu1 %v4067_v14  ;;  %v4229_v14 = vld [vmem:[%s6515_s19 + $0xa0] sm:$0xf0] }
 0x5bc   :  { %v1964_v38 = vpop.f32.mrf.mxu1 }
 0x5bd   :  { %v1965_v56 = vadd.f32 %v5557_v7, %v1964_v38  ;;  %v4032_v38 = vld [vmem:[%s6515_s19 + $0x144] sm:$0xf0] }
 0x5bf   :  { %v1985_v47 = vmax.f32 %v1965_v56, 0.0  ;;  %v4035_v56 = vor.u32 %v4246_v51, %v4032_v38  ;;  %v4221_v51 = vld [vmem:[%s6515_s19 + $0x60] sm:$0xf0] }
 0x5c1   :  { %v1994_v45 = vpack.c.bf16 %v1985_v47, %v1984_v39  ;;  %v4039_v39 = vor.u32 %v4250_v30, %v4038_v24  ;;  %2752 = vmatpush.bf16.msrb.mxu0 %v4035_v56  ;;  %v4218_v56 = vld [vmem:[%s6515_s19 + $0x4c] sm:$0xf]  ;;  %v3920_v24 = vld [vmem:[%s6515_s19 + $0x64] sm:$0xf0] }
 0x5c2   :  { %v3923_v30 = vor.u32 %v4218_v56, %v3920_v24 }
 0x5c3   :  { %2102 = vmatmul.bf16.gmra.mxu2 %v1994_v45  ;;  %2801 = vmatpush.bf16.msrb.mxu1 %v4039_v39  ;;  %v3926_v39 = vld [vmem:[%s6515_s19 + $0x50] sm:$0xf] }
 0x5c4   :  { %v1967_v48 = vpop.f32.mrf.mxu1 }
 0x5c5   :  { %v1968_v4 = vadd.f32 %v5557_v7, %v1967_v48  ;;  %2753 = vmatpush.bf16.msrb.mxu0 %v4007_v36  ;;  %v4211_v36 = vld [vmem:[%s6515_s19 + $0x14] sm:$0xf] }
 0x5c7   :  { %v1986_v10 = vmax.f32 %v1968_v4, 0.0  ;;  %v4011_v4 = vor.u32 %v4243_v3, %v4010_v22  ;;  %v3891_v22 = vor.u32 %v4214_v20, %v3890_v25  ;;  %v3892_v3 = vld [vmem:[%s6515_s19 + $0x2c] sm:$0xf0] }
 0x5c9   :  { %2802 = vmatpush.bf16.msrb.mxu1 %v4011_v4  ;;  %v3898_v4 = vld [vmem:[%s6515_s19 + $0x18] sm:$0xf] }
 0x5cc   :  { %v1969_v1 = vpop.f32.mrf.mxu1 }
 0x5cd   :  { %v1970_v18 = vadd.f32 %v5557_v7, %v1969_v1  ;;  %v4086_v7 = vld [vmem:[%s6515_s19 + $0x198] sm:$0xf] }
 0x5ce   :  { %v4087_v49 = vor.u32 %v4263_v27, %v4086_v7  ;;  %v3982_v27 = vld [vmem:[%s6515_s19 + $0xc0] sm:$0xf] }
 0x5cf   :  { %v1987_v37 = vmax.f32 %v1970_v18, 0.0 }
 0x5d0   :  { %2701 = vmatpush.bf16.msrb.mxu3 %v4087_v49  ;;  %v4236_v49 = vld [vmem:[%s6515_s19 + $0xd8] sm:$0xf0] }
 0x5d1   :  { %v1995_v9 = vpack.c.bf16 %v1987_v37, %v1986_v10  ;;  %v3974_v37 = vld [vmem:[%s6515_s19 + $0xb8] sm:$0xf]  ;;  %v3983_v63 = vor.u32 %v4236_v49, %v3982_v27 }
 0x5d2   :  { %v3975_v11 = vor.u32 %v4235_v8, %v3974_v37 }
 0x5d3   :  { %2107 = vmatmul.bf16.gmra.mxu2 %v1995_v9  ;;  %v3976_v9 = vld [vmem:[%s6515_s19 + $0xd4] sm:$0xf0]  ;;  %2803 = vmatpush.bf16.msrb.mxu1 %v3983_v63 }
 0x5d4   :  { %2702 = vmatpush.bf16.msrb.mxu3 %v4059_v62  ;;  %v3979_v7 = vor.u32 %v4232_v59, %v3976_v9  ;;  %v4228_v62 = vld [vmem:[%s6515_s19 + $0x98] sm:$0xf0] }
 0x5d5   :  { %v3947_v32 = vor.u32 %v4228_v62, %v3946_v53 }
 0x5d6   :  { %2754 = vmatpush.bf16.msrb.mxu0 %v3979_v7 }
 0x5d8   :  { %2703 = vmatpush.bf16.msrb.mxu3 %v4031_v58  ;;  %v3918_v58 = vld [vmem:[%s6515_s19 + $0x48] sm:$0xf] }
 0x5d9   :  { %v3919_v38 = vor.u32 %v4221_v51, %v3918_v58 }
 0x5da   :  { %2755 = vmatpush.bf16.msrb.mxu0 %v3951_v35 }
 0x5dc   :  { %2704 = vmatpush.bf16.msrb.mxu3 %v4003_v31 }
 0x5de   :  { %2756 = vmatpush.bf16.msrb.mxu0 %v3923_v30 }
 0x5e0   :  { %2705 = vmatpush.bf16.msrb.mxu3 %v3975_v11 }
 0x5e4   :  { %2706 = vmatpush.bf16.msrb.mxu3 %v3947_v32 }
 0x5e6   :  { %v2073_v26 = vpop.f32.mrf.mxu2 }
 0x5e7   :  { %v2074_v12 = vadd.f32 %v5794_v13, %v2073_v26 }
 0x5e8   :  { %2707 = vmatpush.bf16.msrb.mxu3 %v3919_v38 }
 0x5e9   :  { %v2113_v19 = vmax.f32 %v2074_v12, 0.0  ;;  %v3955_v12 = vor.u32 %v4229_v14, %v3954_v41 }
 0x5eb   :  { %2804 = vmatpush.bf16.msrb.mxu1 %v3955_v12 }
 0x5ec   :  { %2708 = vmatpush.bf16.msrb.mxu3 %v3891_v22 }
 0x5ee   :  { %v2075_v6 = vpop.f32.mrf.mxu2 }
 0x5ef   :  { %v2076_v29 = vadd.f32 %v5794_v13, %v2075_v6 }
 0x5f1   :  { %v2114_v17 = vmax.f32 %v2076_v29, 0.0 }
 0x5f3   :  { %v5810_v28 = vpack.c.bf16 %v2114_v17, %v2113_v19 }
 0x5f5   :  { %2513 = vmatmul.bf16.vlgmr.msra.gmra.mxu3 %v5810_v28  ;;  %2562 = vmatmul.bf16.vlgmr.msra.gmra.mxu0 %v5810_v28 }
 0x5f6   :  { %2611 = vmatmul.bf16.vlgmr.msra.gmra.mxu1 %v5810_v28  ;;  %2660 = vmatmul.bf16.vlgmr.msrb.gmra.mxu2 %v5810_v28  ;;  %v2078_v40 = vpop.f32.mrf.mxu2 }
 0x5f7   :  { %v2079_v47 = vadd.f32 %v5794_v13, %v2078_v40 }
 0x5f9   :  { %v2115_v61 = vmax.f32 %v2079_v47, 0.0  ;;  %v4222_v47 = vld [vmem:[%s6515_s19 + $0x68] sm:$0xf0] }
 0x5fe   :  { %v2080_v50 = vpop.f32.mrf.mxu2 }
 0x5ff   :  { %v2081_v45 = vadd.f32 %v5794_v13, %v2080_v50  ;;  %v3927_v50 = vor.u32 %v4222_v47, %v3926_v39 }
 0x601   :  { %v2116_v55 = vmax.f32 %v2081_v45, 0.0  ;;  %2805 = vmatpush.bf16.msrb.mxu1 %v3927_v50 }
 0x603   :  { %v5836_v48 = vpack.c.bf16 %v2116_v55, %v2115_v61 }
 0x605   :  { %2518 = vmatmul.bf16.gmra.mxu3 %v5836_v48  ;;  %2567 = vmatmul.bf16.gmra.mxu0 %v5836_v48 }
 0x606   :  { %2616 = vmatmul.bf16.gmra.mxu1 %v5836_v48  ;;  %2665 = vmatmul.bf16.gmra.mxu2 %v5836_v48  ;;  %v2083_v21 = vpop.f32.mrf.mxu2 }
 0x607   :  { %v2084_v43 = vadd.f32 %v5794_v13, %v2083_v21 }
 0x609   :  { %v2117_v1 = vmax.f32 %v2084_v43, 0.0  ;;  %v4215_v43 = vld [vmem:[%s6515_s19 + $0x30] sm:$0xf0] }
 0x60e   :  { %v2085_v2 = vpop.f32.mrf.mxu2 }
 0x60f   :  { %v2086_v54 = vadd.f32 %v5794_v13, %v2085_v2  ;;  %v3895_v2 = vor.u32 %v4211_v36, %v3892_v3 }
 0x611   :  { %v2118_v5 = vmax.f32 %v2086_v54, 0.0  ;;  %v3899_v54 = vor.u32 %v4215_v43, %v3898_v4  ;;  %2757 = vmatpush.bf16.msrb.mxu0 %v3895_v2 }
 0x613   :  { %v5862_v18 = vpack.c.bf16 %v2118_v5, %v2117_v1  ;;  %2806 = vmatpush.bf16.msrb.mxu1 %v3899_v54 }
 0x615   :  { %2523 = vmatmul.bf16.gmra.mxu3 %v5862_v18  ;;  %2572 = vmatmul.bf16.gmra.mxu0 %v5862_v18 }
 0x616   :  { %2621 = vmatmul.bf16.gmra.mxu1 %v5862_v18  ;;  %2670 = vmatmul.bf16.gmra.mxu2 %v5862_v18  ;;  %v2088_v10 = vpop.f32.mrf.mxu2 }
 0x617   :  { %v2089_v52 = vadd.f32 %v5794_v13, %v2088_v10 }
 0x619   :  { %v2119_v57 = vmax.f32 %v2089_v52, 0.0 }
 0x61e   :  { %v2090_v33 = vpop.f32.mrf.mxu2 }
 0x61f   :  { %v2091_v16 = vadd.f32 %v5794_v13, %v2090_v33  ;;  %v5983_v33 = vld [vmem:[%s6516_s20] sm:$0x7f] }
 0x620   :  { %v5996_v32 = vperm.slane %v5983_v33, 0  ;;  %v6000_v34 = vperm.slane %v5983_v33, 3 }
 0x621   :  { %v2120_v23 = vmax.f32 %v2091_v16, 0.0  ;;  %v5986_v16 = vperm.slane %v5983_v33, 1 }
 0x623   :  { %v5888_v26 = vpack.c.bf16 %v2120_v23, %v2119_v57 }
 0x625   :  { %2528 = vmatmul.bf16.gmra.mxu3 %v5888_v26  ;;  %2577 = vmatmul.bf16.gmra.mxu0 %v5888_v26 }
 0x626   :  { %2626 = vmatmul.bf16.gmra.mxu1 %v5888_v26  ;;  %2675 = vmatmul.bf16.gmra.mxu2 %v5888_v26  ;;  %v2093_v0 = vpop.f32.mrf.mxu2 }
 0x627   :  { %v2094_v6 = vadd.f32 %v5794_v13, %v2093_v0 }
 0x629   :  { %v2121_v17 = vmax.f32 %v2094_v6, 0.0 }
 0x62e   :  { %v2095_v29 = vpop.f32.mrf.mxu2 }
 0x62f   :  { %v2096_v19 = vadd.f32 %v5794_v13, %v2095_v29 }
 0x631   :  { %v2122_v40 = vmax.f32 %v2096_v19, 0.0 }
 0x633   :  { %v5914_v44 = vpack.c.bf16 %v2122_v40, %v2121_v17 }
 0x635   :  { %2533 = vmatmul.bf16.gmra.mxu3 %v5914_v44  ;;  %2582 = vmatmul.bf16.gmra.mxu0 %v5914_v44 }
 0x636   :  { %2631 = vmatmul.bf16.gmra.mxu1 %v5914_v44  ;;  %2680 = vmatmul.bf16.gmra.mxu2 %v5914_v44  ;;  %v2098_v46 = vpop.f32.mrf.mxu2 }
 0x637   :  { %v2099_v45 = vadd.f32 %v5794_v13, %v2098_v46 }
 0x639   :  { %v2123_v21 = vmax.f32 %v2099_v45, 0.0 }
 0x63e   :  { %v2100_v61 = vpop.f32.mrf.mxu2 }
 0x63f   :  { %v2101_v55 = vadd.f32 %v5794_v13, %v2100_v61 }
 0x641   :  { %v2124_v60 = vmax.f32 %v2101_v55, 0.0 }
 0x643   :  { %v5940_v42 = vpack.c.bf16 %v2124_v60, %v2123_v21 }
 0x645   :  { %2538 = vmatmul.bf16.gmra.mxu3 %v5940_v42  ;;  %2587 = vmatmul.bf16.gmra.mxu0 %v5940_v42 }
 0x646   :  { %2636 = vmatmul.bf16.gmra.mxu1 %v5940_v42  ;;  %2685 = vmatmul.bf16.gmra.mxu2 %v5940_v42  ;;  %v2103_v31 = vpop.f32.mrf.mxu2 }
 0x647   :  { %v2104_v1 = vadd.f32 %v5794_v13, %v2103_v31 }
 0x649   :  { %v2125_v37 = vmax.f32 %v2104_v1, 0.0 }
 0x64e   :  { %v2105_v5 = vpop.f32.mrf.mxu2 }
 0x64f   :  { %v2106_v10 = vadd.f32 %v5794_v13, %v2105_v5 }
 0x651   :  { %v2126_v8 = vmax.f32 %v2106_v10, 0.0 }
 0x653   :  { %v5966_v11 = vpack.c.bf16 %v2126_v8, %v2125_v37 }
 0x655   :  { %2543 = vmatmul.bf16.gmra.mxu3 %v5966_v11  ;;  %2592 = vmatmul.bf16.gmra.mxu0 %v5966_v11 }
 0x656   :  { %2641 = vmatmul.bf16.gmra.mxu1 %v5966_v11  ;;  %2690 = vmatmul.bf16.gmra.mxu2 %v5966_v11  ;;  %v2108_v59 = vpop.f32.mrf.mxu2 }
 0x657   :  { %v2109_v9 = vadd.f32 %v5794_v13, %v2108_v59 }
 0x659   :  { %v2127_v49 = vmax.f32 %v2109_v9, 0.0 }
 0x65e   :  { %v2110_v7 = vpop.f32.mrf.mxu2 }
 0x65f   :  { %v2111_v27 = vadd.f32 %v5794_v13, %v2110_v7  ;;  %v5989_v13 = vperm.slane %v5983_v33, 2 }
 0x661   :  { %v2128_v63 = vmax.f32 %v2111_v27, 0.0 }
 0x663   :  { %v5974_v52 = vpack.c.bf16 %v2128_v63, %v2127_v49 }
 0x665   :  { %2548 = vmatmul.bf16.gmra.mxu3 %v5974_v52  ;;  %2597 = vmatmul.bf16.gmra.mxu0 %v5974_v52 }
 0x666   :  { %2646 = vmatmul.bf16.gmra.mxu1 %v5974_v52  ;;  %2695 = vmatmul.bf16.gmra.mxu2 %v5974_v52 }
 0x672   :  { %v2563_v57 = vpop.f32.mrf.mxu0 }
 0x673   :  { %v2564_v23 = vadd.f32 %v2563_v57, %v5986_v16  ;;  %v2612_v0 = vpop.f32.mrf.mxu1 }
 0x674   :  { %v2613_v53 = vadd.f32 %v2612_v0, %v5989_v13 }
 0x675   :  { %v2849_v62 = vmul.f32 0.5, %v2564_v23  ;;  %2709 = vmatmul.bf16.vlgmr.msrb.gmra.mxu3 %v5810_v28  ;;  %2758 = vmatmul.bf16.vlgmr.msrb.gmra.mxu0 %v5810_v28 }
 0x676   :  { %v2850_v15 = vmul.f32 0.5, %v2613_v53  ;;  %2807 = vmatmul.bf16.vlgmr.msrb.gmra.mxu1 %v5810_v28 }
 0x677   :  { %4290 = vtanh.f32 %v2849_v62 }
 0x678   :  { %4292 = vtanh.f32 %v2850_v15  ;;  %v2514_v35 = vpop.f32.mrf.mxu3 }
 0x679   :  { %v2515_v41 = vadd.f32 %v2514_v35, %v5996_v32  ;;  %v2661_v14 = vpop.f32.mrf.mxu2 }
 0x67a   :  { %v2662_v12 = vadd.f32 %v2661_v14, %v6000_v34  ;;  %v2565_v6 = vpop.f32.mrf.mxu0 }
 0x67b   :  { %v2848_v29 = vmul.f32 0.5, %v2515_v41  ;;  %v2566_v19 = vadd.f32 %v2565_v6, %v5986_v16  ;;  %v2614_v17 = vpop.f32.mrf.mxu1 }
 0x67c   :  { %v2851_v40 = vmul.f32 0.5, %v2662_v12  ;;  %v2615_v46 = vadd.f32 %v2614_v17, %v5989_v13 }
 0x67d   :  { %v4291_v28 = vpop.eup %4290  ;;  %4294 = vtanh.f32 %v2848_v29  ;;  %v2856_v58 = vmul.f32 0.5, %v2566_v19 }
 0x67e   :  { %v4293_v51 = vpop.eup %4292  ;;  %v3073_v38 = vadd.f32 1.0, %v4291_v28  ;;  %4296 = vtanh.f32 %v2851_v40  ;;  %v2857_v56 = vmul.f32 0.5, %v2615_v46 }
 0x67f   :  { %v3074_v24 = vadd.f32 1.0, %v4293_v51  ;;  %4298 = vtanh.f32 %v2856_v58 }
 0x680   :  { %v3185_v30 = vmul.f32 0.5, %v3073_v38  ;;  %4300 = vtanh.f32 %v2857_v56  ;;  %v2516_v39 = vpop.f32.mrf.mxu3 }
 0x681   :  { %v3186_v47 = vmul.f32 0.5, %v3074_v24  ;;  %v2517_v50 = vadd.f32 %v2516_v39, %v5996_v32  ;;  %v2663_v45 = vpop.f32.mrf.mxu2 }
 0x682   :  { %3297 = vst [vmem:[%s6517_s21 + $0x8] sm:$0xff] %v3185_v30  ;;  %v2664_v61 = vadd.f32 %v2663_v45, %v6000_v34  ;;  %v2568_v55 = vpop.f32.mrf.mxu0 }
 0x683   :  { %v4295_v21 = vpop.eup %4294  ;;  %3298 = vst [vmem:[%s6517_s21 + $0x10] sm:$0xff] %v3186_v47  ;;  %v2855_v60 = vmul.f32 0.5, %v2517_v50  ;;  %v2569_v31 = vadd.f32 %v2568_v55, %v5986_v16  ;;  %v2617_v25 = vpop.f32.mrf.mxu1 }
 0x684   :  { %v4297_v20 = vpop.eup %4296  ;;  %v3072_v36 = vadd.f32 1.0, %v4295_v21  ;;  %v2858_v22 = vmul.f32 0.5, %v2664_v61  ;;  %v2618_v3 = vadd.f32 %v2617_v25, %v5989_v13 }
 0x685   :  { %v4299_v4 = vpop.eup %4298  ;;  %v3075_v43 = vadd.f32 1.0, %v4297_v20  ;;  %4302 = vtanh.f32 %v2855_v60  ;;  %v2863_v2 = vmul.f32 0.5, %v2569_v31  ;;  %2714 = vmatmul.bf16.gmra.mxu3 %v5836_v48  ;;  %2763 = vmatmul.bf16.gmra.mxu0 %v5836_v48 }
 0x686   :  { %v4301_v54 = vpop.eup %4300  ;;  %v3184_v1 = vmul.f32 0.5, %v3072_v36  ;;  %v3080_v5 = vadd.f32 1.0, %v4299_v4  ;;  %4304 = vtanh.f32 %v2858_v22  ;;  %v2864_v10 = vmul.f32 0.5, %v2618_v3  ;;  %2812 = vmatmul.bf16.gmra.mxu1 %v5836_v48 }
 0x687   :  { %v3187_v37 = vmul.f32 0.5, %v3075_v43  ;;  %v3081_v8 = vadd.f32 1.0, %v4301_v54  ;;  %4306 = vtanh.f32 %v2863_v2 }
 0x688   :  { %3296 = vst [vmem:[%s6517_s21] sm:$0xff] %v3184_v1  ;;  %v3192_v59 = vmul.f32 0.5, %v3080_v5  ;;  %4308 = vtanh.f32 %v2864_v10  ;;  %v2519_v9 = vpop.f32.mrf.mxu3 }
 0x689   :  { %3299 = vst [vmem:[%s6517_s21 + $0x18] sm:$0xff] %v3187_v37  ;;  %v3193_v7 = vmul.f32 0.5, %v3081_v8  ;;  %v2520_v27 = vadd.f32 %v2519_v9, %v5996_v32  ;;  %v2666_v49 = vpop.f32.mrf.mxu2 }
 0x68a   :  { %3304 = vst [vmem:[%s6517_s21 + $0x40] sm:$0xff] %v3192_v59  ;;  %v2667_v48 = vadd.f32 %v2666_v49, %v6000_v34  ;;  %v2570_v63 = vpop.f32.mrf.mxu0 }
 0x68b   :  { %v4303_v57 = vpop.eup %4302  ;;  %3305 = vst [vmem:[%s6517_s21 + $0x48] sm:$0xff] %v3193_v7  ;;  %v2862_v23 = vmul.f32 0.5, %v2520_v27  ;;  %v2571_v0 = vadd.f32 %v2570_v63, %v5986_v16  ;;  %v2619_v53 = vpop.f32.mrf.mxu1 }
 0x68c   :  { %v4305_v62 = vpop.eup %4304  ;;  %v3079_v15 = vadd.f32 1.0, %v4303_v57  ;;  %v2865_v35 = vmul.f32 0.5, %v2667_v48  ;;  %v2620_v41 = vadd.f32 %v2619_v53, %v5989_v13 }
 0x68d   :  { %v4307_v14 = vpop.eup %4306  ;;  %v3082_v12 = vadd.f32 1.0, %v4305_v62  ;;  %4310 = vtanh.f32 %v2862_v23  ;;  %v2870_v6 = vmul.f32 0.5, %v2571_v0 }
 0x68e   :  { %v4309_v29 = vpop.eup %4308  ;;  %v3191_v19 = vmul.f32 0.5, %v3079_v15  ;;  %v3087_v17 = vadd.f32 1.0, %v4307_v14  ;;  %4312 = vtanh.f32 %v2865_v35  ;;  %v2871_v40 = vmul.f32 0.5, %v2620_v41 }
 0x68f   :  { %v3194_v46 = vmul.f32 0.5, %v3082_v12  ;;  %v3088_v28 = vadd.f32 1.0, %v4309_v29  ;;  %4314 = vtanh.f32 %v2870_v6 }
 0x690   :  { %3303 = vst [vmem:[%s6517_s21 + $0x38] sm:$0xff] %v3191_v19  ;;  %v3199_v58 = vmul.f32 0.5, %v3087_v17  ;;  %4316 = vtanh.f32 %v2871_v40  ;;  %v2521_v51 = vpop.f32.mrf.mxu3 }
 0x691   :  { %3306 = vst [vmem:[%s6517_s21 + $0x50] sm:$0xff] %v3194_v46  ;;  %v3200_v38 = vmul.f32 0.5, %v3088_v28  ;;  %v2522_v56 = vadd.f32 %v2521_v51, %v5996_v32  ;;  %v2668_v24 = vpop.f32.mrf.mxu2 }
 0x692   :  { %3311 = vst [vmem:[%s6517_s21 + $0x78] sm:$0xff] %v3199_v58  ;;  %v2669_v30 = vadd.f32 %v2668_v24, %v6000_v34  ;;  %v2573_v39 = vpop.f32.mrf.mxu0 }
 0x693   :  { %v4311_v47 = vpop.eup %4310  ;;  %3312 = vst [vmem:[%s6517_s21 + $0x80] sm:$0xff] %v3200_v38  ;;  %v2869_v50 = vmul.f32 0.5, %v2522_v56  ;;  %v2574_v45 = vadd.f32 %v2573_v39, %v5986_v16  ;;  %v2622_v61 = vpop.f32.mrf.mxu1 }
 0x694   :  { %v4313_v55 = vpop.eup %4312  ;;  %v3086_v21 = vadd.f32 1.0, %v4311_v47  ;;  %v2872_v60 = vmul.f32 0.5, %v2669_v30  ;;  %v2623_v31 = vadd.f32 %v2622_v61, %v5989_v13 }
 0x695   :  { %v4315_v25 = vpop.eup %4314  ;;  %v3089_v20 = vadd.f32 1.0, %v4313_v55  ;;  %4318 = vtanh.f32 %v2869_v50  ;;  %v2877_v36 = vmul.f32 0.5, %v2574_v45  ;;  %2719 = vmatmul.bf16.gmra.mxu3 %v5862_v18  ;;  %2768 = vmatmul.bf16.gmra.mxu0 %v5862_v18 }
 0x696   :  { %v4317_v22 = vpop.eup %4316  ;;  %v3198_v3 = vmul.f32 0.5, %v3086_v21  ;;  %v3094_v4 = vadd.f32 1.0, %v4315_v25  ;;  %4320 = vtanh.f32 %v2872_v60  ;;  %v2878_v43 = vmul.f32 0.5, %v2623_v31  ;;  %2817 = vmatmul.bf16.gmra.mxu1 %v5862_v18 }
 0x697   :  { %v3201_v2 = vmul.f32 0.5, %v3089_v20  ;;  %v3095_v54 = vadd.f32 1.0, %v4317_v22  ;;  %4322 = vtanh.f32 %v2877_v36 }
 0x698   :  { %3310 = vst [vmem:[%s6517_s21 + $0x70] sm:$0xff] %v3198_v3  ;;  %v3206_v1 = vmul.f32 0.5, %v3094_v4  ;;  %4324 = vtanh.f32 %v2878_v43  ;;  %v2524_v5 = vpop.f32.mrf.mxu3 }
 0x699   :  { %3313 = vst [vmem:[%s6517_s21 + $0x88] sm:$0xff] %v3201_v2  ;;  %v3207_v10 = vmul.f32 0.5, %v3095_v54  ;;  %v2525_v37 = vadd.f32 %v2524_v5, %v5996_v32  ;;  %v2671_v8 = vpop.f32.mrf.mxu2 }
 0x69a   :  { %3318 = vst [vmem:[%s6517_s21 + $0xb0] sm:$0xff] %v3206_v1  ;;  %v2672_v18 = vadd.f32 %v2671_v8, %v6000_v34  ;;  %v2575_v59 = vpop.f32.mrf.mxu0 }
 0x69b   :  { %v4319_v9 = vpop.eup %4318  ;;  %3319 = vst [vmem:[%s6517_s21 + $0xb8] sm:$0xff] %v3207_v10  ;;  %v2876_v7 = vmul.f32 0.5, %v2525_v37  ;;  %v2576_v27 = vadd.f32 %v2575_v59, %v5986_v16  ;;  %v2624_v49 = vpop.f32.mrf.mxu1 }
 0x69c   :  { %v4321_v48 = vpop.eup %4320  ;;  %v3093_v63 = vadd.f32 1.0, %v4319_v9  ;;  %v2879_v57 = vmul.f32 0.5, %v2672_v18  ;;  %v2625_v23 = vadd.f32 %v2624_v49, %v5989_v13 }
 0x69d   :  { %v4323_v0 = vpop.eup %4322  ;;  %v3096_v53 = vadd.f32 1.0, %v4321_v48  ;;  %4326 = vtanh.f32 %v2876_v7  ;;  %v2884_v62 = vmul.f32 0.5, %v2576_v27 }
 0x69e   :  { %v4325_v15 = vpop.eup %4324  ;;  %v3205_v35 = vmul.f32 0.5, %v3093_v63  ;;  %v3101_v41 = vadd.f32 1.0, %v4323_v0  ;;  %4328 = vtanh.f32 %v2879_v57  ;;  %v2885_v14 = vmul.f32 0.5, %v2625_v23 }
 0x69f   :  { %v3208_v12 = vmul.f32 0.5, %v3096_v53  ;;  %v3102_v6 = vadd.f32 1.0, %v4325_v15  ;;  %4330 = vtanh.f32 %v2884_v62 }
 0x6a0   :  { %3317 = vst [vmem:[%s6517_s21 + $0xa8] sm:$0xff] %v3205_v35  ;;  %v3213_v29 = vmul.f32 0.5, %v3101_v41  ;;  %4332 = vtanh.f32 %v2885_v14  ;;  %v2526_v19 = vpop.f32.mrf.mxu3 }
 0x6a1   :  { %3320 = vst [vmem:[%s6517_s21 + $0xc0] sm:$0xff] %v3208_v12  ;;  %v3214_v17 = vmul.f32 0.5, %v3102_v6  ;;  %v2527_v40 = vadd.f32 %v2526_v19, %v5996_v32  ;;  %v2673_v46 = vpop.f32.mrf.mxu2 }
 0x6a2   :  { %3325 = vst [vmem:[%s6517_s21 + $0xe8] sm:$0xff] %v3213_v29  ;;  %v2674_v28 = vadd.f32 %v2673_v46, %v6000_v34  ;;  %v2578_v58 = vpop.f32.mrf.mxu0 }
 0x6a3   :  { %v4327_v51 = vpop.eup %4326  ;;  %3326 = vst [vmem:[%s6517_s21 + $0xf0] sm:$0xff] %v3214_v17  ;;  %v2883_v38 = vmul.f32 0.5, %v2527_v40  ;;  %v2579_v56 = vadd.f32 %v2578_v58, %v5986_v16  ;;  %v2627_v24 = vpop.f32.mrf.mxu1 }
 0x6a4   :  { %v4329_v30 = vpop.eup %4328  ;;  %v3100_v39 = vadd.f32 1.0, %v4327_v51  ;;  %v2886_v47 = vmul.f32 0.5, %v2674_v28  ;;  %v2628_v50 = vadd.f32 %v2627_v24, %v5989_v13 }
 0x6a5   :  { %v4331_v45 = vpop.eup %4330  ;;  %v3103_v61 = vadd.f32 1.0, %v4329_v30  ;;  %4334 = vtanh.f32 %v2883_v38  ;;  %v2891_v55 = vmul.f32 0.5, %v2579_v56  ;;  %2724 = vmatmul.bf16.gmra.mxu3 %v5888_v26  ;;  %2773 = vmatmul.bf16.gmra.mxu0 %v5888_v26 }
 0x6a6   :  { %v4333_v21 = vpop.eup %4332  ;;  %v3212_v60 = vmul.f32 0.5, %v3100_v39  ;;  %v3108_v31 = vadd.f32 1.0, %v4331_v45  ;;  %4336 = vtanh.f32 %v2886_v47  ;;  %v2892_v25 = vmul.f32 0.5, %v2628_v50  ;;  %2822 = vmatmul.bf16.gmra.mxu1 %v5888_v26 }
 0x6a7   :  { %v3215_v20 = vmul.f32 0.5, %v3103_v61  ;;  %v3109_v36 = vadd.f32 1.0, %v4333_v21  ;;  %4338 = vtanh.f32 %v2891_v55 }
 0x6a8   :  { %3324 = vst [vmem:[%s6517_s21 + $0xe0] sm:$0xff] %v3212_v60  ;;  %v3220_v22 = vmul.f32 0.5, %v3108_v31  ;;  %4340 = vtanh.f32 %v2892_v25  ;;  %v2529_v3 = vpop.f32.mrf.mxu3 }
 0x6a9   :  { %3327 = vst [vmem:[%s6517_s21 + $0xf8] sm:$0xff] %v3215_v20  ;;  %v3221_v4 = vmul.f32 0.5, %v3109_v36  ;;  %v2530_v43 = vadd.f32 %v2529_v3, %v5996_v32  ;;  %v2676_v2 = vpop.f32.mrf.mxu2 }
 0x6aa   :  { %3332 = vst [vmem:[%s6517_s21 + $0x120] sm:$0xff] %v3220_v22  ;;  %v2677_v26 = vadd.f32 %v2676_v2, %v6000_v34  ;;  %v2580_v54 = vpop.f32.mrf.mxu0 }
 0x6ab   :  { %v4335_v1 = vpop.eup %4334  ;;  %3333 = vst [vmem:[%s6517_s21 + $0x128] sm:$0xff] %v3221_v4  ;;  %v2890_v5 = vmul.f32 0.5, %v2530_v43  ;;  %v2581_v10 = vadd.f32 %v2580_v54, %v5986_v16  ;;  %v2629_v37 = vpop.f32.mrf.mxu1 }
 0x6ac   :  { %v4337_v8 = vpop.eup %4336  ;;  %v3107_v18 = vadd.f32 1.0, %v4335_v1  ;;  %v2893_v59 = vmul.f32 0.5, %v2677_v26  ;;  %v2630_v9 = vadd.f32 %v2629_v37, %v5989_v13 }
 0x6ad   :  { %v4339_v7 = vpop.eup %4338  ;;  %v3110_v27 = vadd.f32 1.0, %v4337_v8  ;;  %4342 = vtanh.f32 %v2890_v5  ;;  %v2898_v49 = vmul.f32 0.5, %v2581_v10 }
 0x6ae   :  { %v4341_v48 = vpop.eup %4340  ;;  %v3219_v63 = vmul.f32 0.5, %v3107_v18  ;;  %v3115_v57 = vadd.f32 1.0, %v4339_v7  ;;  %4344 = vtanh.f32 %v2893_v59  ;;  %v2899_v23 = vmul.f32 0.5, %v2630_v9 }
 0x6af   :  { %v3222_v0 = vmul.f32 0.5, %v3110_v27  ;;  %v3116_v53 = vadd.f32 1.0, %v4341_v48  ;;  %4346 = vtanh.f32 %v2898_v49 }
 0x6b0   :  { %3331 = vst [vmem:[%s6517_s21 + $0x118] sm:$0xff] %v3219_v63  ;;  %v3227_v62 = vmul.f32 0.5, %v3115_v57  ;;  %4348 = vtanh.f32 %v2899_v23  ;;  %v2531_v15 = vpop.f32.mrf.mxu3 }
 0x6b1   :  { %3334 = vst [vmem:[%s6517_s21 + $0x130] sm:$0xff] %v3222_v0  ;;  %v3228_v35 = vmul.f32 0.5, %v3116_v53  ;;  %v2532_v41 = vadd.f32 %v2531_v15, %v5996_v32  ;;  %v2678_v14 = vpop.f32.mrf.mxu2 }
 0x6b2   :  { %3339 = vst [vmem:[%s6517_s21 + $0x158] sm:$0xff] %v3227_v62  ;;  %v2679_v12 = vadd.f32 %v2678_v14, %v6000_v34  ;;  %v2583_v6 = vpop.f32.mrf.mxu0 }
 0x6b3   :  { %v4343_v29 = vpop.eup %4342  ;;  %3340 = vst [vmem:[%s6517_s21 + $0x160] sm:$0xff] %v3228_v35  ;;  %v2897_v19 = vmul.f32 0.5, %v2532_v41  ;;  %v2584_v17 = vadd.f32 %v2583_v6, %v5986_v16  ;;  %v2632_v40 = vpop.f32.mrf.mxu1 }
 0x6b4   :  { %v4345_v46 = vpop.eup %4344  ;;  %v3114_v28 = vadd.f32 1.0, %v4343_v29  ;;  %v2900_v58 = vmul.f32 0.5, %v2679_v12  ;;  %v2633_v51 = vadd.f32 %v2632_v40, %v5989_v13 }
 0x6b5   :  { %v4347_v38 = vpop.eup %4346  ;;  %v3117_v56 = vadd.f32 1.0, %v4345_v46  ;;  %4350 = vtanh.f32 %v2897_v19  ;;  %v2905_v24 = vmul.f32 0.5, %v2584_v17  ;;  %2729 = vmatmul.bf16.gmra.mxu3 %v5914_v44  ;;  %2778 = vmatmul.bf16.gmra.mxu0 %v5914_v44 }
 0x6b6   :  { %v4349_v30 = vpop.eup %4348  ;;  %v3226_v39 = vmul.f32 0.5, %v3114_v28  ;;  %v3122_v47 = vadd.f32 1.0, %v4347_v38  ;;  %4352 = vtanh.f32 %v2900_v58  ;;  %v2906_v50 = vmul.f32 0.5, %v2633_v51  ;;  %2827 = vmatmul.bf16.gmra.mxu1 %v5914_v44 }
 0x6b7   :  { %v3229_v45 = vmul.f32 0.5, %v3117_v56  ;;  %v3123_v61 = vadd.f32 1.0, %v4349_v30  ;;  %4354 = vtanh.f32 %v2905_v24 }
 0x6b8   :  { %3338 = vst [vmem:[%s6517_s21 + $0x150] sm:$0xff] %v3226_v39  ;;  %v3234_v55 = vmul.f32 0.5, %v3122_v47  ;;  %4356 = vtanh.f32 %v2906_v50  ;;  %v2534_v21 = vpop.f32.mrf.mxu3 }
 0x6b9   :  { %3341 = vst [vmem:[%s6517_s21 + $0x168] sm:$0xff] %v3229_v45  ;;  %v3235_v60 = vmul.f32 0.5, %v3123_v61  ;;  %v2535_v31 = vadd.f32 %v2534_v21, %v5996_v32  ;;  %v2681_v25 = vpop.f32.mrf.mxu2 }
 0x6ba   :  { %3346 = vst [vmem:[%s6517_s21 + $0x190] sm:$0xff] %v3234_v55  ;;  %v2682_v44 = vadd.f32 %v2681_v25, %v6000_v34  ;;  %v2585_v20 = vpop.f32.mrf.mxu0 }
 0x6bb   :  { %v4351_v36 = vpop.eup %4350  ;;  %3347 = vst [vmem:[%s6517_s21 + $0x198] sm:$0xff] %v3235_v60  ;;  %v2904_v22 = vmul.f32 0.5, %v2535_v31  ;;  %v2586_v3 = vadd.f32 %v2585_v20, %v5986_v16  ;;  %v2634_v4 = vpop.f32.mrf.mxu1 }
 0x6bc   :  { %v4353_v43 = vpop.eup %4352  ;;  %v3121_v2 = vadd.f32 1.0, %v4351_v36  ;;  %v2907_v26 = vmul.f32 0.5, %v2682_v44  ;;  %v2635_v54 = vadd.f32 %v2634_v4, %v5989_v13 }
 0x6bd   :  { %v4355_v1 = vpop.eup %4354  ;;  %v3124_v5 = vadd.f32 1.0, %v4353_v43  ;;  %4358 = vtanh.f32 %v2904_v22  ;;  %v2912_v10 = vmul.f32 0.5, %v2586_v3 }
 0x6be   :  { %v4357_v37 = vpop.eup %4356  ;;  %v3233_v8 = vmul.f32 0.5, %v3121_v2  ;;  %v3129_v18 = vadd.f32 1.0, %v4355_v1  ;;  %4360 = vtanh.f32 %v2907_v26  ;;  %v2913_v59 = vmul.f32 0.5, %v2635_v54 }
 0x6bf   :  { %v3236_v9 = vmul.f32 0.5, %v3124_v5  ;;  %v3130_v7 = vadd.f32 1.0, %v4357_v37  ;;  %4362 = vtanh.f32 %v2912_v10 }
 0x6c0   :  { %3345 = vst [vmem:[%s6517_s21 + $0x188] sm:$0xff] %v3233_v8  ;;  %v3241_v27 = vmul.f32 0.5, %v3129_v18  ;;  %4364 = vtanh.f32 %v2913_v59  ;;  %v2536_v49 = vpop.f32.mrf.mxu3 }
 0x6c1   :  { %3348 = vst [vmem:[%s6517_s21 + $0x1a0] sm:$0xff] %v3236_v9  ;;  %v3242_v48 = vmul.f32 0.5, %v3130_v7  ;;  %v2537_v63 = vadd.f32 %v2536_v49, %v5996_v32  ;;  %v2683_v57 = vpop.f32.mrf.mxu2 }
 0x6c2   :  { %3353 = vst [vmem:[%s6517_s21 + $0x1c8] sm:$0xff] %v3241_v27  ;;  %v2684_v23 = vadd.f32 %v2683_v57, %v6000_v34  ;;  %v2588_v0 = vpop.f32.mrf.mxu0 }
 0x6c3   :  { %v4359_v53 = vpop.eup %4358  ;;  %3354 = vst [vmem:[%s6517_s21 + $0x1d0] sm:$0xff] %v3242_v48  ;;  %v2911_v62 = vmul.f32 0.5, %v2537_v63  ;;  %v2589_v15 = vadd.f32 %v2588_v0, %v5986_v16  ;;  %v2637_v35 = vpop.f32.mrf.mxu1 }
 0x6c4   :  { %v4361_v41 = vpop.eup %4360  ;;  %v3128_v14 = vadd.f32 1.0, %v4359_v53  ;;  %v2914_v12 = vmul.f32 0.5, %v2684_v23  ;;  %v2638_v6 = vadd.f32 %v2637_v35, %v5989_v13 }
 0x6c5   :  { %v4363_v29 = vpop.eup %4362  ;;  %v3131_v19 = vadd.f32 1.0, %v4361_v41  ;;  %4366 = vtanh.f32 %v2911_v62  ;;  %v2919_v17 = vmul.f32 0.5, %v2589_v15  ;;  %2734 = vmatmul.bf16.gmra.mxu3 %v5940_v42  ;;  %2783 = vmatmul.bf16.gmra.mxu0 %v5940_v42 }
 0x6c6   :  { %v4365_v40 = vpop.eup %4364  ;;  %v3240_v46 = vmul.f32 0.5, %v3128_v14  ;;  %v3136_v28 = vadd.f32 1.0, %v4363_v29  ;;  %4368 = vtanh.f32 %v2914_v12  ;;  %v2920_v58 = vmul.f32 0.5, %v2638_v6  ;;  %2832 = vmatmul.bf16.gmra.mxu1 %v5940_v42 }
 0x6c7   :  { %v3243_v51 = vmul.f32 0.5, %v3131_v19  ;;  %v3137_v38 = vadd.f32 1.0, %v4365_v40  ;;  %4370 = vtanh.f32 %v2919_v17 }
 0x6c8   :  { %3352 = vst [vmem:[%s6517_s21 + $0x1c0] sm:$0xff] %v3240_v46  ;;  %v3248_v56 = vmul.f32 0.5, %v3136_v28  ;;  %4372 = vtanh.f32 %v2920_v58  ;;  %v2539_v24 = vpop.f32.mrf.mxu3 }
 0x6c9   :  { %3355 = vst [vmem:[%s6517_s21 + $0x1d8] sm:$0xff] %v3243_v51  ;;  %v3249_v30 = vmul.f32 0.5, %v3137_v38  ;;  %v2540_v39 = vadd.f32 %v2539_v24, %v5996_v32  ;;  %v2686_v47 = vpop.f32.mrf.mxu2 }
 0x6ca   :  { %3360 = vst [vmem:[%s6517_s21 + $0x200] sm:$0xff] %v3248_v56  ;;  %v2687_v42 = vadd.f32 %v2686_v47, %v6000_v34  ;;  %v2590_v50 = vpop.f32.mrf.mxu0 }
 0x6cb   :  { %v4367_v45 = vpop.eup %4366  ;;  %3361 = vst [vmem:[%s6517_s21 + $0x208] sm:$0xff] %v3249_v30  ;;  %v2918_v61 = vmul.f32 0.5, %v2540_v39  ;;  %v2591_v55 = vadd.f32 %v2590_v50, %v5986_v16  ;;  %v2639_v21 = vpop.f32.mrf.mxu1 }
 0x6cc   :  { %v4369_v60 = vpop.eup %4368  ;;  %v3135_v31 = vadd.f32 1.0, %v4367_v45  ;;  %v2921_v25 = vmul.f32 0.5, %v2687_v42  ;;  %v2640_v44 = vadd.f32 %v2639_v21, %v5989_v13 }
 0x6cd   :  { %v4371_v20 = vpop.eup %4370  ;;  %v3138_v36 = vadd.f32 1.0, %v4369_v60  ;;  %4374 = vtanh.f32 %v2918_v61  ;;  %v2926_v22 = vmul.f32 0.5, %v2591_v55 }
 0x6ce   :  { %v4373_v3 = vpop.eup %4372  ;;  %v3247_v4 = vmul.f32 0.5, %v3135_v31  ;;  %v3143_v43 = vadd.f32 1.0, %v4371_v20  ;;  %4376 = vtanh.f32 %v2921_v25  ;;  %v2927_v2 = vmul.f32 0.5, %v2640_v44 }
 0x6cf   :  { %v3250_v26 = vmul.f32 0.5, %v3138_v36  ;;  %v3144_v54 = vadd.f32 1.0, %v4373_v3  ;;  %4378 = vtanh.f32 %v2926_v22 }
 0x6d0   :  { %3359 = vst [vmem:[%s6517_s21 + $0x1f8] sm:$0xff] %v3247_v4  ;;  %v3255_v1 = vmul.f32 0.5, %v3143_v43  ;;  %4380 = vtanh.f32 %v2927_v2  ;;  %v2541_v5 = vpop.f32.mrf.mxu3 }
 0x6d1   :  { %3362 = vst [vmem:[%s6517_s21 + $0x210] sm:$0xff] %v3250_v26  ;;  %v3256_v10 = vmul.f32 0.5, %v3144_v54  ;;  %v2542_v37 = vadd.f32 %v2541_v5, %v5996_v32  ;;  %v2688_v8 = vpop.f32.mrf.mxu2 }
 0x6d2   :  { %3367 = vst [vmem:[%s6517_s21 + $0x238] sm:$0xff] %v3255_v1  ;;  %v2689_v18 = vadd.f32 %v2688_v8, %v6000_v34  ;;  %v2593_v59 = vpop.f32.mrf.mxu0 }
 0x6d3   :  { %v4375_v9 = vpop.eup %4374  ;;  %3368 = vst [vmem:[%s6517_s21 + $0x240] sm:$0xff] %v3256_v10  ;;  %v2925_v7 = vmul.f32 0.5, %v2542_v37  ;;  %v2594_v27 = vadd.f32 %v2593_v59, %v5986_v16  ;;  %v2642_v49 = vpop.f32.mrf.mxu1 }
 0x6d4   :  { %v4377_v48 = vpop.eup %4376  ;;  %v3142_v63 = vadd.f32 1.0, %v4375_v9  ;;  %v2928_v57 = vmul.f32 0.5, %v2689_v18  ;;  %v2643_v23 = vadd.f32 %v2642_v49, %v5989_v13 }
 0x6d5   :  { %v4379_v0 = vpop.eup %4378  ;;  %v3145_v53 = vadd.f32 1.0, %v4377_v48  ;;  %4382 = vtanh.f32 %v2925_v7  ;;  %v2933_v62 = vmul.f32 0.5, %v2594_v27  ;;  %2739 = vmatmul.bf16.gmra.mxu3 %v5966_v11  ;;  %2788 = vmatmul.bf16.gmra.mxu0 %v5966_v11 }
 0x6d6   :  { %v4381_v15 = vpop.eup %4380  ;;  %v3254_v35 = vmul.f32 0.5, %v3142_v63  ;;  %v3150_v41 = vadd.f32 1.0, %v4379_v0  ;;  %4384 = vtanh.f32 %v2928_v57  ;;  %v2934_v14 = vmul.f32 0.5, %v2643_v23  ;;  %2837 = vmatmul.bf16.gmra.mxu1 %v5966_v11 }
 0x6d7   :  { %v3257_v12 = vmul.f32 0.5, %v3145_v53  ;;  %v3151_v6 = vadd.f32 1.0, %v4381_v15  ;;  %4386 = vtanh.f32 %v2933_v62 }
 0x6d8   :  { %3366 = vst [vmem:[%s6517_s21 + $0x230] sm:$0xff] %v3254_v35  ;;  %v3262_v29 = vmul.f32 0.5, %v3150_v41  ;;  %4388 = vtanh.f32 %v2934_v14  ;;  %v2544_v19 = vpop.f32.mrf.mxu3 }
 0x6d9   :  { %3369 = vst [vmem:[%s6517_s21 + $0x248] sm:$0xff] %v3257_v12  ;;  %v3263_v17 = vmul.f32 0.5, %v3151_v6  ;;  %v2545_v40 = vadd.f32 %v2544_v19, %v5996_v32  ;;  %v2691_v46 = vpop.f32.mrf.mxu2 }
 0x6da   :  { %3374 = vst [vmem:[%s6517_s21 + $0x270] sm:$0xff] %v3262_v29  ;;  %v2692_v11 = vadd.f32 %v2691_v46, %v6000_v34  ;;  %v2595_v28 = vpop.f32.mrf.mxu0 }
 0x6db   :  { %v4383_v58 = vpop.eup %4382  ;;  %3375 = vst [vmem:[%s6517_s21 + $0x278] sm:$0xff] %v3263_v17  ;;  %v2932_v51 = vmul.f32 0.5, %v2545_v40  ;;  %v2596_v38 = vadd.f32 %v2595_v28, %v5986_v16  ;;  %v2644_v56 = vpop.f32.mrf.mxu1 }
 0x6dc   :  { %v4385_v24 = vpop.eup %4384  ;;  %v3149_v30 = vadd.f32 1.0, %v4383_v58  ;;  %v2935_v39 = vmul.f32 0.5, %v2692_v11  ;;  %v2645_v47 = vadd.f32 %v2644_v56, %v5989_v13 }
 0x6dd   :  { %v4387_v42 = vpop.eup %4386  ;;  %v3152_v50 = vadd.f32 1.0, %v4385_v24  ;;  %4390 = vtanh.f32 %v2932_v51  ;;  %v2940_v45 = vmul.f32 0.5, %v2596_v38 }
 0x6de   :  { %v4389_v61 = vpop.eup %4388  ;;  %v3261_v55 = vmul.f32 0.5, %v3149_v30  ;;  %v3157_v21 = vadd.f32 1.0, %v4387_v42  ;;  %4392 = vtanh.f32 %v2935_v39  ;;  %v2941_v60 = vmul.f32 0.5, %v2645_v47 }
 0x6df   :  { %v3264_v31 = vmul.f32 0.5, %v3152_v50  ;;  %v3158_v25 = vadd.f32 1.0, %v4389_v61  ;;  %4394 = vtanh.f32 %v2940_v45  ;;  %v6252_v47 = vperm.slane %v5983_v33, 6 }
 0x6e0   :  { %3373 = vst [vmem:[%s6517_s21 + $0x268] sm:$0xff] %v3261_v55  ;;  %v3269_v44 = vmul.f32 0.5, %v3157_v21  ;;  %4396 = vtanh.f32 %v2941_v60  ;;  %v2546_v20 = vpop.f32.mrf.mxu3 }
 0x6e1   :  { %3376 = vst [vmem:[%s6517_s21 + $0x280] sm:$0xff] %v3264_v31  ;;  %v3270_v36 = vmul.f32 0.5, %v3158_v25  ;;  %v2547_v22 = vadd.f32 %v2546_v20, %v5996_v32  ;;  %v2693_v3 = vpop.f32.mrf.mxu2 }
 0x6e2   :  { %3381 = vst [vmem:[%s6517_s21 + $0x2a8] sm:$0xff] %v3269_v44  ;;  %v2694_v4 = vadd.f32 %v2693_v3, %v6000_v34  ;;  %v2598_v43 = vpop.f32.mrf.mxu0 }
 0x6e3   :  { %v4391_v2 = vpop.eup %4390  ;;  %3382 = vst [vmem:[%s6517_s21 + $0x2b0] sm:$0xff] %v3270_v36  ;;  %v2939_v26 = vmul.f32 0.5, %v2547_v22  ;;  %v2599_v54 = vadd.f32 %v2598_v43, %v5986_v16  ;;  %v2647_v1 = vpop.f32.mrf.mxu1 }
 0x6e4   :  { %v4393_v5 = vpop.eup %4392  ;;  %v3156_v10 = vadd.f32 1.0, %v4391_v2  ;;  %v2942_v37 = vmul.f32 0.5, %v2694_v4  ;;  %v2648_v8 = vadd.f32 %v2647_v1, %v5989_v13 }
 0x6e5   :  { %v4395_v18 = vpop.eup %4394  ;;  %v3159_v59 = vadd.f32 1.0, %v4393_v5  ;;  %4398 = vtanh.f32 %v2939_v26  ;;  %v2947_v9 = vmul.f32 0.5, %v2599_v54  ;;  %2744 = vmatmul.bf16.gmra.mxu3 %v5974_v52  ;;  %2793 = vmatmul.bf16.gmra.mxu0 %v5974_v52 }
 0x6e6   :  { %v4397_v7 = vpop.eup %4396  ;;  %v3268_v27 = vmul.f32 0.5, %v3156_v10  ;;  %v3164_v49 = vadd.f32 1.0, %v4395_v18  ;;  %4400 = vtanh.f32 %v2942_v37  ;;  %v2948_v48 = vmul.f32 0.5, %v2648_v8  ;;  %2842 = vmatmul.bf16.gmra.mxu1 %v5974_v52 }
 0x6e7   :  { %v3271_v63 = vmul.f32 0.5, %v3159_v59  ;;  %v3165_v57 = vadd.f32 1.0, %v4397_v7  ;;  %4402 = vtanh.f32 %v2947_v9 }
 0x6e8   :  { %3380 = vst [vmem:[%s6517_s21 + $0x2a0] sm:$0xff] %v3268_v27  ;;  %v3276_v23 = vmul.f32 0.5, %v3164_v49  ;;  %4404 = vtanh.f32 %v2948_v48  ;;  %v2549_v0 = vpop.f32.mrf.mxu3 }
 0x6e9   :  { %3383 = vst [vmem:[%s6517_s21 + $0x2b8] sm:$0xff] %v3271_v63  ;;  %v3277_v53 = vmul.f32 0.5, %v3165_v57  ;;  %v2550_v62 = vadd.f32 %v2549_v0, %v5996_v32  ;;  %v2696_v15 = vpop.f32.mrf.mxu2 }
 0x6ea   :  { %3388 = vst [vmem:[%s6517_s21 + $0x2e0] sm:$0xff] %v3276_v23  ;;  %v2697_v52 = vadd.f32 %v2696_v15, %v6000_v34  ;;  %v2600_v35 = vpop.f32.mrf.mxu0 }
 0x6eb   :  { %v4399_v41 = vpop.eup %4398  ;;  %3389 = vst [vmem:[%s6517_s21 + $0x2e8] sm:$0xff] %v3277_v53  ;;  %v2946_v14 = vmul.f32 0.5, %v2550_v62  ;;  %v2601_v12 = vadd.f32 %v2600_v35, %v5986_v16  ;;  %v2649_v6 = vpop.f32.mrf.mxu1  ;;  %v6246_v16 = vperm.slane %v5983_v33, 5 }
 0x6ec   :  { %v4401_v29 = vpop.eup %4400  ;;  %v3163_v19 = vadd.f32 1.0, %v4399_v41  ;;  %v2949_v17 = vmul.f32 0.5, %v2697_v52  ;;  %v2650_v40 = vadd.f32 %v2649_v6, %v5989_v13 }
 0x6ed   :  { %v4403_v46 = vpop.eup %4402  ;;  %v3166_v11 = vadd.f32 1.0, %v4401_v29  ;;  %4406 = vtanh.f32 %v2946_v14  ;;  %v2954_v28 = vmul.f32 0.5, %v2601_v12 }
 0x6ee   :  { %v4405_v58 = vpop.eup %4404  ;;  %v3275_v51 = vmul.f32 0.5, %v3163_v19  ;;  %v3171_v38 = vadd.f32 1.0, %v4403_v46  ;;  %4408 = vtanh.f32 %v2949_v17  ;;  %v2955_v56 = vmul.f32 0.5, %v2650_v40 }
 0x6ef   :  { %v3278_v24 = vmul.f32 0.5, %v3166_v11  ;;  %v3172_v30 = vadd.f32 1.0, %v4405_v58  ;;  %4410 = vtanh.f32 %v2954_v28 }
 0x6f0   :  { %3387 = vst [vmem:[%s6517_s21 + $0x2d8] sm:$0xff] %v3275_v51  ;;  %v3283_v13 = vmul.f32 0.5, %v3171_v38  ;;  %4412 = vtanh.f32 %v2955_v56  ;;  %v2551_v39 = vpop.f32.mrf.mxu3 }
 0x6f1   :  { %3390 = vst [vmem:[%s6517_s21 + $0x2f0] sm:$0xff] %v3278_v24  ;;  %v3284_v42 = vmul.f32 0.5, %v3172_v30  ;;  %v2552_v50 = vadd.f32 %v2551_v39, %v5996_v32  ;;  %v2698_v45 = vpop.f32.mrf.mxu2 }
 0x6f2   :  { %3395 = vst [vmem:[%s6517_s21 + $0x318] sm:$0xff] %v3283_v13  ;;  %v2699_v61 = vadd.f32 %v2698_v45, %v6000_v34  ;;  %v2759_v55 = vpop.f32.mrf.mxu0  ;;  %v4514_v34 = vld [vmem:[%s6516_s20] sm:$0x7f] }
 0x6f3   :  { %v4407_v21 = vpop.eup %4406  ;;  %3396 = vst [vmem:[%s6517_s21 + $0x320] sm:$0xff] %v3284_v42  ;;  %v2953_v33 = vmul.f32 0.5, %v2552_v50  ;;  %v2760_v60 = vadd.f32 %v2759_v55, %v6246_v16  ;;  %v2808_v31 = vpop.f32.mrf.mxu1  ;;  %v6270_v4 = vperm.slane %v4514_v34, 4 }
 0x6f4   :  { %v4409_v25 = vpop.eup %4408  ;;  %v3170_v44 = vadd.f32 1.0, %v4407_v21  ;;  %v2956_v32 = vmul.f32 0.5, %v2699_v61  ;;  %v2809_v20 = vadd.f32 %v2808_v31, %v6252_v47 }
 0x6f5   :  { %v4411_v36 = vpop.eup %4410  ;;  %v3173_v22 = vadd.f32 1.0, %v4409_v25  ;;  %4414 = vtanh.f32 %v2953_v33  ;;  %v2853_v3 = vmul.f32 0.5, %v2760_v60 }
 0x6f6   :  { %v4413_v43 = vpop.eup %4412  ;;  %v3282_v2 = vmul.f32 0.5, %v3170_v44  ;;  %v3178_v26 = vadd.f32 1.0, %v4411_v36  ;;  %4416 = vtanh.f32 %v2956_v32  ;;  %v2854_v54 = vmul.f32 0.5, %v2809_v20 }
 0x6f7   :  { %v3285_v1 = vmul.f32 0.5, %v3173_v22  ;;  %v3179_v5 = vadd.f32 1.0, %v4413_v43  ;;  %4418 = vtanh.f32 %v2853_v3 }
 0x6f8   :  { %3394 = vst [vmem:[%s6517_s21 + $0x310] sm:$0xff] %v3282_v2  ;;  %v3290_v10 = vmul.f32 0.5, %v3178_v26  ;;  %4420 = vtanh.f32 %v2854_v54  ;;  %v2710_v37 = vpop.f32.mrf.mxu3 }
 0x6f9   :  { %3397 = vst [vmem:[%s6517_s21 + $0x328] sm:$0xff] %v3285_v1  ;;  %v3291_v8 = vmul.f32 0.5, %v3179_v5  ;;  %v2711_v18 = vadd.f32 %v2710_v37, %v6270_v4 }
 0x6fa   :  { %3402 = vst [vmem:[%s6517_s21 + $0x350] sm:$0xff] %v3290_v10  ;;  %v2761_v59 = vpop.f32.mrf.mxu0 }
 0x6fb   :  { %v4415_v9 = vpop.eup %4414  ;;  %3403 = vst [vmem:[%s6517_s21 + $0x358] sm:$0xff] %v3291_v8  ;;  %v2852_v7 = vmul.f32 0.5, %v2711_v18  ;;  %v2762_v27 = vadd.f32 %v2761_v59, %v6246_v16  ;;  %v2810_v49 = vpop.f32.mrf.mxu1 }
 0x6fc   :  { %v4417_v48 = vpop.eup %4416  ;;  %v3177_v63 = vadd.f32 1.0, %v4415_v9  ;;  %v2811_v57 = vadd.f32 %v2810_v49, %v6252_v47 }
 0x6fd   :  { %v4419_v23 = vpop.eup %4418  ;;  %v3180_v0 = vadd.f32 1.0, %v4417_v48  ;;  %4422 = vtanh.f32 %v2852_v7  ;;  %v2860_v53 = vmul.f32 0.5, %v2762_v27 }
 0x6fe   :  { %v4421_v62 = vpop.eup %4420  ;;  %v3289_v15 = vmul.f32 0.5, %v3177_v63  ;;  %v3077_v52 = vadd.f32 1.0, %v4419_v23  ;;  %v2861_v35 = vmul.f32 0.5, %v2811_v57 }
 0x6ff   :  { %v3292_v41 = vmul.f32 0.5, %v3180_v0  ;;  %v3078_v14 = vadd.f32 1.0, %v4421_v62  ;;  %4424 = vtanh.f32 %v2860_v53 }
 0x700   :  { %3401 = vst [vmem:[%s6517_s21 + $0x348] sm:$0xff] %v3289_v15  ;;  %v3189_v12 = vmul.f32 0.5, %v3077_v52  ;;  %4426 = vtanh.f32 %v2861_v35  ;;  %v2712_v6 = vpop.f32.mrf.mxu3 }
 0x701   :  { %3404 = vst [vmem:[%s6517_s21 + $0x360] sm:$0xff] %v3292_v41  ;;  %v3190_v29 = vmul.f32 0.5, %v3078_v14  ;;  %v2713_v19 = vadd.f32 %v2712_v6, %v6270_v4 }
 0x702   :  { %3301 = vst [vmem:[%s6517_s21 + $0x28] sm:$0xff] %v3189_v12  ;;  %v2764_v17 = vpop.f32.mrf.mxu0 }
 0x703   :  { %v4423_v40 = vpop.eup %4422  ;;  %3302 = vst.msk [vmem:[%s6517_s21 + $0x30] sm:$0xff] %vm633_vm0, %v3190_v29  ;;  %v2859_v46 = vmul.f32 0.5, %v2713_v19  ;;  %v2765_v11 = vadd.f32 %v2764_v17, %v6246_v16  ;;  %v2813_v28 = vpop.f32.mrf.mxu1 }
 0x704   :  { %v3076_v58 = vadd.f32 1.0, %v4423_v40  ;;  %v2814_v51 = vadd.f32 %v2813_v28, %v6252_v47 }
 0x705   :  { %v4425_v38 = vpop.eup %4424  ;;  %4428 = vtanh.f32 %v2859_v46  ;;  %v2867_v56 = vmul.f32 0.5, %v2765_v11 }
 0x706   :  { %v4427_v24 = vpop.eup %4426  ;;  %v3188_v30 = vmul.f32 0.5, %v3076_v58  ;;  %v3084_v13 = vadd.f32 1.0, %v4425_v38  ;;  %v2868_v39 = vmul.f32 0.5, %v2814_v51 }
 0x707   :  { %v3085_v42 = vadd.f32 1.0, %v4427_v24  ;;  %4430 = vtanh.f32 %v2867_v56 }
 0x708   :  { %3300 = vst [vmem:[%s6517_s21 + $0x20] sm:$0xff] %v3188_v30  ;;  %v3196_v50 = vmul.f32 0.5, %v3084_v13  ;;  %4432 = vtanh.f32 %v2868_v39  ;;  %v2715_v45 = vpop.f32.mrf.mxu3 }
 0x709   :  { %v3197_v61 = vmul.f32 0.5, %v3085_v42  ;;  %v2716_v55 = vadd.f32 %v2715_v45, %v6270_v4 }
 0x70a   :  { %3308 = vst [vmem:[%s6517_s21 + $0x60] sm:$0xff] %v3196_v50  ;;  %v2766_v21 = vpop.f32.mrf.mxu0 }
 0x70b   :  { %v4429_v33 = vpop.eup %4428  ;;  %3309 = vst.msk [vmem:[%s6517_s21 + $0x68] sm:$0xff] %vm633_vm0, %v3197_v61  ;;  %v2866_v60 = vmul.f32 0.5, %v2716_v55  ;;  %v2767_v31 = vadd.f32 %v2766_v21, %v6246_v16  ;;  %v2815_v25 = vpop.f32.mrf.mxu1 }
 0x70c   :  { %v3083_v44 = vadd.f32 1.0, %v4429_v33  ;;  %v2816_v32 = vadd.f32 %v2815_v25, %v6252_v47 }
 0x70d   :  { %v4431_v20 = vpop.eup %4430  ;;  %4434 = vtanh.f32 %v2866_v60  ;;  %v2874_v36 = vmul.f32 0.5, %v2767_v31 }
 0x70e   :  { %v4433_v22 = vpop.eup %4432  ;;  %v3195_v3 = vmul.f32 0.5, %v3083_v44  ;;  %v3091_v34 = vadd.f32 1.0, %v4431_v20  ;;  %v2875_v43 = vmul.f32 0.5, %v2816_v32 }
 0x70f   :  { %v3092_v2 = vadd.f32 1.0, %v4433_v22  ;;  %4436 = vtanh.f32 %v2874_v36 }
 0x710   :  { %3307 = vst [vmem:[%s6517_s21 + $0x58] sm:$0xff] %v3195_v3  ;;  %v3203_v26 = vmul.f32 0.5, %v3091_v34  ;;  %4438 = vtanh.f32 %v2875_v43  ;;  %v2717_v54 = vpop.f32.mrf.mxu3 }
 0x711   :  { %v3204_v1 = vmul.f32 0.5, %v3092_v2  ;;  %v2718_v5 = vadd.f32 %v2717_v54, %v6270_v4 }
 0x712   :  { %3315 = vst [vmem:[%s6517_s21 + $0x98] sm:$0xff] %v3203_v26  ;;  %v2769_v10 = vpop.f32.mrf.mxu0 }
 0x713   :  { %v4435_v37 = vpop.eup %4434  ;;  %3316 = vst.msk [vmem:[%s6517_s21 + $0xa0] sm:$0xff] %vm633_vm0, %v3204_v1  ;;  %v2873_v8 = vmul.f32 0.5, %v2718_v5  ;;  %v2770_v18 = vadd.f32 %v2769_v10, %v6246_v16  ;;  %v2818_v59 = vpop.f32.mrf.mxu1 }
 0x714   :  { %v3090_v9 = vadd.f32 1.0, %v4435_v37  ;;  %v2819_v7 = vadd.f32 %v2818_v59, %v6252_v47 }
 0x715   :  { %v4437_v27 = vpop.eup %4436  ;;  %4440 = vtanh.f32 %v2873_v8  ;;  %v2881_v49 = vmul.f32 0.5, %v2770_v18 }
 0x716   :  { %v4439_v48 = vpop.eup %4438  ;;  %v3202_v63 = vmul.f32 0.5, %v3090_v9  ;;  %v3098_v57 = vadd.f32 1.0, %v4437_v27  ;;  %v2882_v23 = vmul.f32 0.5, %v2819_v7 }
 0x717   :  { %v3099_v0 = vadd.f32 1.0, %v4439_v48  ;;  %4442 = vtanh.f32 %v2881_v49 }
 0x718   :  { %3314 = vst [vmem:[%s6517_s21 + $0x90] sm:$0xff] %v3202_v63  ;;  %v3210_v53 = vmul.f32 0.5, %v3098_v57  ;;  %4444 = vtanh.f32 %v2882_v23  ;;  %v2720_v62 = vpop.f32.mrf.mxu3 }
 0x719   :  { %v3211_v15 = vmul.f32 0.5, %v3099_v0  ;;  %v2721_v52 = vadd.f32 %v2720_v62, %v6270_v4 }
 0x71a   :  { %3322 = vst [vmem:[%s6517_s21 + $0xd0] sm:$0xff] %v3210_v53  ;;  %v2771_v35 = vpop.f32.mrf.mxu0 }
 0x71b   :  { %v4441_v41 = vpop.eup %4440  ;;  %3323 = vst.msk [vmem:[%s6517_s21 + $0xd8] sm:$0xff] %vm633_vm0, %v3211_v15  ;;  %v2880_v14 = vmul.f32 0.5, %v2721_v52  ;;  %v2772_v12 = vadd.f32 %v2771_v35, %v6246_v16  ;;  %v2820_v6 = vpop.f32.mrf.mxu1 }
 0x71c   :  { %v3097_v29 = vadd.f32 1.0, %v4441_v41  ;;  %v2821_v19 = vadd.f32 %v2820_v6, %v6252_v47 }
 0x71d   :  { %v4443_v17 = vpop.eup %4442  ;;  %4446 = vtanh.f32 %v2880_v14  ;;  %v2888_v40 = vmul.f32 0.5, %v2772_v12 }
 0x71e   :  { %v4445_v46 = vpop.eup %4444  ;;  %v3209_v11 = vmul.f32 0.5, %v3097_v29  ;;  %v3105_v28 = vadd.f32 1.0, %v4443_v17  ;;  %v2889_v58 = vmul.f32 0.5, %v2821_v19 }
 0x71f   :  { %v3106_v51 = vadd.f32 1.0, %v4445_v46  ;;  %4448 = vtanh.f32 %v2888_v40 }
 0x720   :  { %3321 = vst [vmem:[%s6517_s21 + $0xc8] sm:$0xff] %v3209_v11  ;;  %v3217_v38 = vmul.f32 0.5, %v3105_v28  ;;  %4450 = vtanh.f32 %v2889_v58  ;;  %v2722_v56 = vpop.f32.mrf.mxu3 }
 0x721   :  { %v3218_v24 = vmul.f32 0.5, %v3106_v51  ;;  %v2723_v30 = vadd.f32 %v2722_v56, %v6270_v4 }
 0x722   :  { %3329 = vst [vmem:[%s6517_s21 + $0x108] sm:$0xff] %v3217_v38  ;;  %v2774_v13 = vpop.f32.mrf.mxu0 }
 0x723   :  { %v4447_v39 = vpop.eup %4446  ;;  %3330 = vst.msk [vmem:[%s6517_s21 + $0x110] sm:$0xff] %vm633_vm0, %v3218_v24  ;;  %v2887_v42 = vmul.f32 0.5, %v2723_v30  ;;  %v2775_v50 = vadd.f32 %v2774_v13, %v6246_v16  ;;  %v2823_v45 = vpop.f32.mrf.mxu1 }
 0x724   :  { %v3104_v61 = vadd.f32 1.0, %v4447_v39  ;;  %v2824_v55 = vadd.f32 %v2823_v45, %v6252_v47 }
 0x725   :  { %v4449_v21 = vpop.eup %4448  ;;  %4452 = vtanh.f32 %v2887_v42  ;;  %v2895_v33 = vmul.f32 0.5, %v2775_v50 }
 0x726   :  { %v4451_v60 = vpop.eup %4450  ;;  %v3216_v31 = vmul.f32 0.5, %v3104_v61  ;;  %v3112_v25 = vadd.f32 1.0, %v4449_v21  ;;  %v2896_v44 = vmul.f32 0.5, %v2824_v55 }
 0x727   :  { %v3113_v32 = vadd.f32 1.0, %v4451_v60  ;;  %4454 = vtanh.f32 %v2895_v33 }
 0x728   :  { %3328 = vst [vmem:[%s6517_s21 + $0x100] sm:$0xff] %v3216_v31  ;;  %v3224_v20 = vmul.f32 0.5, %v3112_v25  ;;  %4456 = vtanh.f32 %v2896_v44  ;;  %v2725_v36 = vpop.f32.mrf.mxu3 }
 0x729   :  { %v3225_v22 = vmul.f32 0.5, %v3113_v32  ;;  %v2726_v3 = vadd.f32 %v2725_v36, %v6270_v4 }
 0x72a   :  { %3336 = vst [vmem:[%s6517_s21 + $0x140] sm:$0xff] %v3224_v20  ;;  %v2776_v34 = vpop.f32.mrf.mxu0 }
 0x72b   :  { %v4453_v43 = vpop.eup %4452  ;;  %3337 = vst.msk [vmem:[%s6517_s21 + $0x148] sm:$0xff] %vm633_vm0, %v3225_v22  ;;  %v2894_v2 = vmul.f32 0.5, %v2726_v3  ;;  %v2777_v26 = vadd.f32 %v2776_v34, %v6246_v16  ;;  %v2825_v54 = vpop.f32.mrf.mxu1 }
 0x72c   :  { %v3111_v1 = vadd.f32 1.0, %v4453_v43  ;;  %v2826_v5 = vadd.f32 %v2825_v54, %v6252_v47 }
 0x72d   :  { %v4455_v10 = vpop.eup %4454  ;;  %4458 = vtanh.f32 %v2894_v2  ;;  %v2902_v37 = vmul.f32 0.5, %v2777_v26 }
 0x72e   :  { %v4457_v8 = vpop.eup %4456  ;;  %v3223_v18 = vmul.f32 0.5, %v3111_v1  ;;  %v3119_v59 = vadd.f32 1.0, %v4455_v10  ;;  %v2903_v9 = vmul.f32 0.5, %v2826_v5 }
 0x72f   :  { %v3120_v7 = vadd.f32 1.0, %v4457_v8  ;;  %4460 = vtanh.f32 %v2902_v37 }
 0x730   :  { %3335 = vst [vmem:[%s6517_s21 + $0x138] sm:$0xff] %v3223_v18  ;;  %v3231_v27 = vmul.f32 0.5, %v3119_v59  ;;  %4462 = vtanh.f32 %v2903_v9  ;;  %v2727_v49 = vpop.f32.mrf.mxu3 }
 0x731   :  { %v3232_v48 = vmul.f32 0.5, %v3120_v7  ;;  %v2728_v63 = vadd.f32 %v2727_v49, %v6270_v4 }
 0x732   :  { %3343 = vst [vmem:[%s6517_s21 + $0x178] sm:$0xff] %v3231_v27  ;;  %v2779_v57 = vpop.f32.mrf.mxu0 }
 0x733   :  { %v4459_v23 = vpop.eup %4458  ;;  %3344 = vst.msk [vmem:[%s6517_s21 + $0x180] sm:$0xff] %vm633_vm0, %v3232_v48  ;;  %v2901_v0 = vmul.f32 0.5, %v2728_v63  ;;  %v2780_v53 = vadd.f32 %v2779_v57, %v6246_v16  ;;  %v2828_v62 = vpop.f32.mrf.mxu1 }
 0x734   :  { %v3118_v15 = vadd.f32 1.0, %v4459_v23  ;;  %v2829_v52 = vadd.f32 %v2828_v62, %v6252_v47 }
 0x735   :  { %v4461_v35 = vpop.eup %4460  ;;  %4464 = vtanh.f32 %v2901_v0  ;;  %v2909_v41 = vmul.f32 0.5, %v2780_v53 }
 0x736   :  { %v4463_v14 = vpop.eup %4462  ;;  %v3230_v12 = vmul.f32 0.5, %v3118_v15  ;;  %v3126_v6 = vadd.f32 1.0, %v4461_v35  ;;  %v2910_v29 = vmul.f32 0.5, %v2829_v52 }
 0x737   :  { %v3127_v19 = vadd.f32 1.0, %v4463_v14  ;;  %4466 = vtanh.f32 %v2909_v41 }
 0x738   :  { %3342 = vst [vmem:[%s6517_s21 + $0x170] sm:$0xff] %v3230_v12  ;;  %v3238_v17 = vmul.f32 0.5, %v3126_v6  ;;  %4468 = vtanh.f32 %v2910_v29  ;;  %v2730_v40 = vpop.f32.mrf.mxu3 }
 0x739   :  { %v3239_v46 = vmul.f32 0.5, %v3127_v19  ;;  %v2731_v11 = vadd.f32 %v2730_v40, %v6270_v4 }
 0x73a   :  { %3350 = vst [vmem:[%s6517_s21 + $0x1b0] sm:$0xff] %v3238_v17  ;;  %v2781_v28 = vpop.f32.mrf.mxu0 }
 0x73b   :  { %v4465_v58 = vpop.eup %4464  ;;  %3351 = vst.msk [vmem:[%s6517_s21 + $0x1b8] sm:$0xff] %vm633_vm0, %v3239_v46  ;;  %v2908_v51 = vmul.f32 0.5, %v2731_v11  ;;  %v2782_v38 = vadd.f32 %v2781_v28, %v6246_v16  ;;  %v2830_v56 = vpop.f32.mrf.mxu1 }
 0x73c   :  { %v3125_v24 = vadd.f32 1.0, %v4465_v58  ;;  %v2831_v30 = vadd.f32 %v2830_v56, %v6252_v47 }
 0x73d   :  { %v4467_v13 = vpop.eup %4466  ;;  %4470 = vtanh.f32 %v2908_v51  ;;  %v2916_v39 = vmul.f32 0.5, %v2782_v38 }
 0x73e   :  { %v4469_v42 = vpop.eup %4468  ;;  %v3237_v50 = vmul.f32 0.5, %v3125_v24  ;;  %v3133_v45 = vadd.f32 1.0, %v4467_v13  ;;  %v2917_v61 = vmul.f32 0.5, %v2831_v30 }
 0x73f   :  { %v3134_v55 = vadd.f32 1.0, %v4469_v42  ;;  %4472 = vtanh.f32 %v2916_v39 }
 0x740   :  { %3349 = vst [vmem:[%s6517_s21 + $0x1a8] sm:$0xff] %v3237_v50  ;;  %v3245_v21 = vmul.f32 0.5, %v3133_v45  ;;  %4474 = vtanh.f32 %v2917_v61  ;;  %v2732_v33 = vpop.f32.mrf.mxu3 }
 0x741   :  { %v3246_v60 = vmul.f32 0.5, %v3134_v55  ;;  %v2733_v31 = vadd.f32 %v2732_v33, %v6270_v4 }
 0x742   :  { %3357 = vst [vmem:[%s6517_s21 + $0x1e8] sm:$0xff] %v3245_v21  ;;  %v2784_v25 = vpop.f32.mrf.mxu0 }
 0x743   :  { %v4471_v44 = vpop.eup %4470  ;;  %3358 = vst.msk [vmem:[%s6517_s21 + $0x1f0] sm:$0xff] %vm633_vm0, %v3246_v60  ;;  %v2915_v32 = vmul.f32 0.5, %v2733_v31  ;;  %v2785_v20 = vadd.f32 %v2784_v25, %v6246_v16  ;;  %v2833_v36 = vpop.f32.mrf.mxu1 }
 0x744   :  { %v3132_v22 = vadd.f32 1.0, %v4471_v44  ;;  %v2834_v3 = vadd.f32 %v2833_v36, %v6252_v47 }
 0x745   :  { %v4473_v34 = vpop.eup %4472  ;;  %4476 = vtanh.f32 %v2915_v32  ;;  %v2923_v43 = vmul.f32 0.5, %v2785_v20 }
 0x746   :  { %v4475_v2 = vpop.eup %4474  ;;  %v3244_v26 = vmul.f32 0.5, %v3132_v22  ;;  %v3140_v54 = vadd.f32 1.0, %v4473_v34  ;;  %v2924_v1 = vmul.f32 0.5, %v2834_v3 }
 0x747   :  { %v3141_v5 = vadd.f32 1.0, %v4475_v2  ;;  %4478 = vtanh.f32 %v2923_v43 }
 0x748   :  { %3356 = vst [vmem:[%s6517_s21 + $0x1e0] sm:$0xff] %v3244_v26  ;;  %v3252_v10 = vmul.f32 0.5, %v3140_v54  ;;  %4480 = vtanh.f32 %v2924_v1  ;;  %v2735_v37 = vpop.f32.mrf.mxu3 }
 0x749   :  { %v3253_v8 = vmul.f32 0.5, %v3141_v5  ;;  %v2736_v18 = vadd.f32 %v2735_v37, %v6270_v4 }
 0x74a   :  { %3364 = vst [vmem:[%s6517_s21 + $0x220] sm:$0xff] %v3252_v10  ;;  %v2786_v59 = vpop.f32.mrf.mxu0 }
 0x74b   :  { %v4477_v9 = vpop.eup %4476  ;;  %3365 = vst.msk [vmem:[%s6517_s21 + $0x228] sm:$0xff] %vm633_vm0, %v3253_v8  ;;  %v2922_v7 = vmul.f32 0.5, %v2736_v18  ;;  %v2787_v27 = vadd.f32 %v2786_v59, %v6246_v16  ;;  %v2835_v49 = vpop.f32.mrf.mxu1 }
 0x74c   :  { %v3139_v48 = vadd.f32 1.0, %v4477_v9  ;;  %v2836_v63 = vadd.f32 %v2835_v49, %v6252_v47 }
 0x74d   :  { %v4479_v57 = vpop.eup %4478  ;;  %4482 = vtanh.f32 %v2922_v7  ;;  %v2930_v23 = vmul.f32 0.5, %v2787_v27 }
 0x74e   :  { %v4481_v0 = vpop.eup %4480  ;;  %v3251_v53 = vmul.f32 0.5, %v3139_v48  ;;  %v3147_v62 = vadd.f32 1.0, %v4479_v57  ;;  %v2931_v15 = vmul.f32 0.5, %v2836_v63 }
 0x74f   :  { %v3148_v52 = vadd.f32 1.0, %v4481_v0  ;;  %4484 = vtanh.f32 %v2930_v23 }
 0x750   :  { %3363 = vst [vmem:[%s6517_s21 + $0x218] sm:$0xff] %v3251_v53  ;;  %v3259_v35 = vmul.f32 0.5, %v3147_v62  ;;  %4486 = vtanh.f32 %v2931_v15  ;;  %v2737_v41 = vpop.f32.mrf.mxu3 }
 0x751   :  { %v3260_v14 = vmul.f32 0.5, %v3148_v52  ;;  %v2738_v12 = vadd.f32 %v2737_v41, %v6270_v4 }
 0x752   :  { %3371 = vst [vmem:[%s6517_s21 + $0x258] sm:$0xff] %v3259_v35  ;;  %v2789_v6 = vpop.f32.mrf.mxu0 }
 0x753   :  { %v4483_v29 = vpop.eup %4482  ;;  %3372 = vst.msk [vmem:[%s6517_s21 + $0x260] sm:$0xff] %vm633_vm0, %v3260_v14  ;;  %v2929_v19 = vmul.f32 0.5, %v2738_v12  ;;  %v2790_v17 = vadd.f32 %v2789_v6, %v6246_v16  ;;  %v2838_v40 = vpop.f32.mrf.mxu1 }
 0x754   :  { %v3146_v46 = vadd.f32 1.0, %v4483_v29  ;;  %v2839_v11 = vadd.f32 %v2838_v40, %v6252_v47 }
 0x755   :  { %v4485_v28 = vpop.eup %4484  ;;  %4488 = vtanh.f32 %v2929_v19  ;;  %v2937_v58 = vmul.f32 0.5, %v2790_v17 }
 0x756   :  { %v4487_v51 = vpop.eup %4486  ;;  %v3258_v38 = vmul.f32 0.5, %v3146_v46  ;;  %v3154_v56 = vadd.f32 1.0, %v4485_v28  ;;  %v2938_v24 = vmul.f32 0.5, %v2839_v11 }
 0x757   :  { %v3155_v30 = vadd.f32 1.0, %v4487_v51  ;;  %4490 = vtanh.f32 %v2937_v58 }
 0x758   :  { %3370 = vst [vmem:[%s6517_s21 + $0x250] sm:$0xff] %v3258_v38  ;;  %v3266_v13 = vmul.f32 0.5, %v3154_v56  ;;  %4492 = vtanh.f32 %v2938_v24  ;;  %v2740_v39 = vpop.f32.mrf.mxu3 }
 0x759   :  { %v3267_v42 = vmul.f32 0.5, %v3155_v30  ;;  %v2741_v50 = vadd.f32 %v2740_v39, %v6270_v4 }
 0x75a   :  { %3378 = vst [vmem:[%s6517_s21 + $0x290] sm:$0xff] %v3266_v13  ;;  %v2791_v45 = vpop.f32.mrf.mxu0 }
 0x75b   :  { %v4489_v61 = vpop.eup %4488  ;;  %3379 = vst.msk [vmem:[%s6517_s21 + $0x298] sm:$0xff] %vm633_vm0, %v3267_v42  ;;  %v2936_v55 = vmul.f32 0.5, %v2741_v50  ;;  %v2792_v21 = vadd.f32 %v2791_v45, %v6246_v16  ;;  %v2840_v33 = vpop.f32.mrf.mxu1 }
 0x75c   :  { %v3153_v60 = vadd.f32 1.0, %v4489_v61  ;;  %v2841_v31 = vadd.f32 %v2840_v33, %v6252_v47 }
 0x75d   :  { %v4491_v25 = vpop.eup %4490  ;;  %4494 = vtanh.f32 %v2936_v55  ;;  %v2944_v44 = vmul.f32 0.5, %v2792_v21 }
 0x75e   :  { %v4493_v32 = vpop.eup %4492  ;;  %v3265_v20 = vmul.f32 0.5, %v3153_v60  ;;  %v3161_v36 = vadd.f32 1.0, %v4491_v25  ;;  %v2945_v22 = vmul.f32 0.5, %v2841_v31 }
 0x75f   :  { %v3162_v3 = vadd.f32 1.0, %v4493_v32  ;;  %4496 = vtanh.f32 %v2944_v44 }
 0x760   :  { %3377 = vst [vmem:[%s6517_s21 + $0x288] sm:$0xff] %v3265_v20  ;;  %v3273_v34 = vmul.f32 0.5, %v3161_v36  ;;  %4498 = vtanh.f32 %v2945_v22  ;;  %v2742_v43 = vpop.f32.mrf.mxu3 }
 0x761   :  { %v3274_v2 = vmul.f32 0.5, %v3162_v3  ;;  %v2743_v26 = vadd.f32 %v2742_v43, %v6270_v4 }
 0x762   :  { %3385 = vst [vmem:[%s6517_s21 + $0x2c8] sm:$0xff] %v3273_v34  ;;  %v2794_v54 = vpop.f32.mrf.mxu0 }
 0x763   :  { %v4495_v1 = vpop.eup %4494  ;;  %3386 = vst.msk [vmem:[%s6517_s21 + $0x2d0] sm:$0xff] %vm633_vm0, %v3274_v2  ;;  %v2943_v5 = vmul.f32 0.5, %v2743_v26  ;;  %v2795_v10 = vadd.f32 %v2794_v54, %v6246_v16  ;;  %v2843_v37 = vpop.f32.mrf.mxu1 }
 0x764   :  { %v3160_v8 = vadd.f32 1.0, %v4495_v1  ;;  %v2844_v18 = vadd.f32 %v2843_v37, %v6252_v47 }
 0x765   :  { %v4497_v59 = vpop.eup %4496  ;;  %4500 = vtanh.f32 %v2943_v5  ;;  %v2951_v9 = vmul.f32 0.5, %v2795_v10 }
 0x766   :  { %v4499_v7 = vpop.eup %4498  ;;  %v3272_v27 = vmul.f32 0.5, %v3160_v8  ;;  %v3168_v49 = vadd.f32 1.0, %v4497_v59  ;;  %v2952_v48 = vmul.f32 0.5, %v2844_v18 }
 0x767   :  { %v3169_v63 = vadd.f32 1.0, %v4499_v7  ;;  %4502 = vtanh.f32 %v2951_v9 }
 0x768   :  { %3384 = vst [vmem:[%s6517_s21 + $0x2c0] sm:$0xff] %v3272_v27  ;;  %v3280_v57 = vmul.f32 0.5, %v3168_v49  ;;  %4504 = vtanh.f32 %v2952_v48  ;;  %v2745_v23 = vpop.f32.mrf.mxu3 }
 0x769   :  { %v3281_v0 = vmul.f32 0.5, %v3169_v63  ;;  %v2746_v53 = vadd.f32 %v2745_v23, %v6270_v4 }
 0x76a   :  { %3392 = vst [vmem:[%s6517_s21 + $0x300] sm:$0xff] %v3280_v57  ;;  %v2796_v62 = vpop.f32.mrf.mxu0 }
 0x76b   :  { %v4501_v15 = vpop.eup %4500  ;;  %3393 = vst.msk [vmem:[%s6517_s21 + $0x308] sm:$0xff] %vm633_vm0, %v3281_v0  ;;  %v2950_v52 = vmul.f32 0.5, %v2746_v53  ;;  %v2797_v35 = vadd.f32 %v2796_v62, %v6246_v16  ;;  %v2845_v41 = vpop.f32.mrf.mxu1 }
 0x76c   :  { %v3167_v14 = vadd.f32 1.0, %v4501_v15  ;;  %v2846_v12 = vadd.f32 %v2845_v41, %v6252_v47 }
 0x76d   :  { %v4503_v6 = vpop.eup %4502  ;;  %4506 = vtanh.f32 %v2950_v52  ;;  %v2958_v29 = vmul.f32 0.5, %v2797_v35 }
 0x76e   :  { %v4505_v19 = vpop.eup %4504  ;;  %v3279_v17 = vmul.f32 0.5, %v3167_v14  ;;  %v3175_v40 = vadd.f32 1.0, %v4503_v6  ;;  %v2959_v46 = vmul.f32 0.5, %v2846_v12 }
 0x76f   :  { %v3176_v11 = vadd.f32 1.0, %v4505_v19  ;;  %4508 = vtanh.f32 %v2958_v29 }
 0x770   :  { %3391 = vst [vmem:[%s6517_s21 + $0x2f8] sm:$0xff] %v3279_v17  ;;  %v3287_v28 = vmul.f32 0.5, %v3175_v40  ;;  %4510 = vtanh.f32 %v2959_v46  ;;  %v2747_v16 = vpop.f32.mrf.mxu3 }
 0x771   :  { %v3288_v58 = vmul.f32 0.5, %v3176_v11  ;;  %v2748_v51 = vadd.f32 %v2747_v16, %v6270_v4 }
 0x772   :  { %3399 = vst [vmem:[%s6517_s21 + $0x338] sm:$0xff] %v3287_v28 }
 0x773   :  { %v4507_v47 = vpop.eup %4506  ;;  %3400 = vst.msk [vmem:[%s6517_s21 + $0x340] sm:$0xff] %vm633_vm0, %v3288_v58  ;;  %v2957_v38 = vmul.f32 0.5, %v2748_v51 }
 0x774   :  { %v3174_v56 = vadd.f32 1.0, %v4507_v47 }
 0x775   :  { %v4509_v24 = vpop.eup %4508  ;;  %4512 = vtanh.f32 %v2957_v38 }
 0x776   :  { %v4511_v30 = vpop.eup %4510  ;;  %v3286_v13 = vmul.f32 0.5, %v3174_v56  ;;  %v3182_v39 = vadd.f32 1.0, %v4509_v24 }
 0x777   :  { %v3183_v42 = vadd.f32 1.0, %v4511_v30 }
 0x778   :  { %3398 = vst [vmem:[%s6517_s21 + $0x330] sm:$0xff] %v3286_v13  ;;  %v3294_v4 = vmul.f32 0.5, %v3182_v39 }
 0x779   :  { %v3295_v50 = vmul.f32 0.5, %v3183_v42 }
 0x77a   :  { %3406 = vst [vmem:[%s6517_s21 + $0x370] sm:$0xff] %v3294_v4 }
 0x77b   :  { %v4513_v45 = vpop.eup %4512  ;;  %3407 = vst.msk [vmem:[%s6517_s21 + $0x378] sm:$0xff] %vm633_vm0, %v3295_v50 }
 0x77c   :  { %v3181_v61 = vadd.f32 1.0, %v4513_v45 }
 0x77e   :  { %v3293_v55 = vmul.f32 0.5, %v3181_v61 }
 0x780   :  { %3405 = vst [vmem:[%s6517_s21 + $0x368] sm:$0xff] %v3293_v55 }

</bundles_post_ra>
